<compile_context>
chip_gen: v6e
topology: v6e:2x2x1
jax: 0.10.0
libtpu: 0.0.40
codegen_flags: <defaults>
</compile_context>

<pallas_src>
import functools
import math

import jax
import jax.numpy as jnp
import numpy as np
from jax.experimental import pallas as pl
from jax.experimental.pallas import tpu as pltpu

_INV_SQRT2 = 1.0 / math.sqrt(2.0)
_MASK_VALUE = -1e30  # large finite negative (avoids inf-inf NaN risk)


# ----------------------------------------------------------------------------
# Small helpers
# ----------------------------------------------------------------------------
def _round_up(x, m):
    return (x + m - 1) // m * m


def _pick_tile(dim, target, align):
    """Largest divisor of `dim` that is a multiple of `align` and <= target.

    Falls back to the full dim if it is already <= target or no aligned divisor
    exists (keeps index maps exact — no ragged last tile)."""
    if dim <= target:
        return dim
    t = (target // align) * align
    while t >= align:
        if dim % t == 0:
            return t
        t -= align
    return dim


@functools.lru_cache(maxsize=None)
def _vmem_limit_bytes():
    """Chip-aware VMEM limit: ~75% of physical capacity (96 MiB on v5e/v6e,
    ~48 MiB on v7x) so Mosaic internal scratch + double buffers have headroom."""
    try:
        info = pltpu.get_tpu_info()
        cap = getattr(info, "vmem_capacity_bytes", 0) or 0
        if cap > 0:
            return int(cap) * 3 // 4
    except Exception:
        pass
    return 64 * 1024 * 1024


def _erf(x, approx_recip):
    # Abramowitz & Stegun 7.1.26 rational approximation (|err| < 1.5e-7).
    # TODO(synk): exact erf (nn.GELU default) has no direct Mosaic lowering;
    # this matches it to ~1e-7 in f32.
    a1, a2, a3, a4, a5 = 0.254829592, -0.284496736, 1.421413741, -1.453152027, 1.061405429
    p = 0.3275911
    s = jnp.sign(x)
    ax = jnp.abs(x)
    t = pl.reciprocal(1.0 + p * ax, approx=approx_recip)   # EUP slot
    poly = ((((a5 * t + a4) * t + a3) * t + a2) * t + a1) * t
    return s * (1.0 - poly * jnp.exp(-ax * ax))


def _gelu(x, approx_recip=False):
    return 0.5 * x * (1.0 + _erf(x * _INV_SQRT2, approx_recip))


# ----------------------------------------------------------------------------
# Kernel: fused LayerNorm + Linear (+ optional GELU)
#   grid = (M_tiles, N_tiles); full K row-block resident, LN computed once per
#   M-tile (j == 0) and cached in a VMEM scratch at the compute dtype.
# ----------------------------------------------------------------------------
def _ln_linear_kernel(x_ref, g_ref, b_ref, w_ref, *rest, activation, has_bias,
                      approx_recip):
    if has_bias:
        bias_ref, o_ref, xn_ref = rest
    else:
        bias_ref = None
        o_ref, xn_ref = rest

    @pl.when(pl.program_id(1) == 0)
    def _():
        x = x_ref[...].astype(jnp.float32)
        mu = jnp.mean(x, axis=-1, keepdims=True)
        xc = x - mu
        var = jnp.mean(xc * xc, axis=-1, keepdims=True)
        h = xc * jax.lax.rsqrt(var + 1e-5)
        h = h * g_ref[...].astype(jnp.float32) + b_ref[...].astype(jnp.float32)
        xn_ref[...] = h.astype(xn_ref.dtype)

    # Matmul at the streamed dtype (bf16 or f32) with f32 accumulation.
    y = jnp.dot(xn_ref[...], w_ref[...], preferred_element_type=jnp.float32)
    if has_bias:
        y = y + bias_ref[...].astype(jnp.float32)
    if activation == "gelu":
        y = _gelu(y, approx_recip)
    o_ref[...] = y.astype(o_ref.dtype)


def ln_linear(x2d, g, b, w, bias=None, *, activation=None,
              tm_target=512, tn_target=512):
    n, k = x2d.shape
    k2, o = w.shape
    assert k == k2, (k, k2)
    is_bf16 = x2d.dtype == jnp.bfloat16
    tm = _pick_tile(n, tm_target, 16 if is_bf16 else 8)
    tn = _pick_tile(o, tn_target, 128)
    grid = (n // tm, o // tn)
    has_bias = bias is not None
    kern = functools.partial(_ln_linear_kernel, activation=activation,
                             has_bias=has_bias, approx_recip=is_bf16)

    in_specs = [
        pl.BlockSpec((tm, k), lambda i, j: (i, 0)),   # x row block (full K)
        pl.BlockSpec((1, k), lambda i, j: (0, 0)),    # ln gamma
        pl.BlockSpec((1, k), lambda i, j: (0, 0)),    # ln beta
        pl.BlockSpec((k, tn), lambda i, j: (0, j)),   # weight tile
    ]
    args = [x2d, g.reshape(1, k), b.reshape(1, k), w]
    if has_bias:
        in_specs.append(pl.BlockSpec((1, tn), lambda i, j: (0, j)))
        args.append(bias.reshape(1, o))

    return pl.pallas_call(
        kern,
        grid=grid,
        in_specs=in_specs,
        out_specs=pl.BlockSpec((tm, tn), lambda i, j: (i, j)),
        out_shape=jax.ShapeDtypeStruct((n, o), x2d.dtype),
        scratch_shapes=[pltpu.VMEM((tm, k), x2d.dtype)],   # cached normalized rows
        compiler_params=pltpu.CompilerParams(
            dimension_semantics=("parallel", "arbitrary"),
            vmem_limit_bytes=_vmem_limit_bytes()),
    )(*args)


# ----------------------------------------------------------------------------
# Kernel: Linear + bias + residual add, with K-reduction grid axis and
# f32 VMEM accumulator (pl.when init / finalize).
# ----------------------------------------------------------------------------
def _linear_residual_kernel(x_ref, w_ref, b_ref, r_ref, o_ref, acc_ref):
    @pl.when(pl.program_id(2) == 0)
    def _():
        acc_ref[...] = jnp.zeros(acc_ref.shape, jnp.float32)

    acc_ref[...] += jnp.dot(x_ref[...], w_ref[...],
                            preferred_element_type=jnp.float32)

    @pl.when(pl.program_id(2) == pl.num_programs(2) - 1)
    def _():
        y = acc_ref[...] + b_ref[...].astype(jnp.float32) + r_ref[...].astype(jnp.float32)
        o_ref[...] = y.astype(o_ref.dtype)


def linear_residual(x2d, w, bias, residual, *, tm_target=512, tn_target=512,
                    tk_target=512):
    n, k = x2d.shape
    k2, o = w.shape
    assert k == k2 and residual.shape == (n, o)
    is_bf16 = x2d.dtype == jnp.bfloat16
    tm = _pick_tile(n, tm_target, 16 if is_bf16 else 8)
    tn = _pick_tile(o, tn_target, 128)
    tk = _pick_tile(k, tk_target, 128)
    grid = (n // tm, o // tn, k // tk)
    return pl.pallas_call(
        _linear_residual_kernel,
        grid=grid,
        in_specs=[
            pl.BlockSpec((tm, tk), lambda i, j, kk: (i, kk)),
            pl.BlockSpec((tk, tn), lambda i, j, kk: (kk, j)),
            pl.BlockSpec((1, tn), lambda i, j, kk: (0, j)),
            pl.BlockSpec((tm, tn), lambda i, j, kk: (i, j)),   # residual
        ],
        out_specs=pl.BlockSpec((tm, tn), lambda i, j, kk: (i, j)),
        out_shape=jax.ShapeDtypeStruct((n, o), x2d.dtype),
        scratch_shapes=[pltpu.VMEM((tm, tn), jnp.float32)],
        compiler_params=pltpu.CompilerParams(
            dimension_semantics=("parallel", "parallel", "arbitrary"),
            vmem_limit_bytes=_vmem_limit_bytes()),
    )(x2d, w, bias.reshape(1, o), residual)


# ----------------------------------------------------------------------------
# Kernel: flash-style causal attention, reading q/k/v directly from the
# (B*T, 3C) qkv buffer and writing directly into the (B*T, C) output layout.
#   grid = (B, head_groups, q_tiles, kv_tiles); heads are grouped so every
#   block's last dim is a lane-dense 128 multiple; online softmax; the kv block
#   index is clamped to the diagonal so masked tiles are neither fetched nor
#   computed; output finalized at the diagonal tile.
# ----------------------------------------------------------------------------
def _flash_attn_kernel(q_ref, k_ref, v_ref, o_ref, m_ref, l_ref, acc_ref, *,
                       hpb, hd, scale, approx_recip):
    qi = pl.program_id(2)
    ki = pl.program_id(3)

    @pl.when(ki == 0)
    def _():
        m_ref[...] = jnp.full(m_ref.shape, _MASK_VALUE, jnp.float32)
        l_ref[...] = jnp.zeros(l_ref.shape, jnp.float32)
        acc_ref[...] = jnp.zeros(acc_ref.shape, jnp.float32)

    def step(masked):
        q = q_ref[...] * scale          # stays at the streamed dtype (bf16/f32)
        k = k_ref[...]
        v = v_ref[...]
        if masked:
            tq, tkv = q.shape[0], k.shape[0]
            # Diagonal tile with tq == tkv: mask depends only on local indices.
            rows = jax.lax.broadcasted_iota(jnp.int32, (tq, tkv), 0)
            cols = jax.lax.broadcasted_iota(jnp.int32, (tq, tkv), 1)
            keep = cols <= rows
        for h in range(hpb):            # per-head matmuls inside the grouped block
            sl = slice(h * hd, (h + 1) * hd)
            s = jnp.dot(q[:, sl], k[:, sl].T, preferred_element_type=jnp.float32)
            if masked:
                s = jnp.where(keep, s, _MASK_VALUE)
            m_prev = m_ref[h]
            m_new = jnp.maximum(m_prev, jnp.max(s, axis=-1, keepdims=True))
            alpha = jnp.exp(m_prev - m_new)
            p = jnp.exp(s - m_new)
            l_ref[h] = alpha * l_ref[h] + jnp.sum(p, axis=-1, keepdims=True)
            acc_ref[h] = alpha * acc_ref[h] + jnp.dot(
                p.astype(v.dtype), v[:, sl], preferred_element_type=jnp.float32)
            m_ref[h] = m_new

    # Strictly below the diagonal: no mask needed (skip iota + select VPU work).
    @pl.when(ki < qi)
    def _():
        step(masked=False)

    # Diagonal tile: masked scores, then finalize immediately — later kv steps
    # for this q tile neither DMA (clamped index map) nor compute.
    @pl.when(ki == qi)
    def _():
        step(masked=True)
        outs = []
        for h in range(hpb):
            inv_l = pl.reciprocal(l_ref[h], approx=approx_recip)
            outs.append(acc_ref[h] * inv_l)
        o_ref[...] = jnp.concatenate(outs, axis=-1).astype(o_ref.dtype)


def flash_causal_attention(qkv, B, T, n_head, head_dim):
    C = n_head * head_dim
    assert qkv.shape == (B * T, 3 * C)

    # Group heads so the last block dim is a lane-dense multiple of 128
    # (real GPT-2: head_dim=64 -> 2 heads per block).
    hpb = 1
    if head_dim < 128 and 128 % head_dim == 0:
        hpb = 128 // head_dim
        while hpb > 1 and n_head % hpb != 0:
            hpb //= 2
    # TODO(synk): configs where hpb*head_dim is still not a 128 multiple would
    # produce masked partial stores; all GPT-2 variants (hd=64) are covered.
    ng = n_head // hpb
    bw = hpb * head_dim

    is_bf16 = qkv.dtype == jnp.bfloat16
    tq = _pick_tile(T, 256, 16 if is_bf16 else 8)
    tkv = tq   # equal tiles so the diagonal block is exactly ki == qi
    nq, nkv = T // tq, T // tkv
    scale = 1.0 / math.sqrt(head_dim)
    kern = functools.partial(_flash_attn_kernel, hpb=hpb, hd=head_dim,
                             scale=scale, approx_recip=is_bf16)

    # Clamp the kv block index to the diagonal: for ki > qi the index map
    # returns the same block as the previous step, so Pallas skips the DMA of
    # fully-masked K/V tiles (pl.when alone only skips compute, not the fetch).
    q_map = lambda b, g, qi, ki: (b * nq + qi, g)
    k_map = lambda b, g, qi, ki: (b * nkv + jnp.minimum(ki, qi), ng + g)
    v_map = lambda b, g, qi, ki: (b * nkv + jnp.minimum(ki, qi), 2 * ng + g)
    o_map = lambda b, g, qi, ki: (b * nq + qi, g)

    return pl.pallas_call(
        kern,
        grid=(B, ng, nq, nkv),
        in_specs=[
            pl.BlockSpec((tq, bw), q_map),
            pl.BlockSpec((tkv, bw), k_map),
            pl.BlockSpec((tkv, bw), v_map),
        ],
        out_specs=pl.BlockSpec((tq, bw), o_map),
        out_shape=jax.ShapeDtypeStruct((B * T, C), qkv.dtype),
        scratch_shapes=[
            pltpu.VMEM((hpb, tq, 1), jnp.float32),          # running max m
            pltpu.VMEM((hpb, tq, 1), jnp.float32),          # running denom l
            pltpu.VMEM((hpb, tq, head_dim), jnp.float32),   # output accumulator
        ],
        compiler_params=pltpu.CompilerParams(
            dimension_semantics=("parallel", "parallel", "parallel", "arbitrary"),
            vmem_limit_bytes=_vmem_limit_bytes()),
    )(qkv, qkv, qkv)


# ----------------------------------------------------------------------------
# GPT forward (Pallas kernels) + pure-JAX reference
# ----------------------------------------------------------------------------
def prepare_params(params, cfg, dtype=jnp.float32):
    """One-time setup: cast params to the compute dtype (bf16 streams the MXU
    at ~4x throughput with f32 accumulation) and pad the lm_head vocab to a
    128 multiple once (not per forward call)."""
    V = cfg["vocab_size"]
    Vp = _round_up(V, 128)
    prepped = jax.tree_util.tree_map(lambda t: t.astype(dtype), params)
    w = prepped["lm_head_w"]
    if Vp != V:
        w = jnp.pad(w, ((0, 0), (0, Vp - V)))
    prepped["lm_head_w"] = w
    return prepped


def gpt_forward(params, idx, cfg):
    """Forward pass. `params` must come from prepare_params (padded lm_head;
    all tensors share one compute dtype)."""
    B, T = idx.shape
    C, nh = cfg["n_embd"], cfg["n_head"]
    hd = C // nh
    V = cfg["vocab_size"]

    # TODO(synk): token/position embedding gather stays in plain JAX glue.
    x = params["wte"][idx] + params["wpe"][:T][None]          # (B, T, C)
    x2 = x.reshape(B * T, C)

    for blk in params["blocks"]:
        # attention: fused LN+QKV -> flash attention -> fused proj+residual
        qkv = ln_linear(x2, blk["ln1_g"], blk["ln1_b"], blk["attn_w"], blk["attn_b"])
        y = flash_causal_attention(qkv, B, T, nh, hd)
        x2 = linear_residual(y, blk["proj_w"], blk["proj_b"], x2)
        # MLP: fused LN+fc+GELU -> fused proj+residual
        h = ln_linear(x2, blk["ln2_g"], blk["ln2_b"], blk["fc_w"], blk["fc_b"],
                      activation="gelu")
        x2 = linear_residual(h, blk["mlp_proj_w"], blk["mlp_proj_b"], x2)

    # final LN fused into lm_head (no bias): large resident M tile so the padded
    # vocab weight streams through VMEM as few times as possible.
    logits = ln_linear(x2, params["lnf_g"], params["lnf_b"], params["lm_head_w"],
                       None, tm_target=1024)
    return logits[:, :V].reshape(B, T, V)


def gpt_reference(params, idx, cfg):
    B, T = idx.shape
    C, nh = cfg["n_embd"], cfg["n_head"]
    hd = C // nh

    def ln(x, g, b):
        mu = x.mean(-1, keepdims=True)
        var = ((x - mu) ** 2).mean(-1, keepdims=True)
        return (x - mu) / jnp.sqrt(var + 1e-5) * g + b

    x = params["wte"][idx] + params["wpe"][:T][None]
    for blk in params["blocks"]:
        h = ln(x, blk["ln1_g"], blk["ln1_b"])
        qkv = h @ blk["attn_w"] + blk["attn_b"]
        q, k, v = jnp.split(qkv, 3, axis=-1)
        q = q.reshape(B, T, nh, hd).transpose(0, 2, 1, 3)
        k = k.reshape(B, T, nh, hd).transpose(0, 2, 1, 3)
        v = v.reshape(B, T, nh, hd).transpose(0, 2, 1, 3)
        att = (q @ jnp.swapaxes(k, -1, -2)) * (1.0 / math.sqrt(hd))
        mask = jnp.tril(jnp.ones((T, T), bool))
        att = jnp.where(mask, att, -jnp.inf)
        att = jax.nn.softmax(att, axis=-1)
        y = (att @ v).transpose(0, 2, 1, 3).reshape(B, T, C)
        x = x + (y @ blk["proj_w"] + blk["proj_b"])
        h = ln(x, blk["ln2_g"], blk["ln2_b"])
        h = jax.nn.gelu(h @ blk["fc_w"] + blk["fc_b"], approximate=False)
        x = x + (h @ blk["mlp_proj_w"] + blk["mlp_proj_b"])
    x = ln(x, params["lnf_g"], params["lnf_b"])
    return x @ params["lm_head_w"]


# ----------------------------------------------------------------------------
# Deterministic parameter init (synthetic; no checkpoint loading)
# ----------------------------------------------------------------------------
def init_params(key, cfg):
    C, V, S, L = cfg["n_embd"], cfg["vocab_size"], cfg["block_size"], cfg["n_layer"]
    keys = iter(jax.random.split(key, 3 + 8 * L))

    def nrm(shape, std=0.02):
        return (std * jax.random.normal(next(keys), shape)).astype(jnp.float32)

    params = dict(
        wte=nrm((V, C)),
        wpe=nrm((S, C), 0.01),
        lnf_g=jnp.ones((C,), jnp.float32),
        lnf_b=jnp.zeros((C,), jnp.float32),
        blocks=[],
    )
    for _ in range(L):
        params["blocks"].append(dict(
            ln1_g=jnp.ones((C,), jnp.float32),
            ln1_b=jnp.zeros((C,), jnp.float32),
            attn_w=nrm((C, 3 * C)),
            attn_b=nrm((3 * C,), 0.02),
            proj_w=nrm((C, C)),
            proj_b=nrm((C,), 0.02),
            ln2_g=jnp.ones((C,), jnp.float32),
            ln2_b=jnp.zeros((C,), jnp.float32),
            fc_w=nrm((C, 4 * C)),
            fc_b=nrm((4 * C,), 0.02),
            mlp_proj_w=nrm((4 * C, C)),
            mlp_proj_b=nrm((C,), 0.02),
        ))
    params["lm_head_w"] = nrm((C, V))  # stored (in, out); nn.Linear applies x @ W.T
    return params


if __name__ == "__main__":
    # Config exercises the real GPT-2 block shapes: head_dim=64 (2 heads grouped
    # per 128-wide attention block), multi-tile attention (T=512 -> 2x2 q/kv
    # tiles so the causal DMA-clamp + no-mask branch actually run), K-reduction
    # accumulators in the MLP proj, and the lm_head vocab padding (1000 -> 1024).
    cfg = dict(block_size=512, vocab_size=1000, n_layer=2, n_head=4, n_embd=256)
    B, T = 2, 512

    key = jax.random.PRNGKey(0)
    pkey, ikey = jax.random.split(key)
    params = init_params(pkey, cfg)
    idx = jax.random.randint(ikey, (B, T), 0, cfg["vocab_size"], dtype=jnp.int32)

    ref = jax.block_until_ready(gpt_reference(params, idx, cfg))

    # f32 path: exact reciprocals, f32 MXU accumulation -> tight tolerance.
    p32 = prepare_params(params, cfg, jnp.float32)
    out32 = jax.block_until_ready(gpt_forward(p32, idx, cfg))
    assert out32.shape == (B, T, cfg["vocab_size"]), out32.shape
    np.testing.assert_allclose(np.asarray(out32), np.asarray(ref),
                               rtol=2e-3, atol=2e-3)

    # bf16 path: weights/activations stream the MXU in bf16 (f32 accumulation);
    # loose sanity tolerance against the f32 reference.
    pbf = prepare_params(params, cfg, jnp.bfloat16)
    outbf = jax.block_until_ready(gpt_forward(pbf, idx, cfg))
    assert outbf.shape == (B, T, cfg["vocab_size"]), outbf.shape
    np.testing.assert_allclose(np.asarray(outbf, dtype=np.float32),
                               np.asarray(ref), rtol=1e-1, atol=1e-1)

    print("KERNEL_OK")
</pallas_src>

<mosaic_0001>
module attributes {stable_mosaic.version = 11 : i64} {
  func.func @_ln_linear_kernel(%arg0: i32, %arg1: i32, %arg2: memref<512x256xf32, #tpu.memory_space<vmem>>, %arg3: memref<1x256xf32, #tpu.memory_space<vmem>>, %arg4: memref<1x256xf32, #tpu.memory_space<vmem>>, %arg5: memref<256x384xf32, #tpu.memory_space<vmem>>, %arg6: memref<1x384xf32, #tpu.memory_space<vmem>>, %arg7: memref<512x384xf32, #tpu.memory_space<vmem>>, %arg8: memref<512x256xf32, #tpu.memory_space<vmem>>) attributes {dimension_semantics = [#tpu.dimension_semantics<parallel>, #tpu.dimension_semantics<arbitrary>], iteration_bounds = array<i64: 2, 2>, scalar_prefetch = 0 : i64, scratch_operands = 1 : i64, tpu.core_type = #tpu.core_type<tc>, window_params = [{transform_indices = @transform_0, window_bounds = array<i64: 512, 256>}, {pipeline_mode = #tpu.pipeline_mode<synchronous>, transform_indices = @transform_1, window_bounds = array<i64: 1, 256>}, {pipeline_mode = #tpu.pipeline_mode<synchronous>, transform_indices = @transform_2, window_bounds = array<i64: 1, 256>}, {transform_indices = @transform_3, window_bounds = array<i64: 256, 384>}, {transform_indices = @transform_4, window_bounds = array<i64: 1, 384>}, {transform_indices = @transform_5, window_bounds = array<i64: 512, 384>}]} {
    %c0_i32 = arith.constant 0 : i32
    %0 = arith.cmpi eq, %arg1, %c0_i32 : i32
    %1 = arith.extui %0 : i1 to i32
    %c0_i32_0 = arith.constant 0 : i32
    %2 = arith.cmpi ne, %1, %c0_i32_0 : i32
    scf.if %2 {
      %c0_8 = arith.constant 0 : index
      %c0_9 = arith.constant 0 : index
      %10 = vector.load %arg2[%c0_8, %c0_9] : memref<512x256xf32, #tpu.memory_space<vmem>>, vector<512x256xf32>
      %cst_10 = arith.constant dense<0.000000e+00> : vector<512xf32>
      %11 = vector.multi_reduction <add>, %10, %cst_10 [1] : vector<512x256xf32> to vector<512xf32>
      %12 = vector.shape_cast %11 : vector<512xf32> to vector<512x1xf32>
      %cst_11 = arith.constant 2.560000e+02 : f32
      %13 = vector.broadcast %cst_11 : f32 to vector<512x1xf32>
      %14 = arith.divf %12, %13 : vector<512x1xf32>
      %15 = vector.broadcast %14 : vector<512x1xf32> to vector<512x256xf32>
      %16 = arith.subf %10, %15 : vector<512x256xf32>
      %17 = arith.mulf %16, %16 : vector<512x256xf32>
      %cst_12 = arith.constant dense<0.000000e+00> : vector<512xf32>
      %18 = vector.multi_reduction <add>, %17, %cst_12 [1] : vector<512x256xf32> to vector<512xf32>
      %19 = vector.shape_cast %18 : vector<512xf32> to vector<512x1xf32>
      %cst_13 = arith.constant 2.560000e+02 : f32
      %20 = vector.broadcast %cst_13 : f32 to vector<512x1xf32>
      %21 = arith.divf %19, %20 : vector<512x1xf32>
      %cst_14 = arith.constant 9.99999974E-6 : f32
      %22 = vector.broadcast %cst_14 : f32 to vector<512x1xf32>
      %23 = arith.addf %21, %22 : vector<512x1xf32>
      %24 = math.rsqrt %23 : vector<512x1xf32>
      %25 = vector.broadcast %24 : vector<512x1xf32> to vector<512x256xf32>
      %26 = arith.mulf %16, %25 : vector<512x256xf32>
      %c0_15 = arith.constant 0 : index
      %c0_16 = arith.constant 0 : index
      %27 = vector.load %arg3[%c0_15, %c0_16] : memref<1x256xf32, #tpu.memory_space<vmem>>, vector<1x256xf32>
      %28 = vector.broadcast %27 : vector<1x256xf32> to vector<512x256xf32>
      %29 = arith.mulf %26, %28 : vector<512x256xf32>
      %c0_17 = arith.constant 0 : index
      %c0_18 = arith.constant 0 : index
      %30 = vector.load %arg4[%c0_17, %c0_18] : memref<1x256xf32, #tpu.memory_space<vmem>>, vector<1x256xf32>
      %31 = vector.broadcast %30 : vector<1x256xf32> to vector<512x256xf32>
      %32 = arith.addf %29, %31 : vector<512x256xf32>
      %c0_19 = arith.constant 0 : index
      %c0_20 = arith.constant 0 : index
      %33 = vector.load %arg8[%c0_19, %c0_20] : memref<512x256xf32, #tpu.memory_space<vmem>>, vector<512x256xf32>
      tpu.vector_store %arg8[%c0_19, %c0_20], %32 {strides = array<i32>} : memref<512x256xf32, #tpu.memory_space<vmem>>, vector<512x256xf32>,
    } else {
    }
    %c0 = arith.constant 0 : index
    %c0_1 = arith.constant 0 : index
    %3 = vector.load %arg8[%c0, %c0_1] : memref<512x256xf32, #tpu.memory_space<vmem>>, vector<512x256xf32>
    %c0_2 = arith.constant 0 : index
    %c0_3 = arith.constant 0 : index
    %4 = vector.load %arg5[%c0_2, %c0_3] : memref<256x384xf32, #tpu.memory_space<vmem>>, vector<256x384xf32>
    %cst = arith.constant dense<0.000000e+00> : vector<512x384xf32>
    %5 = tpu.matmul %3, %4, %cst {dimension_numbers = #tpu.dot_dimension_numbers<[1], [0], [0], [1], [0, 0, 1, 1], [], []>} : vector<512x256xf32>, vector<256x384xf32>, vector<512x384xf32> -> vector<512x384xf32>
    %c0_4 = arith.constant 0 : index
    %c0_5 = arith.constant 0 : index
    %6 = vector.load %arg6[%c0_4, %c0_5] : memref<1x384xf32, #tpu.memory_space<vmem>>, vector<1x384xf32>
    %7 = vector.broadcast %6 : vector<1x384xf32> to vector<512x384xf32>
    %8 = arith.addf %5, %7 : vector<512x384xf32>
    %c0_6 = arith.constant 0 : index
    %c0_7 = arith.constant 0 : index
    %9 = vector.load %arg7[%c0_6, %c0_7] : memref<512x384xf32, #tpu.memory_space<vmem>>, vector<512x384xf32>
    tpu.vector_store %arg7[%c0_6, %c0_7], %8 {strides = array<i32>} : memref<512x384xf32, #tpu.memory_space<vmem>>, vector<512x384xf32>,
    return
  }
  func.func @transform_0(%arg0: i32, %arg1: i32) -> (i32, i32) {
    %c0_i32 = arith.constant 0 : i32
    %c0_i32_0 = arith.constant 0 : i32
    return %arg0, %c0_i32 : i32, i32
  }
  func.func @transform_1(%arg0: i32, %arg1: i32) -> (i32, i32) {
    %c0_i32 = arith.constant 0 : i32
    %c0_i32_0 = arith.constant 0 : i32
    %c0_i32_1 = arith.constant 0 : i32
    return %c0_i32, %c0_i32_0 : i32, i32
  }
  func.func @transform_2(%arg0: i32, %arg1: i32) -> (i32, i32) {
    %c0_i32 = arith.constant 0 : i32
    %c0_i32_0 = arith.constant 0 : i32
    %c0_i32_1 = arith.constant 0 : i32
    return %c0_i32, %c0_i32_0 : i32, i32
  }
  func.func @transform_3(%arg0: i32, %arg1: i32) -> (i32, i32) {
    %c0_i32 = arith.constant 0 : i32
    %c0_i32_0 = arith.constant 0 : i32
    return %c0_i32, %arg1 : i32, i32
  }
  func.func @transform_4(%arg0: i32, %arg1: i32) -> (i32, i32) {
    %c0_i32 = arith.constant 0 : i32
    %c0_i32_0 = arith.constant 0 : i32
    return %c0_i32, %arg1 : i32, i32
  }
  func.func @transform_5(%arg0: i32, %arg1: i32) -> (i32, i32) {
    %c0_i32 = arith.constant 0 : i32
    return %arg0, %arg1 : i32, i32
  }
}

</mosaic_0001>

<bundles_post_ra>
// kernel: tpu_custom_call.1
= control target key start
LH: loop header
LB: loop body
LE: loop exit
PB: predicated region body
PF: predicated region fallthrough
CT: control target
= control target key end

     0   :  { %s6503_s0 = inlined_call_operand.hbm [shape: f32[1024,256], index: 0, kind: input, shape index: {}]   ;;  %s6504_s1 = inlined_call_operand.hbm [shape: f32[1,256], index: 1, kind: input, shape index: {}]   ;;  %s6505_s2 = inlined_call_operand.hbm [shape: f32[1,256], index: 2, kind: input, shape index: {}]   ;;  %s6506_s3 = inlined_call_operand.hbm [shape: f32[256,768], index: 3, kind: input, shape index: {}]   ;;  %s6507_s4 = inlined_call_operand.hbm [shape: f32[1,768], index: 4, kind: input, shape index: {}]   ;;  %s6508_s5 = inlined_call_operand.hbm [shape: f32[1024,768], index: 5, kind: output, shape index: {}]  }
   0x1   :  { %6695 = sst [smem:[#allocation117_spill]] %s6503_s0 }
   0x2   :  { %6696 = sst [smem:[#allocation118_spill]] %s6504_s1 }
   0x3   :  { %6697 = sst [smem:[#allocation119_spill]] %s6505_s2 }
   0x4   :  { %6698 = sst [smem:[#allocation120_spill]] %s6506_s3 }
   0x5   :  { %6699 = sst [smem:[#allocation121_spill]] %s6508_s5 }
   0x6   :  { %10 = vsyncpa [#allocation4], 0 }
   0x7   :  { %12 = vsyncpa [#allocation4 + $0x1], 0 }
   0x8   :  { %13 = vsyncpa [#allocation7], 0 }
   0x9   :  { %14 = vsyncpa [#allocation10], 0 }
   0xa   :  { %16 = vsyncpa [#allocation10 + $0x1], 0 }
   0xb   :  { %17 = vsyncpa [#allocation5], 0 }
   0xc   :  { %19 = vsyncpa [#allocation5 + $0x1], 0  ;;  %s4022_s18 = smov 0   ;;  %s4024_s19 = smov 0  }
   0xd   :  { %s4026_s20 = smov 0   ;;  %s4028_s21 = smov 0  }
   0xe   :  { %s4030_s22 = smov 0   ;;  %s4032_s23 = smov 0  }
   0xf   :  { %s4034_s24 = smov 0   ;;  %s4036_s25 = smov 0  }
  0x10   :  { %s4038_s26 = smov 0   ;;  %s4040_s27 = smov 0  }
  0x11   :  { %s4042_s28 = smov 0   ;;  %s4044_s29 = smov 0  }
  0x12   :  { %s4046_s30 = smov 0   ;;  %s4048_s6 = smov 0  }
  0x13 LB: > { %6700 = sst [smem:[#allocation17_spill]] %s3923_s18  ;;  %s4089_s7 = sadd.s32 4294967295, %s3975_s6   ;;  %s3975_s6 = sphi %s4048_s6, %s25_s6   ;;  %s3971_s30 = sphi %s4046_s30, %s7096_s30   ;;  %s3967_s29 = sphi %s4044_s29, %s7095_s29   ;;  %s3963_s28 = sphi %s4042_s28, %s7094_s28   ;;  %s3959_s27 = sphi %s4040_s27, %s7093_s27   ;;  %s3955_s26 = sphi %s4038_s26, %s7092_s26   ;;  %s3951_s25 = sphi %s4036_s25, %s7091_s25   ;;  %s3947_s24 = sphi %s4034_s24, %s7090_s24   ;;  %s3943_s23 = sphi %s4032_s23, %s7089_s23   ;;  %s3939_s22 = sphi %s4030_s22, %s7088_s22   ;;  %s3935_s21 = sphi %s4028_s21, %s7082_s21   ;;  %s3931_s20 = sphi %s4026_s20, %s7087_s20   ;;  %s3927_s19 = sphi %s4024_s19, %s7086_s19   ;;  %s3923_s18 = sphi %s4022_s18, %s7081_s18  }
  0x14   : > { %6701 = sst [smem:[#allocation18_spill]] %s3927_s19  ;;  %s3362_s8 = sadd.s32 4294967294, %s3975_s6  }
  0x15   : > { %6702 = sst [smem:[#allocation19_spill]] %s3939_s22  ;;  %p6509_p0 = scmp.eq.s32.totalorder %s3975_s6, 0 }
  0x16   : > { %6703 = sst [smem:[#allocation20_spill]] %s3959_s27  ;;  %p57_p1 = scmp.ne.s32.totalorder %s3951_s25, %s3947_s24 }
  0x17   : > { %6704 = sst [smem:[#allocation21_spill]] %s3963_s28  ;;  %p6510_p2 = scmp.eq.s32.totalorder %s4089_s7, 0 }
  0x18   : > { %6705 = sst [smem:[#allocation22_spill]] %s4089_s7  ;;  %p119_p3 = scmp.ne.s32.totalorder %s3943_s23, %s3939_s22 }
  0x19   : > { %p125_p4 = scmp.ne.s32.totalorder %s3939_s22, %s3935_s21  ;;  %p4101_p5 = por %p6510_p2, %p57_p1 }
  0x1a   : > { %p4108_p6 = por %p119_p3, %p6509_p0  ;;  %p176_p8 = scmp.ne.s32.totalorder %s3931_s20, %s3927_s19 }
  0x1b   : > { %s6706_s10 = scalar_select %p4101_p5, 1, 0 }
  0x1c   : > { %p4114_p7 = por %p125_p4, %p6510_p2  ;;  %p177_p9 = scmp.eq.s32.totalorder %s4089_s7, 3 }
  0x1d   : > { %6707 = sst [smem:[#allocation23_spill]] %s6706_s10  ;;  %p182_p10 = scmp.ne.s32.totalorder %s3927_s19, %s3923_s18 }
  0x1e   : > { %s6709_s13 = scalar_select %p4114_p7, 1, 0 }
  0x1f   : > { %p183_p11 = scmp.eq.s32.totalorder %s3362_s8, 3  ;;  %p4123_p12 = por %p177_p9, %p176_p8 }
  0x20   : > { %6710 = sst [smem:[#allocation24_spill]] %s6709_s13  ;;  %p3363_p13 = scmp.ge.s32.totalorder %s3975_s6, 1 }
  0x21   : > { %s6711_s14 = scalar_select %p4123_p12, 1, 0 }
  0x22   : > { %p4128_p1 = por %p183_p11, %p182_p10  ;;  %p190_p3 = scmp.lt.s32.totalorder %s3975_s6, 5 }
  0x23   : > { %6712 = sst [smem:[#allocation25_spill]] %s6711_s14  ;;  %s3977_s17 = smov [#allocation6]  }
  0x24   : > { %s6713_s15 = scalar_select %p4128_p1, 1, 0 }
  0x25   : > { %p4133_p4 = pnand %p3363_p13, %p190_p3  ;;  %s203_s21 = sshll.u32 %s3977_s17, 4  ;;  %s204_s21 = int_to_ptr.vmem [resolvable:$true] %s203_s21 }
  0x26   : > { %6714 = sst [smem:[#allocation26_spill]] %s6713_s15  ;;  %p3432_p8 = scmp.lt.s32.totalorder %s3975_s6, 4 }
  0x27   : > { %p3409_p0 = pneg %p4133_p4  ;;  %s247_s24 = sand.u32 1, %s3975_s6  }
  0x28   : > { %p4151_p10 = pnand %p3432_p8, %p4108_p6  ;;  %s3698_s17 = scalar_lea.vmem %s204_s21, 32 }
  0x29   : > { %p4143_p9 = pnand %p3409_p0, %p6510_p2  ;;  %p3699_p13 = scmp.ne.s32.totalorder %s204_s21, %s3698_s17 }
  0x2a   : > { %p3706_p0 = scmp.lt.s32.totalorder %s204_s21, %s204_s21  ;;  %p3707_p2 = scmp.lt.s32.totalorder %s3698_s17, %s3698_s17 }
  0x2b   : > { %p3689_p11 = pneg %p4143_p9 }
  0x2c   : > { %p3708_p12 = por %p3707_p2, %p3706_p0 }
  0x2d   : > { %p3701_p3 = pnand %p3699_p13, %p3689_p11 }
  0x2f   : > { %p3702_p1 = pneg %p3701_p3 }
  0x31   : > { %p3709_p7 = pnand %p3708_p12, %p3702_p1 }
  0x33   : > { %3712 = shalt.err (!%p3709_p7)
}
  0x34   : > { %s6718_s1 = sld [smem:[#allocation118_spill]]  ;;  %s6522_s18 = sand.u32 1, %s3943_s23  }
  0x35   : > { %s3387_s5 = smul.u32 768, %s6522_s18  ;;  %s6719_s3 = sld [smem:[#allocation120_spill]] }
  0x36   : > { %s3385_s17 = smul.u32 384, %s3967_s29  ;;  %s4173_s9 = scalar_lea.sflag [#allocation10], %s247_s24 }
  0x37   : > { %s251_s19 = scalar_lea.vmem [#allocation9], %s3387_s5  ;;  %p6523_p2 = pneg %p4151_p10 }
  0x38   : > { %s258_s13 = sshll.u32 %s251_s19, 4  ;;  %s259_s13 = int_to_ptr.vmem [resolvable:$true] %s258_s13 }
  0x39   : > { %s3726_s12 = scalar_lea.vmem %s259_s13, 12288 }
  0x3a   : > { %3412 = dma.hbm_to_vmem [thread:$0]  (!%p4143_p9), %s6718_s1, 32, %s204_s21, [#allocation7]  }
  0x3b   : > { %s257_s27 = scalar_lea.hbm %s6719_s3, %s3385_s17  ;;  %p3727_p6 = scmp.ne.s32.totalorder %s259_s13, %s3726_s12 }
  0x3c   : > { %s3978_s21 = smov [#allocation9]  }
  0x3d   : > { %p3729_p7 = pnand %p3727_p6, %p6523_p2  ;;  %s3731_s18 = sshll.u32 %s3978_s21, 4  ;;  %s3732_s18 = int_to_ptr.vmem [resolvable:$false] %s3731_s18 }
  0x3e   : > { %s3733_s15 = scalar_lea.vmem %s3732_s18, 24576  ;;  %p3734_p1 = scmp.lt.s32.totalorder %s259_s13, %s3732_s18 }
  0x3f   : > { %p3730_p12 = pneg %p3729_p7  ;;  %p3735_p13 = scmp.lt.s32.totalorder %s3733_s15, %s3726_s12 }
  0x41   : > { %p3736_p3 = por %p3735_p13, %p3734_p1 }
  0x43   : > { %p3737_p0 = pnand %p3736_p3, %p3730_p12 }
  0x45   : > { %3740 = shalt.err (!%p3737_p0)
}
  0x46   : > { %s3979_s5 = smov 768   ;;  %s3980_s19 = smov 384  }
  0x47   : > { %s3981_s28 = smov 24   ;;  %s3982_s14 = smov [#allocation8]  }
  0x48   : > { %3422 = dma.hbm_to_vmem [thread:$0]  (!%p4151_p10), %s257_s27, 12288, %s259_s13, %s4173_s9, %s3979_s5, %s3980_s19, %s3981_s28  }
  0x49   : > { %s214_s24 = sshll.u32 %s3982_s14, 4  ;;  %s215_s24 = int_to_ptr.vmem [resolvable:$true] %s214_s24 }
  0x4a   : > { %s3752_s17 = scalar_lea.vmem %s215_s24, 32  ;;  %p3760_p1 = scmp.lt.s32.totalorder %s215_s24, %s215_s24 }
  0x4b   : > { %p3753_p6 = scmp.ne.s32.totalorder %s215_s24, %s3752_s17  ;;  %p3761_p12 = scmp.lt.s32.totalorder %s3752_s17, %s3752_s17 }
  0x4d   : > { %p3755_p7 = pnand %p3753_p6, %p3689_p11  ;;  %p3762_p13 = por %p3761_p12, %p3760_p1 }
  0x4f   : > { %p3756_p2 = pneg %p3755_p7 }
  0x51   : > { %p3763_p3 = pnand %p3762_p13, %p3756_p2 }
  0x53   : > { %3766 = shalt.err (!%p3763_p3)
}
  0x54   : > { %s6720_s2 = sld [smem:[#allocation119_spill]]  ;;  %s6721_s27 = sadd.s32 1, %s3967_s29 }
  0x55   : > { %p35_p11 = scmp.ge.s32.totalorder %s6721_s27, 2  ;;  %s37_s13 = sadd.s32 1, %s3971_s30 }
  0x56   : > { %s44_s8 = sadd.s32 1, %s3955_s26  ;;  %p51_p2 = scmp.ne.s32.totalorder %s3955_s26, %s3951_s25 }
  0x57   : > { %s6722_s12 = smov %s6721_s27  ;;  %s7100_s13 = smov (!%p35_p11, %s37_s13), %s3971_s30 }
  0x58   : > { %s7098_s12 = smov (%p35_p11, %s6722_s12), 0  ;;  %p6724_p0 = scmp.eq.s32.totalorder %s3975_s6, 0 }
  0x59   : > { %6723 = sst [smem:[#allocation27_spill]] %s7098_s12  ;;  %s109_s5 = ssub.s32 %s3967_s29, %s7098_s12 }
  0x5a   : > { %3415 = dma.hbm_to_vmem [thread:$0]  (!%p4143_p9), %s6720_s2, 32, %s215_s24, [#allocation7]  }
  0x5b   : > { %p4204_p6 = por %p6724_p0, %p51_p2  ;;  %p39_p9 = scmp.ge.s32.totalorder %s7100_s13, 2 }
  0x5c   : > { %p110_p7 = scmp.eq.s32.totalorder %s109_s5, 0  ;;  %s225_s19 = sand.u32 1, %s3955_s26  }
  0x5d   : > { %s3384_s28 = sshll.u32 %s3971_s30, 14  ;;  %s7102_s13 = smov (%p39_p9, %s7100_s13), 0 }
  0x5e   : > { %6726 = sst [smem:[#allocation28_spill]] %s7102_s13  ;;  %s6727_s14 = sadd.s32 1, %s3943_s23 }
  0x5f   : > { %s4217_s24 = scalar_select %p110_p7, %s3943_s23, %s6727_s14  }
  0x60   : > { %s41_s17 = ssub.s32 %s3971_s30, %s7102_s13  ;;  %s3367_s15 = sshll.u32 %s225_s19, 10 }
  0x61   : > { %p42_p1 = scmp.eq.s32.totalorder %s41_s17, 0  ;;  %s163_s18 = sor.u32 %s109_s5, %s41_s17 }
  0x62   : > { %p164_p12 = scmp.eq.s32.totalorder %s163_s18, 0  ;;  %s6728_s1 = sadd.s32 1, %s3931_s20 }
  0x63   : > { %s4222_s27 = scalar_select %p42_p1, %s3955_s26, %s44_s8  }
  0x64   : > { %s4227_s2 = scalar_select %p164_p12, %s3931_s20, %s6728_s1  }
  0x65   : > { %s6729_s0 = sld [smem:[#allocation117_spill]]  ;;  %s229_s7 = scalar_lea.vmem [#allocation3], %s3367_s15 }
  0x66   : > { %s237_s10 = sshll.u32 %s229_s7, 4  ;;  %p4236_p13 = pnand %p3432_p8, %p4204_p6  ;;  %s238_s10 = int_to_ptr.vmem [resolvable:$true] %s237_s10 }
  0x67   : > { %s226_s5 = scalar_lea.sflag [#allocation4], %s225_s19  ;;  %s3780_s8 = scalar_lea.vmem %s238_s10, 16384 }
  0x68   : > { %p3769_p3 = pneg %p4236_p13  ;;  %p3781_p11 = scmp.ne.s32.totalorder %s238_s10, %s3780_s8 }
  0x69   : > { %s3983_s1 = smov [#allocation3]  }
  0x6a   : > { %p3783_p2 = pnand %p3781_p11, %p3769_p3  ;;  %s3785_s3 = sshll.u32 %s3983_s1, 4  ;;  %s3786_s3 = int_to_ptr.vmem [resolvable:$false] %s3785_s3 }
  0x6b   : > { %s236_s22 = scalar_lea.hbm %s6729_s0, %s3384_s28  ;;  %s3787_s12 = scalar_lea.vmem %s3786_s3, 32768 }
  0x6c   : > { %p3784_p0 = pneg %p3783_p2  ;;  %p3788_p9 = scmp.lt.s32.totalorder %s238_s10, %s3786_s3 }
  0x6d   : > { %p3789_p7 = scmp.lt.s32.totalorder %s3787_s12, %s3780_s8 }
  0x6f   : > { %p3790_p1 = por %p3789_p7, %p3788_p9 }
  0x71   : > { %p3791_p8 = pnand %p3790_p1, %p3784_p0 }
  0x73   : > { %3794 = shalt.err (!%p3791_p8)
}
  0x74   : > { %s3984_s7 = smov 256   ;;  %s3985_s21 = smov 16  }
  0x75   : > { %3419 = dma.hbm_to_vmem [thread:$0]  (!%p4236_p13), %s236_s22, 16384, %s238_s10, %s226_s5, %s3984_s7, %s3984_s7, %s3985_s21  }
  0x76   : > { %s6731_s19 = sand.u32 1, %s3943_s23   ;;  %s3386_s17 = smul.u32 48, %s3967_s29 }
  0x77   : > { %s3388_s28 = smul.u32 3, %s6731_s19  ;;  %p6732_p12 = pneg %p4151_p10 }
  0x78   : > { %s278_s1 = scalar_lea.hbm %s6507_s4, %s3386_s17  ;;  %s3986_s0 = smov [#allocation11]  }
  0x79   : > { %s272_s3 = scalar_lea.vmem [#allocation11], %s3388_s28  ;;  %s3813_s13 = sshll.u32 %s3986_s0, 4  ;;  %s3814_s13 = int_to_ptr.vmem [resolvable:$false] %s3813_s13 }
  0x7a   : > { %s280_s8 = sshll.u32 %s272_s3, 4  ;;  %s3815_s22 = scalar_lea.vmem %s3814_s13, 96  ;;  %s281_s8 = int_to_ptr.vmem [resolvable:$true] %s280_s8 }
  0x7b   : > { %s3808_s12 = scalar_lea.vmem %s281_s8, 48  ;;  %p3816_p13 = scmp.lt.s32.totalorder %s281_s8, %s3814_s13 }
  0x7c   : > { %p3809_p6 = scmp.ne.s32.totalorder %s281_s8, %s3808_s12  ;;  %p3817_p2 = scmp.lt.s32.totalorder %s3815_s22, %s3808_s12 }
  0x7e   : > { %p3811_p3 = pnand %p3809_p6, %p6732_p12  ;;  %p3818_p0 = por %p3817_p2, %p3816_p13 }
  0x80   : > { %p3812_p11 = pneg %p3811_p3 }
  0x82   : > { %p3819_p9 = pnand %p3818_p0, %p3812_p11 }
  0x84   : > { %3822 = shalt.err (!%p3819_p9)
}
  0x85   : > { %3425 = dma.hbm_to_vmem [thread:$0]  (!%p4151_p10), %s278_s1, 48, %s281_s8, %s4173_s9  }
  0x86   : > { %289 = sbr.rel (%p4133_p4) target bundleno = 1161 (0x489), region = 40  ;;  %s291_s14 = sand.u32 (!%p4133_p4), 1, %s3951_s25  }
  0x87   : > { %s3374_s5 = sshll.u32 (!%p4133_p4), %s291_s14, 10  ;;  %s292_s7 = scalar_lea.sflag (!%p4133_p4), [#allocation4], %s291_s14 }
  0x88   : > { %s4259_s0 = scalar_lea.vmem (!%p4133_p4), [#allocation3], %s3374_s5 }
  0x8b   : > { %3906 = dma.done.wait (%p4101_p5), %s292_s7, 16384  }
  0x8c   : > { %3908 = vsyncadd (%p4101_p5), %s292_s7, 4294950912  ;;  %s6734_s13 = sld [smem:[#allocation22_spill]] }
  0x92   : > { %p6735_p7 = scmp.eq.s32.totalorder %s6734_s13, 0 }
  0x94   : > { %3910 = dma.done.wait (%p6735_p7), [#allocation7], 64   ;;  %p6736_p10 = pmov %p6735_p7 }
  0x95   : > { %s6737_s11 = sld [smem:[#allocation19_spill]]  ;;  %s308_s9 = sand.u32 1, %s6734_s13  }
  0x96   : > { %3912 = vsyncadd (%p6736_p10), [#allocation7], 4294967232  ;;  %s6738_s16 = sld [smem:[#allocation24_spill]]  ;;  %s309_s28 = scalar_lea.sflag [#allocation10], %s308_s9 }
  0x9b   : > { %s310_s21 = sand.u32 1, %s6737_s11  }
  0x9c   : > { %s3389_s19 = smul.u32 768, %s310_s21  ;;  %p6739_p4 = scmp.ne.s32.totalorder %s6738_s16, 0 }
  0x9e   : > { %s4271_s17 = scalar_lea.vmem [#allocation9], %s3389_s19 }
  0x9f   : > { %3914 = dma.done.wait (%p6739_p4), %s309_s28, 12336  }
  0xa0   : > { %3916 = vsyncadd (%p6739_p4), %s309_s28, 4294954960  ;;  %s6740_s18 = sld [smem:[#allocation18_spill]]  ;;  %s4277_s15 = smul.u32 3, %s310_s21 }
  0xa1   : > { %s6741_s22 = sld [smem:[#allocation20_spill]] }
  0xa2   : > { %s321_s8 = scalar_lea.vmem [#allocation11], %s4277_s15 }
  0xa6   : > { %s355_s1 = sand.u32 1, %s6740_s18  }
  0xa7   : > { %s3391_s3 = smul.u32 1536, %s355_s1  ;;  %p3377_p5 = scmp.ne.s32.totalorder %s6741_s22, 0 }
  0xa9   : > { %s4283_s12 = scalar_lea.vmem [#allocation12], %s3391_s3  ;;  %366 = sbr.rel (%p3377_p5) target bundleno = 631 (0x277), region = 64 }
  0xae   : > { %v4287_v0 = vld [vmem:[%s4259_s0] sm:$0xff]  ;;  %v4290_v1 = vld [vmem:[%s4259_s0 + $0x8] sm:$0xff]  ;;  %v4301_v5 = vld [vmem:[%s4259_s0 + $0x10] sm:$0xff] }
  0xaf   : > { %v4293_v2 = vld [vmem:[%s4259_s0 + $0x20] sm:$0xff]  ;;  %v495_v3 = vadd.f32 %v4290_v1, %v4287_v0  ;;  %v4298_v4 = vld [vmem:[%s4259_s0 + $0x28] sm:$0xff]  ;;  %v4304_v6 = vld [vmem:[%s4259_s0 + $0x18] sm:$0xff] }
  0xb0   : > { %v501_v7 = vadd.f32 %v4298_v4, %v4293_v2  ;;  %v4309_v8 = vld [vmem:[%s4259_s0 + $0x30] sm:$0xff]  ;;  %v4312_v9 = vld [vmem:[%s4259_s0 + $0x38] sm:$0xff]  ;;  %v498_v10 = vadd.f32 %v4304_v6, %v4301_v5  ;;  %v4319_v12 = vld [vmem:[%s4259_s0 + $0x40] sm:$0xff] }
  0xb1   : > { %496 = vadd.xlane.f32.xlu0 %v495_v3  ;;  %v504_v11 = vadd.f32 %v4312_v9, %v4309_v8  ;;  %v4322_v13 = vld [vmem:[%s4259_s0 + $0x48] sm:$0xff]  ;;  %v4325_v14 = vld [vmem:[%s4259_s0 + $0x50] sm:$0xff]  ;;  %v4328_v15 = vld [vmem:[%s4259_s0 + $0x58] sm:$0xff] }
  0xb2   : > { %502 = vadd.xlane.f32.xlu1 %v501_v7  ;;  %v507_v16 = vadd.f32 %v4322_v13, %v4319_v12  ;;  %v510_v17 = vadd.f32 %v4328_v15, %v4325_v14  ;;  %v4335_v18 = vld [vmem:[%s4259_s0 + $0x60] sm:$0xff]  ;;  %v4338_v19 = vld [vmem:[%s4259_s0 + $0x68] sm:$0xff]  ;;  %v4341_v20 = vld [vmem:[%s4259_s0 + $0x70] sm:$0xff] }
  0xb3   : > { %v4344_v21 = vld [vmem:[%s4259_s0 + $0x78] sm:$0xff]  ;;  %v513_v22 = vadd.f32 %v4338_v19, %v4335_v18  ;;  %v4351_v24 = vld [vmem:[%s4259_s0 + $0x80] sm:$0xff]  ;;  %v4354_v25 = vld [vmem:[%s4259_s0 + $0x88] sm:$0xff] }
  0xb4   : > { %v516_v23 = vadd.f32 %v4344_v21, %v4341_v20  ;;  %v4357_v26 = vld [vmem:[%s4259_s0 + $0x90] sm:$0xff]  ;;  %v4360_v27 = vld [vmem:[%s4259_s0 + $0x98] sm:$0xff]  ;;  %v519_v28 = vadd.f32 %v4354_v25, %v4351_v24  ;;  %v4367_v30 = vld [vmem:[%s4259_s0 + $0xa0] sm:$0xff] }
  0xb5   : > { %499 = vadd.xlane.f32.xlu0 %v498_v10  ;;  %v522_v29 = vadd.f32 %v4360_v27, %v4357_v26  ;;  %v4370_v31 = vld [vmem:[%s4259_s0 + $0xa8] sm:$0xff]  ;;  %v4373_v32 = vld [vmem:[%s4259_s0 + $0xb0] sm:$0xff]  ;;  %v4376_v33 = vld [vmem:[%s4259_s0 + $0xb8] sm:$0xff] }
  0xb6   : > { %505 = vadd.xlane.f32.xlu1 %v504_v11  ;;  %v525_v34 = vadd.f32 %v4370_v31, %v4367_v30  ;;  %v528_v35 = vadd.f32 %v4376_v33, %v4373_v32  ;;  %v4383_v36 = vld [vmem:[%s4259_s0 + $0xc0] sm:$0xff]  ;;  %v4386_v37 = vld [vmem:[%s4259_s0 + $0xc8] sm:$0xff]  ;;  %v4389_v38 = vld [vmem:[%s4259_s0 + $0xd0] sm:$0xff] }
  0xb7   : > { %v4392_v39 = vld [vmem:[%s4259_s0 + $0xd8] sm:$0xff]  ;;  %v531_v40 = vadd.f32 %v4386_v37, %v4383_v36  ;;  %v4399_v42 = vld [vmem:[%s4259_s0 + $0xe0] sm:$0xff]  ;;  %v4402_v43 = vld [vmem:[%s4259_s0 + $0xe8] sm:$0xff] }
  0xb8   : > { %v534_v41 = vadd.f32 %v4392_v39, %v4389_v38  ;;  %v4405_v44 = vld [vmem:[%s4259_s0 + $0xf0] sm:$0xff]  ;;  %v4408_v45 = vld [vmem:[%s4259_s0 + $0xf8] sm:$0xff]  ;;  %v537_v46 = vadd.f32 %v4402_v43, %v4399_v42  ;;  %v4415_v48 = vld [vmem:[%s4259_s0 + $0x100] sm:$0xff] }
  0xb9   : > { %508 = vadd.xlane.f32.xlu0 %v507_v16  ;;  %v540_v47 = vadd.f32 %v4408_v45, %v4405_v44  ;;  %v4418_v49 = vld [vmem:[%s4259_s0 + $0x108] sm:$0xff]  ;;  %v4421_v50 = vld [vmem:[%s4259_s0 + $0x110] sm:$0xff]  ;;  %v4424_v51 = vld [vmem:[%s4259_s0 + $0x118] sm:$0xff] }
  0xba   : > { %511 = vadd.xlane.f32.xlu1 %v510_v17  ;;  %v543_v52 = vadd.f32 %v4418_v49, %v4415_v48  ;;  %v546_v53 = vadd.f32 %v4424_v51, %v4421_v50  ;;  %v4431_v54 = vld [vmem:[%s4259_s0 + $0x120] sm:$0xff]  ;;  %v4434_v55 = vld [vmem:[%s4259_s0 + $0x128] sm:$0xff]  ;;  %v4437_v56 = vld [vmem:[%s4259_s0 + $0x130] sm:$0xff] }
  0xbb   : > { %v4440_v57 = vld [vmem:[%s4259_s0 + $0x138] sm:$0xff]  ;;  %v549_v58 = vadd.f32 %v4434_v55, %v4431_v54  ;;  %v4447_v60 = vld [vmem:[%s4259_s0 + $0x140] sm:$0xff]  ;;  %v4450_v61 = vld [vmem:[%s4259_s0 + $0x148] sm:$0xff] }
  0xbc   : > { %v552_v59 = vadd.f32 %v4440_v57, %v4437_v56  ;;  %v4453_v62 = vld [vmem:[%s4259_s0 + $0x150] sm:$0xff]  ;;  %v4456_v63 = vld [vmem:[%s4259_s0 + $0x158] sm:$0xff]  ;;  %v555_v3 = vadd.f32 %v4450_v61, %v4447_v60  ;;  %v4463_v10 = vld [vmem:[%s4259_s0 + $0x160] sm:$0xff] }
  0xbd   : > { %514 = vadd.xlane.f32.xlu0 %v513_v22  ;;  %v558_v7 = vadd.f32 %v4456_v63, %v4453_v62  ;;  %v4466_v11 = vld [vmem:[%s4259_s0 + $0x168] sm:$0xff]  ;;  %v4469_v16 = vld [vmem:[%s4259_s0 + $0x170] sm:$0xff]  ;;  %v4472_v17 = vld [vmem:[%s4259_s0 + $0x178] sm:$0xff] }
  0xbe   : > { %517 = vadd.xlane.f32.xlu1 %v516_v23  ;;  %v561_v22 = vadd.f32 %v4466_v11, %v4463_v10  ;;  %v564_v23 = vadd.f32 %v4472_v17, %v4469_v16 }
  0xc1   : > { %520 = vadd.xlane.f32.xlu0 %v519_v28  ;;  %v4479_v28 = vld [vmem:[%s4259_s0 + $0x180] sm:$0xff] }
  0xc2   : > { %523 = vadd.xlane.f32.xlu1 %v522_v29  ;;  %v4482_v29 = vld [vmem:[%s4259_s0 + $0x188] sm:$0xff] }
  0xc5   : > { %526 = vadd.xlane.f32.xlu0 %v525_v34  ;;  %v4485_v34 = vld [vmem:[%s4259_s0 + $0x190] sm:$0xff] }
  0xc6   : > { %529 = vadd.xlane.f32.xlu1 %v528_v35  ;;  %6742 = vst [vmem:[#allocation29_spill] sm:$0xff] %v4485_v34  ;;  %v4488_v35 = vld [vmem:[%s4259_s0 + $0x198] sm:$0xff] }
  0xc7   : > { %6743 = vst [vmem:[#allocation30_spill] sm:$0xff] %v4488_v35 }
  0xc9   : > { %532 = vadd.xlane.f32.xlu0 %v531_v40  ;;  %v567_v40 = vadd.f32 %v4482_v29, %v4479_v28 }
  0xca   : > { %535 = vadd.xlane.f32.xlu1 %v534_v41  ;;  %v570_v41 = vadd.f32 %v4488_v35, %v4485_v34 }
  0xcd   : > { %538 = vadd.xlane.f32.xlu0 %v537_v46  ;;  %v4495_v46 = vld [vmem:[%s4259_s0 + $0x1a0] sm:$0xff] }
  0xce   : > { %541 = vadd.xlane.f32.xlu1 %v540_v47  ;;  %6744 = vst [vmem:[#allocation31_spill] sm:$0xff] %v4495_v46  ;;  %v4498_v47 = vld [vmem:[%s4259_s0 + $0x1a8] sm:$0xff] }
  0xcf   : > { %6745 = vst [vmem:[#allocation32_spill] sm:$0xff] %v4498_v47 }
  0xd1   : > { %544 = vadd.xlane.f32.xlu0 %v543_v52  ;;  %v4501_v52 = vld [vmem:[%s4259_s0 + $0x1b0] sm:$0xff] }
  0xd2   : > { %547 = vadd.xlane.f32.xlu1 %v546_v53  ;;  %6746 = vst [vmem:[#allocation33_spill] sm:$0xff] %v4501_v52  ;;  %v4504_v53 = vld [vmem:[%s4259_s0 + $0x1b8] sm:$0xff] }
  0xd3   : > { %6747 = vst [vmem:[#allocation34_spill] sm:$0xff] %v4504_v53 }
  0xd5   : > { %550 = vadd.xlane.f32.xlu0 %v549_v58  ;;  %v573_v58 = vadd.f32 %v4498_v47, %v4495_v46  ;;  %v4533_v47 = vld [vmem:[%s4259_s0 + $0x1f0] sm:$0xff]  ;;  %v4536_v46 = vld [vmem:[%s4259_s0 + $0x1f8] sm:$0xff] }
  0xd6   : > { %553 = vadd.xlane.f32.xlu1 %v552_v59  ;;  %v576_v59 = vadd.f32 %v4504_v53, %v4501_v52  ;;  %v4527_v53 = vld [vmem:[%s4259_s0 + $0x1e0] sm:$0xff]  ;;  %v4530_v52 = vld [vmem:[%s4259_s0 + $0x1e8] sm:$0xff]  ;;  %6754 = vst [vmem:[#allocation41_spill] sm:$0xff] %v4533_v47  ;;  %6755 = vst [vmem:[#allocation42_spill] sm:$0xff] %v4536_v46 }
  0xd7   : > { %6752 = vst [vmem:[#allocation39_spill] sm:$0xff] %v4527_v53  ;;  %6753 = vst [vmem:[#allocation40_spill] sm:$0xff] %v4530_v52 }
  0xd9   : > { %556 = vadd.xlane.f32.xlu0 %v555_v3  ;;  %v4511_v3 = vld [vmem:[%s4259_s0 + $0x1c0] sm:$0xff] }
  0xda   : > { %559 = vadd.xlane.f32.xlu1 %v558_v7  ;;  %6748 = vst [vmem:[#allocation35_spill] sm:$0xff] %v4511_v3  ;;  %v4514_v7 = vld [vmem:[%s4259_s0 + $0x1c8] sm:$0xff] }
  0xdb   : > { %6749 = vst [vmem:[#allocation36_spill] sm:$0xff] %v4514_v7 }
  0xdd   : > { %562 = vadd.xlane.f32.xlu0 %v561_v22  ;;  %v4517_v22 = vld [vmem:[%s4259_s0 + $0x1d0] sm:$0xff] }
  0xde   : > { %565 = vadd.xlane.f32.xlu1 %v564_v23  ;;  %6750 = vst [vmem:[#allocation37_spill] sm:$0xff] %v4517_v22  ;;  %v4520_v23 = vld [vmem:[%s4259_s0 + $0x1d8] sm:$0xff] }
  0xdf   : > { %6751 = vst [vmem:[#allocation38_spill] sm:$0xff] %v4520_v23 }
  0xe1   : > { %568 = vadd.xlane.f32.xlu0 %v567_v40  ;;  %v579_v40 = vadd.f32 %v4514_v7, %v4511_v3  ;;  %v4549_v7 = vld [vmem:[%s4259_s0 + $0x210] sm:$0xff]  ;;  %v4552_v3 = vld [vmem:[%s4259_s0 + $0x218] sm:$0xff] }
  0xe2   : > { %571 = vadd.xlane.f32.xlu1 %v570_v41  ;;  %v582_v41 = vadd.f32 %v4520_v23, %v4517_v22  ;;  %v4543_v23 = vld [vmem:[%s4259_s0 + $0x200] sm:$0xff]  ;;  %v4546_v22 = vld [vmem:[%s4259_s0 + $0x208] sm:$0xff]  ;;  %6758 = vst [vmem:[#allocation45_spill] sm:$0xff] %v4549_v7  ;;  %6759 = vst [vmem:[#allocation46_spill] sm:$0xff] %v4552_v3 }
  0xe3   : > { %6756 = vst [vmem:[#allocation43_spill] sm:$0xff] %v4543_v23  ;;  %6757 = vst [vmem:[#allocation44_spill] sm:$0xff] %v4546_v22 }
  0xe5   : > { %574 = vadd.xlane.f32.xlu0 %v573_v58  ;;  %v585_v58 = vadd.f32 %v4530_v52, %v4527_v53  ;;  %v4565_v52 = vld [vmem:[%s4259_s0 + $0x230] sm:$0xff]  ;;  %v4568_v53 = vld [vmem:[%s4259_s0 + $0x238] sm:$0xff] }
  0xe6   : > { %577 = vadd.xlane.f32.xlu1 %v576_v59  ;;  %v588_v59 = vadd.f32 %v4536_v46, %v4533_v47  ;;  %v4559_v46 = vld [vmem:[%s4259_s0 + $0x220] sm:$0xff]  ;;  %v4562_v47 = vld [vmem:[%s4259_s0 + $0x228] sm:$0xff]  ;;  %6762 = vst [vmem:[#allocation49_spill] sm:$0xff] %v4565_v52  ;;  %6763 = vst [vmem:[#allocation50_spill] sm:$0xff] %v4568_v53 }
  0xe7   : > { %6760 = vst [vmem:[#allocation47_spill] sm:$0xff] %v4559_v46  ;;  %6761 = vst [vmem:[#allocation48_spill] sm:$0xff] %v4562_v47 }
  0xe9   : > { %580 = vadd.xlane.f32.xlu0 %v579_v40  ;;  %v591_v40 = vadd.f32 %v4546_v22, %v4543_v23  ;;  %v4581_v22 = vld [vmem:[%s4259_s0 + $0x250] sm:$0xff]  ;;  %v4584_v23 = vld [vmem:[%s4259_s0 + $0x258] sm:$0xff] }
  0xea   : > { %583 = vadd.xlane.f32.xlu1 %v582_v41  ;;  %v594_v41 = vadd.f32 %v4552_v3, %v4549_v7  ;;  %v4575_v3 = vld [vmem:[%s4259_s0 + $0x240] sm:$0xff]  ;;  %v4578_v7 = vld [vmem:[%s4259_s0 + $0x248] sm:$0xff]  ;;  %6766 = vst [vmem:[#allocation53_spill] sm:$0xff] %v4581_v22  ;;  %6767 = vst [vmem:[#allocation54_spill] sm:$0xff] %v4584_v23 }
  0xeb   : > { %6764 = vst [vmem:[#allocation51_spill] sm:$0xff] %v4575_v3  ;;  %6765 = vst [vmem:[#allocation52_spill] sm:$0xff] %v4578_v7 }
  0xed   : > { %586 = vadd.xlane.f32.xlu0 %v585_v58  ;;  %v597_v58 = vadd.f32 %v4562_v47, %v4559_v46  ;;  %v4597_v47 = vld [vmem:[%s4259_s0 + $0x270] sm:$0xff]  ;;  %v4600_v46 = vld [vmem:[%s4259_s0 + $0x278] sm:$0xff] }
  0xee   : > { %589 = vadd.xlane.f32.xlu1 %v588_v59  ;;  %v600_v59 = vadd.f32 %v4568_v53, %v4565_v52  ;;  %v4591_v53 = vld [vmem:[%s4259_s0 + $0x260] sm:$0xff]  ;;  %v4594_v52 = vld [vmem:[%s4259_s0 + $0x268] sm:$0xff]  ;;  %6770 = vst [vmem:[#allocation57_spill] sm:$0xff] %v4597_v47  ;;  %6771 = vst [vmem:[#allocation58_spill] sm:$0xff] %v4600_v46 }
  0xef   : > { %6768 = vst [vmem:[#allocation55_spill] sm:$0xff] %v4591_v53  ;;  %6769 = vst [vmem:[#allocation56_spill] sm:$0xff] %v4594_v52 }
  0xf1   : > { %592 = vadd.xlane.f32.xlu0 %v591_v40  ;;  %v603_v40 = vadd.f32 %v4578_v7, %v4575_v3  ;;  %v4613_v7 = vld [vmem:[%s4259_s0 + $0x290] sm:$0xff]  ;;  %v4616_v3 = vld [vmem:[%s4259_s0 + $0x298] sm:$0xff] }
  0xf2   : > { %595 = vadd.xlane.f32.xlu1 %v594_v41  ;;  %v606_v41 = vadd.f32 %v4584_v23, %v4581_v22  ;;  %v4607_v23 = vld [vmem:[%s4259_s0 + $0x280] sm:$0xff]  ;;  %v4610_v22 = vld [vmem:[%s4259_s0 + $0x288] sm:$0xff]  ;;  %6774 = vst [vmem:[#allocation61_spill] sm:$0xff] %v4613_v7  ;;  %6775 = vst [vmem:[#allocation62_spill] sm:$0xff] %v4616_v3 }
  0xf3   : > { %6772 = vst [vmem:[#allocation59_spill] sm:$0xff] %v4607_v23  ;;  %6773 = vst [vmem:[#allocation60_spill] sm:$0xff] %v4610_v22 }
  0xf5   : > { %598 = vadd.xlane.f32.xlu0 %v597_v58  ;;  %v609_v58 = vadd.f32 %v4594_v52, %v4591_v53  ;;  %v4629_v52 = vld [vmem:[%s4259_s0 + $0x2b0] sm:$0xff]  ;;  %v4632_v53 = vld [vmem:[%s4259_s0 + $0x2b8] sm:$0xff] }
  0xf6   : > { %601 = vadd.xlane.f32.xlu1 %v600_v59  ;;  %v612_v59 = vadd.f32 %v4600_v46, %v4597_v47  ;;  %v4623_v46 = vld [vmem:[%s4259_s0 + $0x2a0] sm:$0xff]  ;;  %v4626_v47 = vld [vmem:[%s4259_s0 + $0x2a8] sm:$0xff]  ;;  %6778 = vst [vmem:[#allocation65_spill] sm:$0xff] %v4629_v52  ;;  %6779 = vst [vmem:[#allocation66_spill] sm:$0xff] %v4632_v53 }
  0xf7   : > { %6776 = vst [vmem:[#allocation63_spill] sm:$0xff] %v4623_v46  ;;  %6777 = vst [vmem:[#allocation64_spill] sm:$0xff] %v4626_v47 }
  0xf9   : > { %604 = vadd.xlane.f32.xlu0 %v603_v40  ;;  %v615_v40 = vadd.f32 %v4610_v22, %v4607_v23  ;;  %v4645_v22 = vld [vmem:[%s4259_s0 + $0x2d0] sm:$0xff]  ;;  %v4648_v23 = vld [vmem:[%s4259_s0 + $0x2d8] sm:$0xff] }
  0xfa   : > { %607 = vadd.xlane.f32.xlu1 %v606_v41  ;;  %v618_v41 = vadd.f32 %v4616_v3, %v4613_v7  ;;  %v4639_v3 = vld [vmem:[%s4259_s0 + $0x2c0] sm:$0xff]  ;;  %v4642_v7 = vld [vmem:[%s4259_s0 + $0x2c8] sm:$0xff]  ;;  %6782 = vst [vmem:[#allocation69_spill] sm:$0xff] %v4645_v22  ;;  %6783 = vst [vmem:[#allocation70_spill] sm:$0xff] %v4648_v23 }
  0xfb   : > { %6780 = vst [vmem:[#allocation67_spill] sm:$0xff] %v4639_v3  ;;  %6781 = vst [vmem:[#allocation68_spill] sm:$0xff] %v4642_v7 }
  0xfd   : > { %610 = vadd.xlane.f32.xlu0 %v609_v58  ;;  %v621_v58 = vadd.f32 %v4626_v47, %v4623_v46  ;;  %v4661_v47 = vld [vmem:[%s4259_s0 + $0x2f0] sm:$0xff]  ;;  %v4664_v46 = vld [vmem:[%s4259_s0 + $0x2f8] sm:$0xff] }
  0xfe   : > { %613 = vadd.xlane.f32.xlu1 %v612_v59  ;;  %v624_v59 = vadd.f32 %v4632_v53, %v4629_v52  ;;  %v4655_v53 = vld [vmem:[%s4259_s0 + $0x2e0] sm:$0xff]  ;;  %v4658_v52 = vld [vmem:[%s4259_s0 + $0x2e8] sm:$0xff]  ;;  %6786 = vst [vmem:[#allocation73_spill] sm:$0xff] %v4661_v47  ;;  %6787 = vst [vmem:[#allocation74_spill] sm:$0xff] %v4664_v46 }
  0xff   : > { %6784 = vst [vmem:[#allocation71_spill] sm:$0xff] %v4655_v53  ;;  %6785 = vst [vmem:[#allocation72_spill] sm:$0xff] %v4658_v52 }
 0x101   : > { %616 = vadd.xlane.f32.xlu0 %v615_v40  ;;  %v627_v40 = vadd.f32 %v4642_v7, %v4639_v3  ;;  %v4677_v7 = vld [vmem:[%s4259_s0 + $0x310] sm:$0xff]  ;;  %v4680_v3 = vld [vmem:[%s4259_s0 + $0x318] sm:$0xff] }
 0x102   : > { %619 = vadd.xlane.f32.xlu1 %v618_v41  ;;  %v630_v41 = vadd.f32 %v4648_v23, %v4645_v22  ;;  %v4671_v23 = vld [vmem:[%s4259_s0 + $0x300] sm:$0xff]  ;;  %v4674_v22 = vld [vmem:[%s4259_s0 + $0x308] sm:$0xff]  ;;  %6790 = vst [vmem:[#allocation77_spill] sm:$0xff] %v4677_v7  ;;  %6791 = vst [vmem:[#allocation78_spill] sm:$0xff] %v4680_v3 }
 0x103   : > { %6788 = vst [vmem:[#allocation75_spill] sm:$0xff] %v4671_v23  ;;  %6789 = vst [vmem:[#allocation76_spill] sm:$0xff] %v4674_v22 }
 0x105   : > { %622 = vadd.xlane.f32.xlu0 %v621_v58  ;;  %v633_v58 = vadd.f32 %v4658_v52, %v4655_v53  ;;  %v4693_v52 = vld [vmem:[%s4259_s0 + $0x330] sm:$0xff]  ;;  %v4696_v53 = vld [vmem:[%s4259_s0 + $0x338] sm:$0xff] }
 0x106   : > { %625 = vadd.xlane.f32.xlu1 %v624_v59  ;;  %v636_v59 = vadd.f32 %v4664_v46, %v4661_v47  ;;  %v4687_v46 = vld [vmem:[%s4259_s0 + $0x320] sm:$0xff]  ;;  %v4690_v47 = vld [vmem:[%s4259_s0 + $0x328] sm:$0xff]  ;;  %6794 = vst [vmem:[#allocation81_spill] sm:$0xff] %v4693_v52  ;;  %6795 = vst [vmem:[#allocation82_spill] sm:$0xff] %v4696_v53 }
 0x107   : > { %6792 = vst [vmem:[#allocation79_spill] sm:$0xff] %v4687_v46  ;;  %6793 = vst [vmem:[#allocation80_spill] sm:$0xff] %v4690_v47 }
 0x109   : > { %628 = vadd.xlane.f32.xlu0 %v627_v40  ;;  %v639_v40 = vadd.f32 %v4674_v22, %v4671_v23  ;;  %v4709_v22 = vld [vmem:[%s4259_s0 + $0x350] sm:$0xff]  ;;  %v4712_v23 = vld [vmem:[%s4259_s0 + $0x358] sm:$0xff] }
 0x10a   : > { %631 = vadd.xlane.f32.xlu1 %v630_v41  ;;  %v642_v41 = vadd.f32 %v4680_v3, %v4677_v7  ;;  %v4703_v3 = vld [vmem:[%s4259_s0 + $0x340] sm:$0xff]  ;;  %v4706_v7 = vld [vmem:[%s4259_s0 + $0x348] sm:$0xff]  ;;  %6798 = vst [vmem:[#allocation85_spill] sm:$0xff] %v4709_v22  ;;  %6799 = vst [vmem:[#allocation86_spill] sm:$0xff] %v4712_v23 }
 0x10b   : > { %6796 = vst [vmem:[#allocation83_spill] sm:$0xff] %v4703_v3  ;;  %6797 = vst [vmem:[#allocation84_spill] sm:$0xff] %v4706_v7 }
 0x10d   : > { %634 = vadd.xlane.f32.xlu0 %v633_v58  ;;  %v645_v58 = vadd.f32 %v4690_v47, %v4687_v46  ;;  %v4725_v47 = vld [vmem:[%s4259_s0 + $0x370] sm:$0xff]  ;;  %v4728_v46 = vld [vmem:[%s4259_s0 + $0x378] sm:$0xff] }
 0x10e   : > { %637 = vadd.xlane.f32.xlu1 %v636_v59  ;;  %v648_v59 = vadd.f32 %v4696_v53, %v4693_v52  ;;  %v4719_v53 = vld [vmem:[%s4259_s0 + $0x360] sm:$0xff]  ;;  %v4722_v52 = vld [vmem:[%s4259_s0 + $0x368] sm:$0xff]  ;;  %6802 = vst [vmem:[#allocation89_spill] sm:$0xff] %v4725_v47  ;;  %6803 = vst [vmem:[#allocation90_spill] sm:$0xff] %v4728_v46 }
 0x10f   : > { %6800 = vst [vmem:[#allocation87_spill] sm:$0xff] %v4719_v53  ;;  %6801 = vst [vmem:[#allocation88_spill] sm:$0xff] %v4722_v52 }
 0x111   : > { %640 = vadd.xlane.f32.xlu0 %v639_v40  ;;  %v651_v40 = vadd.f32 %v4706_v7, %v4703_v3  ;;  %v4741_v7 = vld [vmem:[%s4259_s0 + $0x390] sm:$0xff]  ;;  %v4744_v3 = vld [vmem:[%s4259_s0 + $0x398] sm:$0xff] }
 0x112   : > { %643 = vadd.xlane.f32.xlu1 %v642_v41  ;;  %v654_v41 = vadd.f32 %v4712_v23, %v4709_v22  ;;  %v4735_v23 = vld [vmem:[%s4259_s0 + $0x380] sm:$0xff]  ;;  %v4738_v22 = vld [vmem:[%s4259_s0 + $0x388] sm:$0xff]  ;;  %6806 = vst [vmem:[#allocation93_spill] sm:$0xff] %v4741_v7  ;;  %6807 = vst [vmem:[#allocation94_spill] sm:$0xff] %v4744_v3 }
 0x113   : > { %6804 = vst [vmem:[#allocation91_spill] sm:$0xff] %v4735_v23  ;;  %6805 = vst [vmem:[#allocation92_spill] sm:$0xff] %v4738_v22 }
 0x115   : > { %646 = vadd.xlane.f32.xlu0 %v645_v58  ;;  %v657_v58 = vadd.f32 %v4722_v52, %v4719_v53  ;;  %v4757_v52 = vld [vmem:[%s4259_s0 + $0x3b0] sm:$0xff]  ;;  %v4760_v53 = vld [vmem:[%s4259_s0 + $0x3b8] sm:$0xff] }
 0x116   : > { %649 = vadd.xlane.f32.xlu1 %v648_v59  ;;  %v660_v59 = vadd.f32 %v4728_v46, %v4725_v47  ;;  %v4751_v46 = vld [vmem:[%s4259_s0 + $0x3a0] sm:$0xff]  ;;  %v4754_v47 = vld [vmem:[%s4259_s0 + $0x3a8] sm:$0xff]  ;;  %6810 = vst [vmem:[#allocation97_spill] sm:$0xff] %v4757_v52  ;;  %6811 = vst [vmem:[#allocation98_spill] sm:$0xff] %v4760_v53 }
 0x117   : > { %6808 = vst [vmem:[#allocation95_spill] sm:$0xff] %v4751_v46  ;;  %6809 = vst [vmem:[#allocation96_spill] sm:$0xff] %v4754_v47 }
 0x119   : > { %652 = vadd.xlane.f32.xlu0 %v651_v40  ;;  %v663_v40 = vadd.f32 %v4738_v22, %v4735_v23  ;;  %v4773_v22 = vld [vmem:[%s4259_s0 + $0x3d0] sm:$0xff]  ;;  %v4776_v23 = vld [vmem:[%s4259_s0 + $0x3d8] sm:$0xff] }
 0x11a   : > { %655 = vadd.xlane.f32.xlu1 %v654_v41  ;;  %v666_v41 = vadd.f32 %v4744_v3, %v4741_v7  ;;  %v4767_v3 = vld [vmem:[%s4259_s0 + $0x3c0] sm:$0xff]  ;;  %v4770_v7 = vld [vmem:[%s4259_s0 + $0x3c8] sm:$0xff]  ;;  %6814 = vst [vmem:[#allocation101_spill] sm:$0xff] %v4773_v22  ;;  %6815 = vst [vmem:[#allocation102_spill] sm:$0xff] %v4776_v23 }
 0x11b   : > { %6812 = vst [vmem:[#allocation99_spill] sm:$0xff] %v4767_v3  ;;  %6813 = vst [vmem:[#allocation100_spill] sm:$0xff] %v4770_v7  ;;  %v675_v35 = vadd.f32 %v4770_v7, %v4767_v3 }
 0x11d   : > { %658 = vadd.xlane.f32.xlu0 %v657_v58  ;;  %v669_v58 = vadd.f32 %v4754_v47, %v4751_v46  ;;  %v4786_v47 = vld [vmem:[%s4259_s0 + $0x3e8] sm:$0xff] }
 0x11e   : > { %661 = vadd.xlane.f32.xlu1 %v660_v59  ;;  %v672_v59 = vadd.f32 %v4760_v53, %v4757_v52  ;;  %6816 = vst [vmem:[#allocation103_spill] sm:$0xff] %v4786_v47  ;;  %v4789_v53 = vld [vmem:[%s4259_s0 + $0x3f0] sm:$0xff]  ;;  %v4792_v52 = vld [vmem:[%s4259_s0 + $0x3f8] sm:$0xff] }
 0x11f   : > { %6817 = vst [vmem:[#allocation104_spill] sm:$0xff] %v4792_v52 }
 0x121   : > { %664 = vadd.xlane.f32.xlu0 %v663_v40  ;;  %v678_v40 = vadd.f32 %v4776_v23, %v4773_v22 }
 0x122   : > { %667 = vadd.xlane.f32.xlu1 %v666_v41  ;;  %v4783_v41 = vld [vmem:[%s4259_s0 + $0x3e0] sm:$0xff] }
 0x123   : > { %v681_v46 = vadd.f32 %v4786_v47, %v4783_v41 }
 0x125   : > { %670 = vadd.xlane.f32.xlu0 %v669_v58  ;;  %v684_v58 = vadd.f32 %v4792_v52, %v4789_v53 }
 0x126   : > { %673 = vadd.xlane.f32.xlu1 %v672_v59 }
 0x129   : > { %676 = vadd.xlane.f32.xlu0 %v675_v35 }
 0x12a   : > { %679 = vadd.xlane.f32.xlu1 %v678_v40 }
 0x12d   : > { %682 = vadd.xlane.f32.xlu0 %v681_v46 }
 0x12e   : > { %685 = vadd.xlane.f32.xlu1 %v684_v58 }
 0x13a   : > { %v497_v59 = vpop.xlane.xlu0 %496 }
 0x13b   : > { %v688_v23 = vmul.f32 0.00390625, %v497_v59  ;;  %v503_v22 = vpop.xlane.xlu1 %502 }
 0x13c   : > { %v690_v7 = vmul.f32 0.00390625, %v503_v22 }
 0x13d   : > { %v4799_v3 = vsub.f32 %v4287_v0, %v688_v23  ;;  %v4802_v34 = vsub.f32 %v4290_v1, %v688_v23 }
 0x13e   : > { %v4805_v35 = vsub.f32 %v4293_v2, %v690_v7  ;;  %v4808_v40 = vsub.f32 %v4298_v4, %v690_v7  ;;  %v500_v47 = vpop.xlane.xlu0 %499 }
 0x13f   : > { %6818 = vst [vmem:[#allocation105_spill] sm:$0xff] %v4799_v3  ;;  %6819 = vst [vmem:[#allocation106_spill] sm:$0xff] %v4802_v34  ;;  %v689_v52 = vmul.f32 0.00390625, %v500_v47  ;;  %v506_v46 = vpop.xlane.xlu1 %505  ;;  %v880_v58 = vmul.f32 %v4799_v3, %v4799_v3  ;;  %v881_v22 = vmul.f32 %v4802_v34, %v4802_v34 }
 0x140   : > { %6820 = vst [vmem:[#allocation107_spill] sm:$0xff] %v4805_v35  ;;  %6821 = vst [vmem:[#allocation108_spill] sm:$0xff] %v4808_v40  ;;  %v691_v0 = vmul.f32 0.00390625, %v506_v46  ;;  %v884_v1 = vmul.f32 %v4805_v35, %v4805_v35  ;;  %v885_v2 = vmul.f32 %v4808_v40, %v4808_v40 }
 0x141   : > { %v4819_v23 = vsub.f32 %v4301_v5, %v689_v52  ;;  %v4822_v4 = vsub.f32 %v4304_v6, %v689_v52  ;;  %v1008_v47 = vadd.f32 %v881_v22, %v880_v58 }
 0x142   : > { %v4825_v7 = vsub.f32 %v4309_v8, %v691_v0  ;;  %v4828_v59 = vsub.f32 %v4312_v9, %v691_v0  ;;  %v509_v46 = vpop.xlane.xlu0 %508  ;;  %v1014_v3 = vadd.f32 %v885_v2, %v884_v1 }
 0x143   : > { %v692_v34 = vmul.f32 0.00390625, %v509_v46  ;;  %1009 = vadd.xlane.f32.xlu0 %v1008_v47  ;;  %v512_v35 = vpop.xlane.xlu1 %511  ;;  %v882_v40 = vmul.f32 %v4819_v23, %v4819_v23  ;;  %v883_v5 = vmul.f32 %v4822_v4, %v4822_v4 }
 0x144   : > { %v693_v6 = vmul.f32 0.00390625, %v512_v35  ;;  %v886_v52 = vmul.f32 %v4825_v7, %v4825_v7  ;;  %v887_v8 = vmul.f32 %v4828_v59, %v4828_v59 }
 0x145   : > { %v4839_v9 = vsub.f32 %v4319_v12, %v692_v34  ;;  %v4842_v58 = vsub.f32 %v4322_v13, %v692_v34  ;;  %v1011_v22 = vadd.f32 %v883_v5, %v882_v40 }
 0x146   : > { %v4845_v0 = vsub.f32 %v4325_v14, %v693_v6  ;;  %v4848_v1 = vsub.f32 %v4328_v15, %v693_v6  ;;  %v515_v35 = vpop.xlane.xlu0 %514  ;;  %v1017_v46 = vadd.f32 %v887_v8, %v886_v52 }
 0x147   : > { %v694_v2 = vmul.f32 0.00390625, %v515_v35  ;;  %1015 = vadd.xlane.f32.xlu0 %v1014_v3  ;;  %1012 = vadd.xlane.f32.xlu1 %v1011_v22  ;;  %v518_v47 = vpop.xlane.xlu1 %517  ;;  %v888_v12 = vmul.f32 %v4839_v9, %v4839_v9  ;;  %v889_v13 = vmul.f32 %v4842_v58, %v4842_v58 }
 0x148   : > { %v695_v34 = vmul.f32 0.00390625, %v518_v47  ;;  %v890_v14 = vmul.f32 %v4845_v0, %v4845_v0  ;;  %v891_v15 = vmul.f32 %v4848_v1, %v4848_v1 }
 0x149   : > { %v4859_v40 = vsub.f32 %v4335_v18, %v694_v2  ;;  %v4862_v3 = vsub.f32 %v4338_v19, %v694_v2  ;;  %v1020_v5 = vadd.f32 %v889_v13, %v888_v12 }
 0x14a   : > { %v4865_v6 = vsub.f32 %v4341_v20, %v695_v34  ;;  %v4868_v52 = vsub.f32 %v4344_v21, %v695_v34  ;;  %v521_v8 = vpop.xlane.xlu0 %520  ;;  %v1023_v47 = vadd.f32 %v891_v15, %v890_v14 }
 0x14b   : > { %v696_v22 = vmul.f32 0.00390625, %v521_v8  ;;  %1018 = vadd.xlane.f32.xlu1 %v1017_v46  ;;  %1021 = vadd.xlane.f32.xlu0 %v1020_v5  ;;  %v524_v35 = vpop.xlane.xlu1 %523  ;;  %v892_v18 = vmul.f32 %v4859_v40, %v4859_v40  ;;  %v893_v19 = vmul.f32 %v4862_v3, %v4862_v3 }
 0x14c   : > { %v697_v2 = vmul.f32 0.00390625, %v524_v35  ;;  %v894_v20 = vmul.f32 %v4865_v6, %v4865_v6  ;;  %v895_v21 = vmul.f32 %v4868_v52, %v4868_v52 }
 0x14d   : > { %v4879_v12 = vsub.f32 %v4351_v24, %v696_v22  ;;  %v4882_v46 = vsub.f32 %v4354_v25, %v696_v22  ;;  %v1026_v13 = vadd.f32 %v893_v19, %v892_v18 }
 0x14e   : > { %v4885_v34 = vsub.f32 %v4357_v26, %v697_v2  ;;  %v4888_v14 = vsub.f32 %v4360_v27, %v697_v2  ;;  %v527_v15 = vpop.xlane.xlu0 %526  ;;  %v1029_v35 = vadd.f32 %v895_v21, %v894_v20 }
 0x14f   : > { %v698_v5 = vmul.f32 0.00390625, %v527_v15  ;;  %1024 = vadd.xlane.f32.xlu1 %v1023_v47  ;;  %1027 = vadd.xlane.f32.xlu0 %v1026_v13  ;;  %v530_v8 = vpop.xlane.xlu1 %529  ;;  %v896_v24 = vmul.f32 %v4879_v12, %v4879_v12  ;;  %v897_v25 = vmul.f32 %v4882_v46, %v4882_v46 }
 0x150   : > { %v699_v22 = vmul.f32 0.00390625, %v530_v8  ;;  %v898_v26 = vmul.f32 %v4885_v34, %v4885_v34  ;;  %v899_v27 = vmul.f32 %v4888_v14, %v4888_v14 }
 0x151   : > { %v4899_v18 = vsub.f32 %v4367_v30, %v698_v5  ;;  %v4902_v47 = vsub.f32 %v4370_v31, %v698_v5  ;;  %v1032_v19 = vadd.f32 %v897_v25, %v896_v24 }
 0x152   : > { %v4905_v2 = vsub.f32 %v4373_v32, %v699_v22  ;;  %v4908_v20 = vsub.f32 %v4376_v33, %v699_v22  ;;  %v533_v21 = vpop.xlane.xlu0 %532  ;;  %v1035_v8 = vadd.f32 %v899_v27, %v898_v26 }
 0x153   : > { %v700_v13 = vmul.f32 0.00390625, %v533_v21  ;;  %1030 = vadd.xlane.f32.xlu1 %v1029_v35  ;;  %1033 = vadd.xlane.f32.xlu0 %v1032_v19  ;;  %v536_v15 = vpop.xlane.xlu1 %535  ;;  %v900_v30 = vmul.f32 %v4899_v18, %v4899_v18  ;;  %v901_v31 = vmul.f32 %v4902_v47, %v4902_v47 }
 0x154   : > { %v701_v5 = vmul.f32 0.00390625, %v536_v15  ;;  %v902_v32 = vmul.f32 %v4905_v2, %v4905_v2  ;;  %v903_v33 = vmul.f32 %v4908_v20, %v4908_v20 }
 0x155   : > { %v4919_v24 = vsub.f32 %v4383_v36, %v700_v13  ;;  %v4922_v35 = vsub.f32 %v4386_v37, %v700_v13  ;;  %v1038_v25 = vadd.f32 %v901_v31, %v900_v30 }
 0x156   : > { %v4925_v22 = vsub.f32 %v4389_v38, %v701_v5  ;;  %v4928_v26 = vsub.f32 %v4392_v39, %v701_v5  ;;  %v539_v27 = vpop.xlane.xlu0 %538  ;;  %v1041_v15 = vadd.f32 %v903_v33, %v902_v32 }
 0x157   : > { %v702_v19 = vmul.f32 0.00390625, %v539_v27  ;;  %1036 = vadd.xlane.f32.xlu1 %v1035_v8  ;;  %1039 = vadd.xlane.f32.xlu0 %v1038_v25  ;;  %v542_v21 = vpop.xlane.xlu1 %541  ;;  %v904_v36 = vmul.f32 %v4919_v24, %v4919_v24  ;;  %v905_v37 = vmul.f32 %v4922_v35, %v4922_v35 }
 0x158   : > { %v703_v13 = vmul.f32 0.00390625, %v542_v21  ;;  %v906_v38 = vmul.f32 %v4925_v22, %v4925_v22  ;;  %v907_v39 = vmul.f32 %v4928_v26, %v4928_v26 }
 0x159   : > { %v4939_v30 = vsub.f32 %v4399_v42, %v702_v19  ;;  %v4942_v8 = vsub.f32 %v4402_v43, %v702_v19  ;;  %v1044_v31 = vadd.f32 %v905_v37, %v904_v36 }
 0x15a   : > { %v4945_v5 = vsub.f32 %v4405_v44, %v703_v13  ;;  %v4948_v32 = vsub.f32 %v4408_v45, %v703_v13  ;;  %v545_v33 = vpop.xlane.xlu0 %544  ;;  %v1047_v21 = vadd.f32 %v907_v39, %v906_v38 }
 0x15b   : > { %v704_v25 = vmul.f32 0.00390625, %v545_v33  ;;  %1042 = vadd.xlane.f32.xlu1 %v1041_v15  ;;  %1045 = vadd.xlane.f32.xlu0 %v1044_v31  ;;  %v548_v27 = vpop.xlane.xlu1 %547  ;;  %v908_v42 = vmul.f32 %v4939_v30, %v4939_v30  ;;  %v909_v43 = vmul.f32 %v4942_v8, %v4942_v8 }
 0x15c   : > { %v705_v19 = vmul.f32 0.00390625, %v548_v27  ;;  %v910_v44 = vmul.f32 %v4945_v5, %v4945_v5  ;;  %v911_v45 = vmul.f32 %v4948_v32, %v4948_v32 }
 0x15d   : > { %v4959_v36 = vsub.f32 %v4415_v48, %v704_v25  ;;  %v4962_v15 = vsub.f32 %v4418_v49, %v704_v25  ;;  %v1050_v37 = vadd.f32 %v909_v43, %v908_v42 }
 0x15e   : > { %v4965_v13 = vsub.f32 %v4421_v50, %v705_v19  ;;  %v4968_v38 = vsub.f32 %v4424_v51, %v705_v19  ;;  %v551_v39 = vpop.xlane.xlu0 %550  ;;  %v1053_v27 = vadd.f32 %v911_v45, %v910_v44 }
 0x15f   : > { %v706_v31 = vmul.f32 0.00390625, %v551_v39  ;;  %1048 = vadd.xlane.f32.xlu1 %v1047_v21  ;;  %1051 = vadd.xlane.f32.xlu0 %v1050_v37  ;;  %v554_v33 = vpop.xlane.xlu1 %553  ;;  %v912_v48 = vmul.f32 %v4959_v36, %v4959_v36  ;;  %v913_v49 = vmul.f32 %v4962_v15, %v4962_v15 }
 0x160   : > { %v707_v25 = vmul.f32 0.00390625, %v554_v33  ;;  %v914_v50 = vmul.f32 %v4965_v13, %v4965_v13  ;;  %v915_v51 = vmul.f32 %v4968_v38, %v4968_v38 }
 0x161   : > { %v4979_v42 = vsub.f32 %v4431_v54, %v706_v31  ;;  %v4982_v21 = vsub.f32 %v4434_v55, %v706_v31  ;;  %v1056_v43 = vadd.f32 %v913_v49, %v912_v48 }
 0x162   : > { %v4985_v19 = vsub.f32 %v4437_v56, %v707_v25  ;;  %v4988_v44 = vsub.f32 %v4440_v57, %v707_v25  ;;  %v557_v45 = vpop.xlane.xlu0 %556  ;;  %v1059_v33 = vadd.f32 %v915_v51, %v914_v50 }
 0x163   : > { %v708_v37 = vmul.f32 0.00390625, %v557_v45  ;;  %1054 = vadd.xlane.f32.xlu1 %v1053_v27  ;;  %1057 = vadd.xlane.f32.xlu0 %v1056_v43  ;;  %v560_v39 = vpop.xlane.xlu1 %559  ;;  %v916_v54 = vmul.f32 %v4979_v42, %v4979_v42  ;;  %v917_v55 = vmul.f32 %v4982_v21, %v4982_v21 }
 0x164   : > { %v709_v31 = vmul.f32 0.00390625, %v560_v39  ;;  %v918_v56 = vmul.f32 %v4985_v19, %v4985_v19  ;;  %v919_v57 = vmul.f32 %v4988_v44, %v4988_v44 }
 0x165   : > { %v4999_v48 = vsub.f32 %v4447_v60, %v708_v37  ;;  %v5002_v27 = vsub.f32 %v4450_v61, %v708_v37  ;;  %v1062_v49 = vadd.f32 %v917_v55, %v916_v54 }
 0x166   : > { %v5005_v25 = vsub.f32 %v4453_v62, %v709_v31  ;;  %v5008_v50 = vsub.f32 %v4456_v63, %v709_v31  ;;  %v563_v51 = vpop.xlane.xlu0 %562  ;;  %v1065_v39 = vadd.f32 %v919_v57, %v918_v56 }
 0x167   : > { %v710_v43 = vmul.f32 0.00390625, %v563_v51  ;;  %1060 = vadd.xlane.f32.xlu1 %v1059_v33  ;;  %1063 = vadd.xlane.f32.xlu0 %v1062_v49  ;;  %v566_v45 = vpop.xlane.xlu1 %565  ;;  %v920_v60 = vmul.f32 %v4999_v48, %v4999_v48  ;;  %v921_v61 = vmul.f32 %v5002_v27, %v5002_v27 }
 0x168   : > { %v711_v37 = vmul.f32 0.00390625, %v566_v45  ;;  %v922_v62 = vmul.f32 %v5005_v25, %v5005_v25  ;;  %v923_v63 = vmul.f32 %v5008_v50, %v5008_v50 }
 0x169   : > { %v5019_v54 = vsub.f32 %v4463_v10, %v710_v43  ;;  %v5022_v33 = vsub.f32 %v4466_v11, %v710_v43  ;;  %v1068_v55 = vadd.f32 %v921_v61, %v920_v60 }
 0x16a   : > { %v5025_v31 = vsub.f32 %v4469_v16, %v711_v37  ;;  %v5028_v56 = vsub.f32 %v4472_v17, %v711_v37  ;;  %v569_v57 = vpop.xlane.xlu0 %568  ;;  %v1071_v45 = vadd.f32 %v923_v63, %v922_v62  ;;  %v6828_v37 = vld [vmem:[#allocation29_spill] sm:$0xff]  ;;  %v6830_v63 = vld [vmem:[#allocation30_spill] sm:$0xff] }
 0x16b   : > { %6822 = vst [vmem:[#allocation109_spill] sm:$0xff] %v5019_v54  ;;  %6823 = vst [vmem:[#allocation110_spill] sm:$0xff] %v5022_v33  ;;  %v712_v49 = vmul.f32 0.00390625, %v569_v57  ;;  %1066 = vadd.xlane.f32.xlu1 %v1065_v39  ;;  %1069 = vadd.xlane.f32.xlu0 %v1068_v55  ;;  %v572_v51 = vpop.xlane.xlu1 %571  ;;  %v924_v10 = vmul.f32 %v5019_v54, %v5019_v54  ;;  %v925_v11 = vmul.f32 %v5022_v33, %v5022_v33 }
 0x16c   : > { %6824 = vst [vmem:[#allocation111_spill] sm:$0xff] %v5025_v31  ;;  %6825 = vst [vmem:[#allocation112_spill] sm:$0xff] %v5028_v56  ;;  %v713_v43 = vmul.f32 0.00390625, %v572_v51  ;;  %v926_v16 = vmul.f32 %v5025_v31, %v5025_v31  ;;  %v927_v17 = vmul.f32 %v5028_v56, %v5028_v56 }
 0x16d   : > { %v5039_v60 = vsub.f32 %v4479_v28, %v712_v49  ;;  %v5042_v39 = vsub.f32 %v4482_v29, %v712_v49  ;;  %v1074_v61 = vadd.f32 %v925_v11, %v924_v10 }
 0x16e   : > { %v5045_v62 = vsub.f32 %v6828_v37, %v713_v43  ;;  %v5048_v55 = vsub.f32 %v6830_v63, %v713_v43  ;;  %v575_v57 = vpop.xlane.xlu0 %574  ;;  %v1077_v33 = vadd.f32 %v927_v17, %v926_v16  ;;  %v6832_v43 = vld [vmem:[#allocation31_spill] sm:$0xff]  ;;  %v6836_v17 = vld [vmem:[#allocation33_spill] sm:$0xff] }
 0x16f   : > { %6826 = vst [vmem:[#allocation113_spill] sm:$0xff] %v5039_v60  ;;  %6827 = vst [vmem:[#allocation114_spill] sm:$0xff] %v5042_v39  ;;  %v714_v51 = vmul.f32 0.00390625, %v575_v57  ;;  %1072 = vadd.xlane.f32.xlu1 %v1071_v45  ;;  %1075 = vadd.xlane.f32.xlu0 %v1074_v61  ;;  %v578_v31 = vpop.xlane.xlu1 %577  ;;  %v928_v28 = vmul.f32 %v5039_v60, %v5039_v60  ;;  %v929_v29 = vmul.f32 %v5042_v39, %v5042_v39  ;;  %v6834_v45 = vld [vmem:[#allocation32_spill] sm:$0xff]  ;;  %v6838_v57 = vld [vmem:[#allocation34_spill] sm:$0xff] }
 0x170   : > { %6829 = vst [vmem:[#allocation29_spill] sm:$0xff] %v5045_v62  ;;  %6831 = vst [vmem:[#allocation30_spill] sm:$0xff] %v5048_v55  ;;  %v715_v49 = vmul.f32 0.00390625, %v578_v31  ;;  %v930_v10 = vmul.f32 %v5045_v62, %v5045_v62  ;;  %v931_v11 = vmul.f32 %v5048_v55, %v5048_v55 }
 0x171   : > { %v5059_v37 = vsub.f32 %v6832_v43, %v714_v51  ;;  %v5062_v61 = vsub.f32 %v6834_v45, %v714_v51  ;;  %v1080_v16 = vadd.f32 %v929_v29, %v928_v28 }
 0x172   : > { %v5065_v63 = vsub.f32 %v6836_v17, %v715_v49  ;;  %v5068_v60 = vsub.f32 %v6838_v57, %v715_v49  ;;  %v581_v31 = vpop.xlane.xlu0 %580  ;;  %v1083_v56 = vadd.f32 %v931_v11, %v930_v10  ;;  %v6840_v49 = vld [vmem:[#allocation35_spill] sm:$0xff]  ;;  %v6844_v11 = vld [vmem:[#allocation37_spill] sm:$0xff] }
 0x173   : > { %6833 = vst [vmem:[#allocation31_spill] sm:$0xff] %v5059_v37  ;;  %6835 = vst [vmem:[#allocation32_spill] sm:$0xff] %v5062_v61  ;;  %v716_v39 = vmul.f32 0.00390625, %v581_v31  ;;  %1078 = vadd.xlane.f32.xlu1 %v1077_v33  ;;  %1081 = vadd.xlane.f32.xlu0 %v1080_v16  ;;  %v584_v62 = vpop.xlane.xlu1 %583  ;;  %v932_v43 = vmul.f32 %v5059_v37, %v5059_v37  ;;  %v933_v51 = vmul.f32 %v5062_v61, %v5062_v61  ;;  %v6842_v33 = vld [vmem:[#allocation36_spill] sm:$0xff]  ;;  %v6846_v31 = vld [vmem:[#allocation38_spill] sm:$0xff] }
 0x174   : > { %6837 = vst [vmem:[#allocation33_spill] sm:$0xff] %v5065_v63  ;;  %6839 = vst [vmem:[#allocation34_spill] sm:$0xff] %v5068_v60  ;;  %v717_v45 = vmul.f32 0.00390625, %v584_v62  ;;  %v934_v28 = vmul.f32 %v5065_v63, %v5065_v63  ;;  %v935_v29 = vmul.f32 %v5068_v60, %v5068_v60 }
 0x175   : > { %v5079_v17 = vsub.f32 %v6840_v49, %v716_v39  ;;  %v5082_v16 = vsub.f32 %v6842_v33, %v716_v39  ;;  %v1086_v10 = vadd.f32 %v933_v51, %v932_v43 }
 0x176   : > { %v5085_v57 = vsub.f32 %v6844_v11, %v717_v45  ;;  %v5088_v37 = vsub.f32 %v6846_v31, %v717_v45  ;;  %v587_v62 = vpop.xlane.xlu0 %586  ;;  %v1089_v55 = vadd.f32 %v935_v29, %v934_v28  ;;  %v6848_v45 = vld [vmem:[#allocation39_spill] sm:$0xff]  ;;  %v6852_v29 = vld [vmem:[#allocation41_spill] sm:$0xff] }
 0x177   : > { %6841 = vst [vmem:[#allocation35_spill] sm:$0xff] %v5079_v17  ;;  %6843 = vst [vmem:[#allocation36_spill] sm:$0xff] %v5082_v16  ;;  %v718_v61 = vmul.f32 0.00390625, %v587_v62  ;;  %1084 = vadd.xlane.f32.xlu1 %v1083_v56  ;;  %1087 = vadd.xlane.f32.xlu0 %v1086_v10  ;;  %v590_v63 = vpop.xlane.xlu1 %589  ;;  %v936_v49 = vmul.f32 %v5079_v17, %v5079_v17  ;;  %v937_v39 = vmul.f32 %v5082_v16, %v5082_v16  ;;  %v6850_v56 = vld [vmem:[#allocation40_spill] sm:$0xff]  ;;  %v6854_v62 = vld [vmem:[#allocation42_spill] sm:$0xff] }
 0x178   : > { %6845 = vst [vmem:[#allocation37_spill] sm:$0xff] %v5085_v57  ;;  %6847 = vst [vmem:[#allocation38_spill] sm:$0xff] %v5088_v37  ;;  %v719_v33 = vmul.f32 0.00390625, %v590_v63  ;;  %v938_v43 = vmul.f32 %v5085_v57, %v5085_v57  ;;  %v939_v51 = vmul.f32 %v5088_v37, %v5088_v37 }
 0x179   : > { %v5099_v11 = vsub.f32 %v6848_v45, %v718_v61  ;;  %v5102_v10 = vsub.f32 %v6850_v56, %v718_v61  ;;  %v1092_v28 = vadd.f32 %v937_v39, %v936_v49 }
 0x17a   : > { %v5105_v31 = vsub.f32 %v6852_v29, %v719_v33  ;;  %v5108_v17 = vsub.f32 %v6854_v62, %v719_v33  ;;  %v593_v63 = vpop.xlane.xlu0 %592  ;;  %v1095_v60 = vadd.f32 %v939_v51, %v938_v43  ;;  %v6856_v33 = vld [vmem:[#allocation43_spill] sm:$0xff]  ;;  %v6860_v51 = vld [vmem:[#allocation45_spill] sm:$0xff] }
 0x17b   : > { %6849 = vst [vmem:[#allocation39_spill] sm:$0xff] %v5099_v11  ;;  %6851 = vst [vmem:[#allocation40_spill] sm:$0xff] %v5102_v10  ;;  %v720_v16 = vmul.f32 0.00390625, %v593_v63  ;;  %1090 = vadd.xlane.f32.xlu1 %v1089_v55  ;;  %1093 = vadd.xlane.f32.xlu0 %v1092_v28  ;;  %v596_v57 = vpop.xlane.xlu1 %595  ;;  %v940_v45 = vmul.f32 %v5099_v11, %v5099_v11  ;;  %v941_v61 = vmul.f32 %v5102_v10, %v5102_v10  ;;  %v6858_v55 = vld [vmem:[#allocation44_spill] sm:$0xff]  ;;  %v6862_v63 = vld [vmem:[#allocation46_spill] sm:$0xff] }
 0x17c   : > { %6853 = vst [vmem:[#allocation41_spill] sm:$0xff] %v5105_v31  ;;  %6855 = vst [vmem:[#allocation42_spill] sm:$0xff] %v5108_v17  ;;  %v721_v56 = vmul.f32 0.00390625, %v596_v57  ;;  %v942_v49 = vmul.f32 %v5105_v31, %v5105_v31  ;;  %v943_v39 = vmul.f32 %v5108_v17, %v5108_v17 }
 0x17d   : > { %v5119_v29 = vsub.f32 %v6856_v33, %v720_v16  ;;  %v5122_v28 = vsub.f32 %v6858_v55, %v720_v16  ;;  %v1098_v43 = vadd.f32 %v941_v61, %v940_v45 }
 0x17e   : > { %v5125_v62 = vsub.f32 %v6860_v51, %v721_v56  ;;  %v5128_v11 = vsub.f32 %v6862_v63, %v721_v56  ;;  %v599_v57 = vpop.xlane.xlu0 %598  ;;  %v1101_v37 = vadd.f32 %v943_v39, %v942_v49  ;;  %v6864_v56 = vld [vmem:[#allocation47_spill] sm:$0xff]  ;;  %v6868_v39 = vld [vmem:[#allocation49_spill] sm:$0xff] }
 0x17f   : > { %6857 = vst [vmem:[#allocation43_spill] sm:$0xff] %v5119_v29  ;;  %6859 = vst [vmem:[#allocation44_spill] sm:$0xff] %v5122_v28  ;;  %v722_v10 = vmul.f32 0.00390625, %v599_v57  ;;  %1096 = vadd.xlane.f32.xlu1 %v1095_v60  ;;  %1099 = vadd.xlane.f32.xlu0 %v1098_v43  ;;  %v602_v31 = vpop.xlane.xlu1 %601  ;;  %v944_v33 = vmul.f32 %v5119_v29, %v5119_v29  ;;  %v945_v16 = vmul.f32 %v5122_v28, %v5122_v28  ;;  %v6866_v60 = vld [vmem:[#allocation48_spill] sm:$0xff]  ;;  %v6870_v57 = vld [vmem:[#allocation50_spill] sm:$0xff] }
 0x180   : > { %6861 = vst [vmem:[#allocation45_spill] sm:$0xff] %v5125_v62  ;;  %6863 = vst [vmem:[#allocation46_spill] sm:$0xff] %v5128_v11  ;;  %v723_v55 = vmul.f32 0.00390625, %v602_v31  ;;  %v946_v45 = vmul.f32 %v5125_v62, %v5125_v62  ;;  %v947_v61 = vmul.f32 %v5128_v11, %v5128_v11 }
 0x181   : > { %v5139_v51 = vsub.f32 %v6864_v56, %v722_v10  ;;  %v5142_v43 = vsub.f32 %v6866_v60, %v722_v10  ;;  %v1104_v49 = vadd.f32 %v945_v16, %v944_v33  ;;  %v6872_v60 = vld [vmem:[#allocation51_spill] sm:$0xff] }
 0x182   : > { %v5145_v63 = vsub.f32 %v6868_v39, %v723_v55  ;;  %v5148_v29 = vsub.f32 %v6870_v57, %v723_v55  ;;  %v605_v31 = vpop.xlane.xlu0 %604  ;;  %v1107_v10 = vadd.f32 %v947_v61, %v946_v45  ;;  %v6874_v57 = vld [vmem:[#allocation52_spill] sm:$0xff] }
 0x183   : > { %6865 = vst [vmem:[#allocation47_spill] sm:$0xff] %v5139_v51  ;;  %6867 = vst [vmem:[#allocation48_spill] sm:$0xff] %v5142_v43  ;;  %v948_v62 = vmul.f32 %v5139_v51, %v5139_v51  ;;  %v949_v11 = vmul.f32 %v5142_v43, %v5142_v43  ;;  %v724_v28 = vmul.f32 0.00390625, %v605_v31  ;;  %1102 = vadd.xlane.f32.xlu1 %v1101_v37  ;;  %1105 = vadd.xlane.f32.xlu0 %v1104_v49  ;;  %v608_v56 = vpop.xlane.xlu1 %607  ;;  %v6876_v43 = vld [vmem:[#allocation53_spill] sm:$0xff]  ;;  %v6878_v37 = vld [vmem:[#allocation54_spill] sm:$0xff] }
 0x184   : > { %6869 = vst [vmem:[#allocation49_spill] sm:$0xff] %v5145_v63  ;;  %6871 = vst [vmem:[#allocation50_spill] sm:$0xff] %v5148_v29  ;;  %v950_v33 = vmul.f32 %v5145_v63, %v5145_v63  ;;  %v951_v16 = vmul.f32 %v5148_v29, %v5148_v29  ;;  %v725_v55 = vmul.f32 0.00390625, %v608_v56 }
 0x185   : > { %v5159_v39 = vsub.f32 %v6872_v60, %v724_v28  ;;  %v5162_v51 = vsub.f32 %v6874_v57, %v724_v28  ;;  %v1110_v17 = vadd.f32 %v949_v11, %v948_v62 }
 0x186   : > { %v5165_v31 = vsub.f32 %v6876_v43, %v725_v55  ;;  %v5168_v49 = vsub.f32 %v6878_v37, %v725_v55  ;;  %v611_v45 = vpop.xlane.xlu0 %610  ;;  %v1113_v28 = vadd.f32 %v951_v16, %v950_v33  ;;  %v6880_v55 = vld [vmem:[#allocation55_spill] sm:$0xff]  ;;  %v6882_v37 = vld [vmem:[#allocation56_spill] sm:$0xff] }
 0x187   : > { %6873 = vst [vmem:[#allocation51_spill] sm:$0xff] %v5159_v39  ;;  %6875 = vst [vmem:[#allocation52_spill] sm:$0xff] %v5162_v51  ;;  %v952_v61 = vmul.f32 %v5159_v39, %v5159_v39  ;;  %v953_v56 = vmul.f32 %v5162_v51, %v5162_v51  ;;  %v726_v29 = vmul.f32 0.00390625, %v611_v45  ;;  %1108 = vadd.xlane.f32.xlu1 %v1107_v10  ;;  %1111 = vadd.xlane.f32.xlu0 %v1110_v17  ;;  %v614_v60 = vpop.xlane.xlu1 %613  ;;  %v6884_v51 = vld [vmem:[#allocation57_spill] sm:$0xff]  ;;  %v6886_v17 = vld [vmem:[#allocation58_spill] sm:$0xff] }
 0x188   : > { %6877 = vst [vmem:[#allocation53_spill] sm:$0xff] %v5165_v31  ;;  %6879 = vst [vmem:[#allocation54_spill] sm:$0xff] %v5168_v49  ;;  %v954_v11 = vmul.f32 %v5165_v31, %v5165_v31  ;;  %v955_v62 = vmul.f32 %v5168_v49, %v5168_v49  ;;  %v727_v43 = vmul.f32 0.00390625, %v614_v60 }
 0x189   : > { %v5179_v57 = vsub.f32 %v6880_v55, %v726_v29  ;;  %v5182_v39 = vsub.f32 %v6882_v37, %v726_v29  ;;  %v1116_v63 = vadd.f32 %v953_v56, %v952_v61 }
 0x18a   : > { %v5185_v45 = vsub.f32 %v6884_v51, %v727_v43  ;;  %v5188_v10 = vsub.f32 %v6886_v17, %v727_v43  ;;  %v617_v33 = vpop.xlane.xlu0 %616  ;;  %v1119_v29 = vadd.f32 %v955_v62, %v954_v11  ;;  %v6888_v43 = vld [vmem:[#allocation59_spill] sm:$0xff]  ;;  %v6890_v17 = vld [vmem:[#allocation60_spill] sm:$0xff] }
 0x18b   : > { %6881 = vst [vmem:[#allocation55_spill] sm:$0xff] %v5179_v57  ;;  %6883 = vst [vmem:[#allocation56_spill] sm:$0xff] %v5182_v39  ;;  %v956_v16 = vmul.f32 %v5179_v57, %v5179_v57  ;;  %v957_v60 = vmul.f32 %v5182_v39, %v5182_v39  ;;  %v728_v49 = vmul.f32 0.00390625, %v617_v33  ;;  %1114 = vadd.xlane.f32.xlu1 %v1113_v28  ;;  %1117 = vadd.xlane.f32.xlu0 %v1116_v63  ;;  %v620_v55 = vpop.xlane.xlu1 %619  ;;  %v6892_v39 = vld [vmem:[#allocation61_spill] sm:$0xff]  ;;  %v6894_v63 = vld [vmem:[#allocation62_spill] sm:$0xff] }
 0x18c   : > { %6885 = vst [vmem:[#allocation57_spill] sm:$0xff] %v5185_v45  ;;  %6887 = vst [vmem:[#allocation58_spill] sm:$0xff] %v5188_v10  ;;  %v958_v61 = vmul.f32 %v5185_v45, %v5185_v45  ;;  %v959_v51 = vmul.f32 %v5188_v10, %v5188_v10  ;;  %v729_v56 = vmul.f32 0.00390625, %v620_v55 }
 0x18d   : > { %v5199_v37 = vsub.f32 %v6888_v43, %v728_v49  ;;  %v5202_v57 = vsub.f32 %v6890_v17, %v728_v49  ;;  %v1122_v31 = vadd.f32 %v957_v60, %v956_v16 }
 0x18e   : > { %v5205_v33 = vsub.f32 %v6892_v39, %v729_v56  ;;  %v5208_v28 = vsub.f32 %v6894_v63, %v729_v56  ;;  %v623_v11 = vpop.xlane.xlu0 %622  ;;  %v1125_v49 = vadd.f32 %v959_v51, %v958_v61  ;;  %v6896_v56 = vld [vmem:[#allocation63_spill] sm:$0xff]  ;;  %v6898_v63 = vld [vmem:[#allocation64_spill] sm:$0xff] }
 0x18f   : > { %6889 = vst [vmem:[#allocation59_spill] sm:$0xff] %v5199_v37  ;;  %6891 = vst [vmem:[#allocation60_spill] sm:$0xff] %v5202_v57  ;;  %v960_v62 = vmul.f32 %v5199_v37, %v5199_v37  ;;  %v961_v55 = vmul.f32 %v5202_v57, %v5202_v57  ;;  %v730_v10 = vmul.f32 0.00390625, %v623_v11  ;;  %1120 = vadd.xlane.f32.xlu1 %v1119_v29  ;;  %1123 = vadd.xlane.f32.xlu0 %v1122_v31  ;;  %v626_v43 = vpop.xlane.xlu1 %625  ;;  %v6900_v57 = vld [vmem:[#allocation65_spill] sm:$0xff]  ;;  %v6902_v31 = vld [vmem:[#allocation66_spill] sm:$0xff] }
 0x190   : > { %6893 = vst [vmem:[#allocation61_spill] sm:$0xff] %v5205_v33  ;;  %6895 = vst [vmem:[#allocation62_spill] sm:$0xff] %v5208_v28  ;;  %v962_v16 = vmul.f32 %v5205_v33, %v5205_v33  ;;  %v963_v39 = vmul.f32 %v5208_v28, %v5208_v28  ;;  %v731_v60 = vmul.f32 0.00390625, %v626_v43 }
 0x191   : > { %v5219_v17 = vsub.f32 %v6896_v56, %v730_v10  ;;  %v5222_v37 = vsub.f32 %v6898_v63, %v730_v10  ;;  %v1128_v45 = vadd.f32 %v961_v55, %v960_v62 }
 0x192   : > { %v5225_v11 = vsub.f32 %v6900_v57, %v731_v60  ;;  %v5228_v29 = vsub.f32 %v6902_v31, %v731_v60  ;;  %v629_v61 = vpop.xlane.xlu0 %628  ;;  %v1131_v10 = vadd.f32 %v963_v39, %v962_v16  ;;  %v6904_v60 = vld [vmem:[#allocation67_spill] sm:$0xff]  ;;  %v6906_v31 = vld [vmem:[#allocation68_spill] sm:$0xff] }
 0x193   : > { %6897 = vst [vmem:[#allocation63_spill] sm:$0xff] %v5219_v17  ;;  %6899 = vst [vmem:[#allocation64_spill] sm:$0xff] %v5222_v37  ;;  %v964_v51 = vmul.f32 %v5219_v17, %v5219_v17  ;;  %v965_v43 = vmul.f32 %v5222_v37, %v5222_v37  ;;  %v732_v28 = vmul.f32 0.00390625, %v629_v61  ;;  %1126 = vadd.xlane.f32.xlu1 %v1125_v49  ;;  %1129 = vadd.xlane.f32.xlu0 %v1128_v45  ;;  %v632_v56 = vpop.xlane.xlu1 %631  ;;  %v6908_v37 = vld [vmem:[#allocation69_spill] sm:$0xff]  ;;  %v6910_v45 = vld [vmem:[#allocation70_spill] sm:$0xff] }
 0x194   : > { %6901 = vst [vmem:[#allocation65_spill] sm:$0xff] %v5225_v11  ;;  %6903 = vst [vmem:[#allocation66_spill] sm:$0xff] %v5228_v29  ;;  %v966_v62 = vmul.f32 %v5225_v11, %v5225_v11  ;;  %v967_v57 = vmul.f32 %v5228_v29, %v5228_v29  ;;  %v733_v55 = vmul.f32 0.00390625, %v632_v56 }
 0x195   : > { %v5239_v63 = vsub.f32 %v6904_v60, %v732_v28  ;;  %v5242_v17 = vsub.f32 %v6906_v31, %v732_v28  ;;  %v1134_v33 = vadd.f32 %v965_v43, %v964_v51 }
 0x196   : > { %v5245_v61 = vsub.f32 %v6908_v37, %v733_v55  ;;  %v5248_v49 = vsub.f32 %v6910_v45, %v733_v55  ;;  %v635_v16 = vpop.xlane.xlu0 %634  ;;  %v1137_v28 = vadd.f32 %v967_v57, %v966_v62  ;;  %v6912_v55 = vld [vmem:[#allocation71_spill] sm:$0xff]  ;;  %v6914_v45 = vld [vmem:[#allocation72_spill] sm:$0xff] }
 0x197   : > { %6905 = vst [vmem:[#allocation67_spill] sm:$0xff] %v5239_v63  ;;  %6907 = vst [vmem:[#allocation68_spill] sm:$0xff] %v5242_v17  ;;  %v968_v39 = vmul.f32 %v5239_v63, %v5239_v63  ;;  %v969_v56 = vmul.f32 %v5242_v17, %v5242_v17  ;;  %v734_v29 = vmul.f32 0.00390625, %v635_v16  ;;  %1132 = vadd.xlane.f32.xlu1 %v1131_v10  ;;  %1135 = vadd.xlane.f32.xlu0 %v1134_v33  ;;  %v638_v60 = vpop.xlane.xlu1 %637  ;;  %v6916_v17 = vld [vmem:[#allocation73_spill] sm:$0xff]  ;;  %v6918_v33 = vld [vmem:[#allocation74_spill] sm:$0xff] }
 0x198   : > { %6909 = vst [vmem:[#allocation69_spill] sm:$0xff] %v5245_v61  ;;  %6911 = vst [vmem:[#allocation70_spill] sm:$0xff] %v5248_v49  ;;  %v970_v51 = vmul.f32 %v5245_v61, %v5245_v61  ;;  %v971_v37 = vmul.f32 %v5248_v49, %v5248_v49  ;;  %v735_v43 = vmul.f32 0.00390625, %v638_v60 }
 0x199   : > { %v5259_v31 = vsub.f32 %v6912_v55, %v734_v29  ;;  %v5262_v63 = vsub.f32 %v6914_v45, %v734_v29  ;;  %v1140_v11 = vadd.f32 %v969_v56, %v968_v39 }
 0x19a   : > { %v5265_v16 = vsub.f32 %v6916_v17, %v735_v43  ;;  %v5268_v10 = vsub.f32 %v6918_v33, %v735_v43  ;;  %v641_v62 = vpop.xlane.xlu0 %640  ;;  %v1143_v29 = vadd.f32 %v971_v37, %v970_v51  ;;  %v6920_v43 = vld [vmem:[#allocation75_spill] sm:$0xff]  ;;  %v6922_v33 = vld [vmem:[#allocation76_spill] sm:$0xff] }
 0x19b   : > { %6913 = vst [vmem:[#allocation71_spill] sm:$0xff] %v5259_v31  ;;  %6915 = vst [vmem:[#allocation72_spill] sm:$0xff] %v5262_v63  ;;  %v972_v57 = vmul.f32 %v5259_v31, %v5259_v31  ;;  %v973_v60 = vmul.f32 %v5262_v63, %v5262_v63  ;;  %v736_v49 = vmul.f32 0.00390625, %v641_v62  ;;  %1138 = vadd.xlane.f32.xlu1 %v1137_v28  ;;  %1141 = vadd.xlane.f32.xlu0 %v1140_v11  ;;  %v644_v55 = vpop.xlane.xlu1 %643  ;;  %v6924_v63 = vld [vmem:[#allocation77_spill] sm:$0xff]  ;;  %v6926_v11 = vld [vmem:[#allocation78_spill] sm:$0xff] }
 0x19c   : > { %6917 = vst [vmem:[#allocation73_spill] sm:$0xff] %v5265_v16  ;;  %6919 = vst [vmem:[#allocation74_spill] sm:$0xff] %v5268_v10  ;;  %v974_v39 = vmul.f32 %v5265_v16, %v5265_v16  ;;  %v975_v17 = vmul.f32 %v5268_v10, %v5268_v10  ;;  %v737_v56 = vmul.f32 0.00390625, %v644_v55 }
 0x19d   : > { %v5279_v45 = vsub.f32 %v6920_v43, %v736_v49  ;;  %v5282_v31 = vsub.f32 %v6922_v33, %v736_v49  ;;  %v1146_v61 = vadd.f32 %v973_v60, %v972_v57 }
 0x19e   : > { %v5285_v62 = vsub.f32 %v6924_v63, %v737_v56  ;;  %v5288_v28 = vsub.f32 %v6926_v11, %v737_v56  ;;  %v647_v51 = vpop.xlane.xlu0 %646  ;;  %v1149_v49 = vadd.f32 %v975_v17, %v974_v39  ;;  %v6928_v56 = vld [vmem:[#allocation79_spill] sm:$0xff]  ;;  %v6930_v11 = vld [vmem:[#allocation80_spill] sm:$0xff] }
 0x19f   : > { %6921 = vst [vmem:[#allocation75_spill] sm:$0xff] %v5279_v45  ;;  %6923 = vst [vmem:[#allocation76_spill] sm:$0xff] %v5282_v31  ;;  %v976_v37 = vmul.f32 %v5279_v45, %v5279_v45  ;;  %v977_v55 = vmul.f32 %v5282_v31, %v5282_v31  ;;  %v738_v10 = vmul.f32 0.00390625, %v647_v51  ;;  %1144 = vadd.xlane.f32.xlu1 %v1143_v29  ;;  %1147 = vadd.xlane.f32.xlu0 %v1146_v61  ;;  %v650_v43 = vpop.xlane.xlu1 %649  ;;  %v6932_v31 = vld [vmem:[#allocation81_spill] sm:$0xff]  ;;  %v6934_v61 = vld [vmem:[#allocation82_spill] sm:$0xff] }
 0x1a0   : > { %6925 = vst [vmem:[#allocation77_spill] sm:$0xff] %v5285_v62  ;;  %6927 = vst [vmem:[#allocation78_spill] sm:$0xff] %v5288_v28  ;;  %v978_v57 = vmul.f32 %v5285_v62, %v5285_v62  ;;  %v979_v63 = vmul.f32 %v5288_v28, %v5288_v28  ;;  %v739_v60 = vmul.f32 0.00390625, %v650_v43 }
 0x1a1   : > { %v5299_v33 = vsub.f32 %v6928_v56, %v738_v10  ;;  %v5302_v45 = vsub.f32 %v6930_v11, %v738_v10  ;;  %v1152_v16 = vadd.f32 %v977_v55, %v976_v37 }
 0x1a2   : > { %v5305_v51 = vsub.f32 %v6932_v31, %v739_v60  ;;  %v5308_v29 = vsub.f32 %v6934_v61, %v739_v60  ;;  %v653_v39 = vpop.xlane.xlu0 %652  ;;  %v1155_v10 = vadd.f32 %v979_v63, %v978_v57  ;;  %v6936_v60 = vld [vmem:[#allocation83_spill] sm:$0xff]  ;;  %v6938_v61 = vld [vmem:[#allocation84_spill] sm:$0xff] }
 0x1a3   : > { %6929 = vst [vmem:[#allocation79_spill] sm:$0xff] %v5299_v33  ;;  %6931 = vst [vmem:[#allocation80_spill] sm:$0xff] %v5302_v45  ;;  %v980_v17 = vmul.f32 %v5299_v33, %v5299_v33  ;;  %v981_v43 = vmul.f32 %v5302_v45, %v5302_v45  ;;  %v740_v28 = vmul.f32 0.00390625, %v653_v39  ;;  %1150 = vadd.xlane.f32.xlu1 %v1149_v49  ;;  %1153 = vadd.xlane.f32.xlu0 %v1152_v16  ;;  %v656_v56 = vpop.xlane.xlu1 %655  ;;  %v6940_v45 = vld [vmem:[#allocation85_spill] sm:$0xff]  ;;  %v6942_v16 = vld [vmem:[#allocation86_spill] sm:$0xff] }
 0x1a4   : > { %6933 = vst [vmem:[#allocation81_spill] sm:$0xff] %v5305_v51  ;;  %6935 = vst [vmem:[#allocation82_spill] sm:$0xff] %v5308_v29  ;;  %v982_v37 = vmul.f32 %v5305_v51, %v5305_v51  ;;  %v983_v31 = vmul.f32 %v5308_v29, %v5308_v29  ;;  %v741_v55 = vmul.f32 0.00390625, %v656_v56 }
 0x1a5   : > { %v5319_v11 = vsub.f32 %v6936_v60, %v740_v28  ;;  %v5322_v33 = vsub.f32 %v6938_v61, %v740_v28  ;;  %v1158_v62 = vadd.f32 %v981_v43, %v980_v17 }
 0x1a6   : > { %v5325_v39 = vsub.f32 %v6940_v45, %v741_v55  ;;  %v5328_v49 = vsub.f32 %v6942_v16, %v741_v55  ;;  %v659_v57 = vpop.xlane.xlu0 %658  ;;  %v1161_v28 = vadd.f32 %v983_v31, %v982_v37  ;;  %v6944_v55 = vld [vmem:[#allocation87_spill] sm:$0xff]  ;;  %v6946_v16 = vld [vmem:[#allocation88_spill] sm:$0xff] }
 0x1a7   : > { %6937 = vst [vmem:[#allocation83_spill] sm:$0xff] %v5319_v11  ;;  %6939 = vst [vmem:[#allocation84_spill] sm:$0xff] %v5322_v33  ;;  %v984_v63 = vmul.f32 %v5319_v11, %v5319_v11  ;;  %v985_v56 = vmul.f32 %v5322_v33, %v5322_v33  ;;  %v742_v29 = vmul.f32 0.00390625, %v659_v57  ;;  %1156 = vadd.xlane.f32.xlu1 %v1155_v10  ;;  %1159 = vadd.xlane.f32.xlu0 %v1158_v62  ;;  %v662_v60 = vpop.xlane.xlu1 %661  ;;  %v6948_v33 = vld [vmem:[#allocation89_spill] sm:$0xff]  ;;  %v6950_v62 = vld [vmem:[#allocation90_spill] sm:$0xff] }
 0x1a8   : > { %6941 = vst [vmem:[#allocation85_spill] sm:$0xff] %v5325_v39  ;;  %6943 = vst [vmem:[#allocation86_spill] sm:$0xff] %v5328_v49  ;;  %v986_v17 = vmul.f32 %v5325_v39, %v5325_v39  ;;  %v987_v45 = vmul.f32 %v5328_v49, %v5328_v49  ;;  %v743_v43 = vmul.f32 0.00390625, %v662_v60 }
 0x1a9   : > { %v5339_v61 = vsub.f32 %v6944_v55, %v742_v29  ;;  %v5342_v11 = vsub.f32 %v6946_v16, %v742_v29  ;;  %v1164_v51 = vadd.f32 %v985_v56, %v984_v63 }
 0x1aa   : > { %v5345_v57 = vsub.f32 %v6948_v33, %v743_v43  ;;  %v5348_v10 = vsub.f32 %v6950_v62, %v743_v43  ;;  %v665_v37 = vpop.xlane.xlu0 %664  ;;  %v1167_v29 = vadd.f32 %v987_v45, %v986_v17  ;;  %v6952_v43 = vld [vmem:[#allocation91_spill] sm:$0xff]  ;;  %v6954_v62 = vld [vmem:[#allocation92_spill] sm:$0xff] }
 0x1ab   : > { %6945 = vst [vmem:[#allocation87_spill] sm:$0xff] %v5339_v61  ;;  %6947 = vst [vmem:[#allocation88_spill] sm:$0xff] %v5342_v11  ;;  %v988_v31 = vmul.f32 %v5339_v61, %v5339_v61  ;;  %v989_v60 = vmul.f32 %v5342_v11, %v5342_v11  ;;  %v744_v49 = vmul.f32 0.00390625, %v665_v37  ;;  %1162 = vadd.xlane.f32.xlu1 %v1161_v28  ;;  %1165 = vadd.xlane.f32.xlu0 %v1164_v51  ;;  %v668_v55 = vpop.xlane.xlu1 %667  ;;  %v6956_v11 = vld [vmem:[#allocation93_spill] sm:$0xff]  ;;  %v6958_v51 = vld [vmem:[#allocation94_spill] sm:$0xff] }
 0x1ac   : > { %6949 = vst [vmem:[#allocation89_spill] sm:$0xff] %v5345_v57  ;;  %6951 = vst [vmem:[#allocation90_spill] sm:$0xff] %v5348_v10  ;;  %v990_v63 = vmul.f32 %v5345_v57, %v5345_v57  ;;  %v991_v33 = vmul.f32 %v5348_v10, %v5348_v10  ;;  %v745_v56 = vmul.f32 0.00390625, %v668_v55 }
 0x1ad   : > { %v5359_v16 = vsub.f32 %v6952_v43, %v744_v49  ;;  %v5362_v61 = vsub.f32 %v6954_v62, %v744_v49  ;;  %v1170_v39 = vadd.f32 %v989_v60, %v988_v31 }
 0x1ae   : > { %v5365_v37 = vsub.f32 %v6956_v11, %v745_v56  ;;  %v5368_v28 = vsub.f32 %v6958_v51, %v745_v56  ;;  %v671_v17 = vpop.xlane.xlu0 %670  ;;  %v1173_v49 = vadd.f32 %v991_v33, %v990_v63  ;;  %v6960_v56 = vld [vmem:[#allocation95_spill] sm:$0xff]  ;;  %v6962_v51 = vld [vmem:[#allocation96_spill] sm:$0xff] }
 0x1af   : > { %6953 = vst [vmem:[#allocation91_spill] sm:$0xff] %v5359_v16  ;;  %6955 = vst [vmem:[#allocation92_spill] sm:$0xff] %v5362_v61  ;;  %v992_v45 = vmul.f32 %v5359_v16, %v5359_v16  ;;  %v993_v55 = vmul.f32 %v5362_v61, %v5362_v61  ;;  %v746_v10 = vmul.f32 0.00390625, %v671_v17  ;;  %1168 = vadd.xlane.f32.xlu1 %v1167_v29  ;;  %1171 = vadd.xlane.f32.xlu0 %v1170_v39  ;;  %v674_v43 = vpop.xlane.xlu1 %673  ;;  %v6964_v61 = vld [vmem:[#allocation97_spill] sm:$0xff]  ;;  %v6966_v39 = vld [vmem:[#allocation98_spill] sm:$0xff] }
 0x1b0   : > { %6957 = vst [vmem:[#allocation93_spill] sm:$0xff] %v5365_v37  ;;  %6959 = vst [vmem:[#allocation94_spill] sm:$0xff] %v5368_v28  ;;  %v994_v31 = vmul.f32 %v5365_v37, %v5365_v37  ;;  %v995_v11 = vmul.f32 %v5368_v28, %v5368_v28  ;;  %v747_v60 = vmul.f32 0.00390625, %v674_v43 }
 0x1b1   : > { %v5379_v62 = vsub.f32 %v6960_v56, %v746_v10  ;;  %v5382_v16 = vsub.f32 %v6962_v51, %v746_v10  ;;  %v1176_v57 = vadd.f32 %v993_v55, %v992_v45 }
 0x1b2   : > { %v5385_v17 = vsub.f32 %v6964_v61, %v747_v60  ;;  %v5388_v29 = vsub.f32 %v6966_v39, %v747_v60  ;;  %v677_v63 = vpop.xlane.xlu0 %676  ;;  %v1179_v10 = vadd.f32 %v995_v11, %v994_v31  ;;  %v6968_v60 = vld [vmem:[#allocation99_spill] sm:$0xff]  ;;  %v6970_v39 = vld [vmem:[#allocation100_spill] sm:$0xff] }
 0x1b3   : > { %6961 = vst [vmem:[#allocation95_spill] sm:$0xff] %v5379_v62  ;;  %6963 = vst [vmem:[#allocation96_spill] sm:$0xff] %v5382_v16  ;;  %v996_v33 = vmul.f32 %v5379_v62, %v5379_v62  ;;  %v997_v43 = vmul.f32 %v5382_v16, %v5382_v16  ;;  %v748_v28 = vmul.f32 0.00390625, %v677_v63  ;;  %1174 = vadd.xlane.f32.xlu1 %v1173_v49  ;;  %1177 = vadd.xlane.f32.xlu0 %v1176_v57  ;;  %v680_v56 = vpop.xlane.xlu1 %679  ;;  %v6972_v16 = vld [vmem:[#allocation101_spill] sm:$0xff]  ;;  %v6974_v57 = vld [vmem:[#allocation102_spill] sm:$0xff] }
 0x1b4   : > { %6965 = vst [vmem:[#allocation97_spill] sm:$0xff] %v5385_v17  ;;  %6967 = vst [vmem:[#allocation98_spill] sm:$0xff] %v5388_v29  ;;  %v998_v45 = vmul.f32 %v5385_v17, %v5385_v17  ;;  %v999_v61 = vmul.f32 %v5388_v29, %v5388_v29  ;;  %v749_v55 = vmul.f32 0.00390625, %v680_v56 }
 0x1b5   : > { %v5399_v51 = vsub.f32 %v6968_v60, %v748_v28  ;;  %v5402_v62 = vsub.f32 %v6970_v39, %v748_v28  ;;  %v1182_v37 = vadd.f32 %v997_v43, %v996_v33  ;;  %v6977_v39 = vld [vmem:[#allocation103_spill] sm:$0xff] }
 0x1b6   : > { %v5405_v63 = vsub.f32 %v6972_v16, %v749_v55  ;;  %v5408_v49 = vsub.f32 %v6974_v57, %v749_v55  ;;  %v683_v31 = vpop.xlane.xlu0 %682  ;;  %v1185_v28 = vadd.f32 %v999_v61, %v998_v45 }
 0x1b7   : > { %6969 = vst [vmem:[#allocation99_spill] sm:$0xff] %v5399_v51  ;;  %6971 = vst [vmem:[#allocation100_spill] sm:$0xff] %v5402_v62  ;;  %v1000_v11 = vmul.f32 %v5399_v51, %v5399_v51  ;;  %v1001_v56 = vmul.f32 %v5402_v62, %v5402_v62  ;;  %v750_v29 = vmul.f32 0.00390625, %v683_v31  ;;  %1180 = vadd.xlane.f32.xlu1 %v1179_v10  ;;  %1183 = vadd.xlane.f32.xlu0 %v1182_v37  ;;  %v686_v60 = vpop.xlane.xlu1 %685  ;;  %v6980_v37 = vld [vmem:[#allocation104_spill] sm:$0xff] }
 0x1b8   : > { %6973 = vst [vmem:[#allocation101_spill] sm:$0xff] %v5405_v63  ;;  %6975 = vst [vmem:[#allocation102_spill] sm:$0xff] %v5408_v49  ;;  %v1002_v33 = vmul.f32 %v5405_v63, %v5405_v63  ;;  %v1003_v16 = vmul.f32 %v5408_v49, %v5408_v49  ;;  %v751_v43 = vmul.f32 0.00390625, %v686_v60 }
 0x1b9   : > { %v5419_v55 = vsub.f32 %v4783_v41, %v750_v29  ;;  %v5422_v57 = vsub.f32 %v6977_v39, %v750_v29  ;;  %v1188_v51 = vadd.f32 %v1001_v56, %v1000_v11 }
 0x1ba   : > { %v5425_v31 = vsub.f32 %v4789_v53, %v751_v43  ;;  %v5428_v10 = vsub.f32 %v6980_v37, %v751_v43  ;;  %v1191_v41 = vadd.f32 %v1003_v16, %v1002_v33  ;;  %v1522_v37 = vlaneseq }
 0x1bb   : > { %6976 = vst [vmem:[#allocation115_spill] sm:$0xff] %v5419_v55  ;;  %6978 = vst [vmem:[#allocation103_spill] sm:$0xff] %v5422_v57  ;;  %v1004_v45 = vmul.f32 %v5419_v55, %v5419_v55  ;;  %v1005_v61 = vmul.f32 %v5422_v57, %v5422_v57  ;;  %1186 = vadd.xlane.f32.xlu1 %v1185_v28  ;;  %1189 = vadd.xlane.f32.xlu0 %v1188_v51 }
 0x1bc   : > { %6979 = vst [vmem:[#allocation116_spill] sm:$0xff] %v5425_v31  ;;  %6981 = vst [vmem:[#allocation104_spill] sm:$0xff] %v5428_v10  ;;  %v1006_v29 = vmul.f32 %v5425_v31, %v5425_v31  ;;  %v1007_v11 = vmul.f32 %v5428_v10, %v5428_v10  ;;  %v1523_v31 = vshrl.u32 %v1522_v37, 7 }
 0x1bd   : > { %v1194_v53 = vadd.f32 %v1005_v61, %v1004_v45 }
 0x1be   : > { %v1197_v56 = vadd.f32 %v1007_v11, %v1006_v29  ;;  %v1524_v11 = vsub.s32 0, %v1523_v31 }
 0x1bf   : > { %1192 = vadd.xlane.f32.xlu1 %v1191_v41  ;;  %1195 = vadd.xlane.f32.xlu0 %v1194_v53 }
 0x1c3   : > { %1198 = vadd.xlane.f32.xlu1 %v1197_v56 }
 0x1cc   : > { %v1010_v60 = vpop.xlane.xlu0 %1009 }
 0x1cd   : > { %v1200_v43 = vmul.f32 0.00390625, %v1010_v60  ;;  %v1520_v60 = vld [vmem:[#allocation6] sm:$0x3] }
 0x1cf   : > { %v1264_v39 = vadd.f32 1e-05, %v1200_v43  ;;  %v1528_v43 = vsub.s32 1, %v1523_v31 }
 0x1d0   : > { %v1013_v55 = vpop.xlane.xlu1 %1012  ;;  %v1016_v57 = vpop.xlane.xlu0 %1015 }
 0x1d1   : > { %3559 = vrsqrt.f32 %v1264_v39  ;;  %v1201_v51 = vmul.f32 0.00390625, %v1013_v55  ;;  %v1202_v28 = vmul.f32 0.00390625, %v1016_v57  ;;  %v1660_v57 = vld [vmem:[#allocation8] sm:$0x3] }
 0x1d2   : > { %v5442_v10 = vrot.slane %v1660_v57, %v1524_v11  ;;  %v5444_v31 = vrot.slane %v1660_v57, %v1528_v43 }
 0x1d3   : > { %v1265_v33 = vadd.f32 1e-05, %v1201_v51  ;;  %v1266_v16 = vadd.f32 1e-05, %v1202_v28  ;;  %v5438_v28 = vrot.slane %v1520_v60, %v1524_v11 }
 0x1d4   : > { %v1019_v49 = vpop.xlane.xlu1 %1018  ;;  %v1022_v63 = vpop.xlane.xlu0 %1021 }
 0x1d5   : > { %3561 = vrsqrt.f32 %v1265_v33  ;;  %v1203_v45 = vmul.f32 0.00390625, %v1019_v49  ;;  %v1204_v61 = vmul.f32 0.00390625, %v1022_v63  ;;  %v5440_v63 = vrot.slane %v1520_v60, %v1528_v43 }
 0x1d6   : > { %3563 = vrsqrt.f32 %v1266_v16 }
 0x1d7   : > { %v1267_v41 = vadd.f32 1e-05, %v1203_v45  ;;  %v1268_v29 = vadd.f32 1e-05, %v1204_v61 }
 0x1d8   : > { %v1025_v53 = vpop.xlane.xlu1 %1024  ;;  %v1028_v56 = vpop.xlane.xlu0 %1027 }
 0x1d9   : > { %3565 = vrsqrt.f32 %v1267_v41  ;;  %v1205_v39 = vmul.f32 0.00390625, %v1025_v53  ;;  %v1206_v55 = vmul.f32 0.00390625, %v1028_v56  ;;  %v6982_v41 = vld [vmem:[#allocation105_spill] sm:$0xff]  ;;  %v6983_v53 = vld [vmem:[#allocation106_spill] sm:$0xff] }
 0x1da   : > { %3567 = vrsqrt.f32 %v1268_v29 }
 0x1db   : > { %v1269_v51 = vadd.f32 1e-05, %v1205_v39  ;;  %v1270_v37 = vadd.f32 1e-05, %v1206_v55 }
 0x1dc   : > { %v1031_v33 = vpop.xlane.xlu1 %1030  ;;  %v1034_v49 = vpop.xlane.xlu0 %1033 }
 0x1dd   : > { %3569 = vrsqrt.f32 %v1269_v51  ;;  %v1207_v16 = vmul.f32 0.00390625, %v1031_v33  ;;  %v1208_v45 = vmul.f32 0.00390625, %v1034_v49 }
 0x1de   : > { %v3560_v61 = vpop.eup %3559  ;;  %3571 = vrsqrt.f32 %v1270_v37 }
 0x1df   : > { %v1392_v29 = vmul.f32 %v3560_v61, %v6982_v41  ;;  %v1393_v56 = vmul.f32 %v3560_v61, %v6983_v53  ;;  %v1271_v39 = vadd.f32 1e-05, %v1207_v16  ;;  %v1272_v55 = vadd.f32 1e-05, %v1208_v45  ;;  %v6984_v45 = vld [vmem:[#allocation107_spill] sm:$0xff]  ;;  %v6985_v53 = vld [vmem:[#allocation108_spill] sm:$0xff] }
 0x1e0   : > { %v1037_v62 = vpop.xlane.xlu1 %1036  ;;  %v1040_v17 = vpop.xlane.xlu0 %1039 }
 0x1e1   : > { %v1532_v60 = vmul.f32 %v5438_v28, %v1392_v29  ;;  %v1533_v51 = vmul.f32 %v5440_v63, %v1393_v56  ;;  %3573 = vrsqrt.f32 %v1271_v39  ;;  %v1209_v33 = vmul.f32 0.00390625, %v1037_v62 }
 0x1e2   : > { %v3562_v49 = vpop.eup %3561  ;;  %3575 = vrsqrt.f32 %v1272_v55  ;;  %v1210_v11 = vmul.f32 0.00390625, %v1040_v17 }
 0x1e3   : > { %v3564_v43 = vpop.eup %3563  ;;  %v1672_v57 = vadd.f32 %v5442_v10, %v1532_v60  ;;  %v1673_v37 = vadd.f32 %v5444_v31, %v1533_v51  ;;  %v1394_v61 = vmul.f32 %v3562_v49, %v4819_v23  ;;  %v1395_v16 = vmul.f32 %v3562_v49, %v4822_v4 }
 0x1e4   : > { %v1396_v41 = vmul.f32 %v3564_v43, %v6984_v45  ;;  %v1397_v29 = vmul.f32 %v3564_v43, %v6985_v53  ;;  %v1273_v54 = vadd.f32 1e-05, %v1209_v33  ;;  %v1043_v56 = vpop.xlane.xlu1 %1042  ;;  %v1046_v39 = vpop.xlane.xlu0 %1045  ;;  %v1274_v55 = vadd.f32 1e-05, %v1210_v11 }
 0x1e5   : > { %1800 = vst [vmem:[#allocation2 + $0x2b0] sm:$0xff] %v1672_v57  ;;  %1801 = vst [vmem:[#allocation2 + $0x3b0] sm:$0xff] %v1673_v37  ;;  %v1534_v62 = vmul.f32 %v5438_v28, %v1394_v61  ;;  %v1535_v17 = vmul.f32 %v5440_v63, %v1395_v16  ;;  %v1211_v60 = vmul.f32 0.00390625, %v1043_v56  ;;  %v1212_v49 = vmul.f32 0.00390625, %v1046_v39 }
 0x1e6   : > { %v3566_v51 = vpop.eup %3565  ;;  %v1536_v23 = vmul.f32 %v5438_v28, %v1396_v41  ;;  %v1537_v4 = vmul.f32 %v5440_v63, %v1397_v29  ;;  %3577 = vrsqrt.f32 %v1273_v54 }
 0x1e7   : > { %v3568_v45 = vpop.eup %3567  ;;  %v1674_v33 = vadd.f32 %v5442_v10, %v1534_v62  ;;  %v1675_v43 = vadd.f32 %v5444_v31, %v1535_v17  ;;  %v1398_v57 = vmul.f32 %v3566_v51, %v4825_v7  ;;  %v1399_v37 = vmul.f32 %v3566_v51, %v4828_v59 }
 0x1e8   : > { %v1676_v61 = vadd.f32 %v5442_v10, %v1536_v23  ;;  %v1677_v11 = vadd.f32 %v5444_v31, %v1537_v4  ;;  %v1400_v16 = vmul.f32 %v3568_v45, %v4839_v9  ;;  %v1401_v41 = vmul.f32 %v3568_v45, %v4842_v58  ;;  %v1049_v53 = vpop.xlane.xlu1 %1048  ;;  %v1052_v54 = vpop.xlane.xlu0 %1051 }
 0x1e9   : > { %1802 = vst [vmem:[#allocation2 + $0xd8] sm:$0xff] %v1674_v33  ;;  %1803 = vst [vmem:[#allocation2 + $0x18] sm:$0xff] %v1675_v43  ;;  %v1538_v29 = vmul.f32 %v5438_v28, %v1398_v57  ;;  %v1539_v56 = vmul.f32 %v5440_v63, %v1399_v37  ;;  %3579 = vrsqrt.f32 %v1274_v55  ;;  %v1275_v7 = vadd.f32 1e-05, %v1211_v60 }
 0x1ea   : > { %v3570_v39 = vpop.eup %3569  ;;  %1804 = vst [vmem:[#allocation2 + $0x50] sm:$0xff] %v1676_v61  ;;  %1805 = vst [vmem:[#allocation2 + $0x368] sm:$0xff] %v1677_v11  ;;  %v1540_v59 = vmul.f32 %v5438_v28, %v1400_v16  ;;  %v1541_v62 = vmul.f32 %v5440_v63, %v1401_v41  ;;  %v1276_v9 = vadd.f32 1e-05, %v1212_v49  ;;  %v1213_v17 = vmul.f32 0.00390625, %v1049_v53 }
 0x1eb   : > { %v3572_v58 = vpop.eup %3571  ;;  %v1678_v51 = vadd.f32 %v5442_v10, %v1538_v29  ;;  %v1679_v23 = vadd.f32 %v5444_v31, %v1539_v56  ;;  %v1402_v4 = vmul.f32 %v3570_v39, %v4845_v0  ;;  %v1403_v45 = vmul.f32 %v3570_v39, %v4848_v1 }
 0x1ec   : > { %v1680_v55 = vadd.f32 %v5442_v10, %v1540_v59  ;;  %v1681_v60 = vadd.f32 %v5444_v31, %v1541_v62  ;;  %v1404_v33 = vmul.f32 %v3572_v58, %v4859_v40  ;;  %v1405_v43 = vmul.f32 %v3572_v58, %v4862_v3  ;;  %v1055_v57 = vpop.xlane.xlu1 %1054  ;;  %v1058_v49 = vpop.xlane.xlu0 %1057 }
 0x1ed   : > { %1806 = vst [vmem:[#allocation2 + $0x330] sm:$0xff] %v1678_v51  ;;  %1807 = vst [vmem:[#allocation2 + $0x48] sm:$0xff] %v1679_v23  ;;  %v1542_v37 = vmul.f32 %v5438_v28, %v1402_v4  ;;  %v1543_v61 = vmul.f32 %v5440_v63, %v1403_v45  ;;  %3581 = vrsqrt.f32 %v1275_v7  ;;  %v1277_v0 = vadd.f32 1e-05, %v1213_v17 }
 0x1ee   : > { %v3574_v11 = vpop.eup %3573  ;;  %1808 = vst [vmem:[#allocation2 + $0x380] sm:$0xff] %v1680_v55  ;;  %1809 = vst [vmem:[#allocation2 + $0x110] sm:$0xff] %v1681_v60  ;;  %v1544_v1 = vmul.f32 %v5438_v28, %v1404_v33  ;;  %v1545_v16 = vmul.f32 %v5440_v63, %v1405_v43  ;;  %3583 = vrsqrt.f32 %v1276_v9  ;;  %v1214_v40 = vmul.f32 0.00390625, %v1052_v54 }
 0x1ef   : > { %v3576_v3 = vpop.eup %3575  ;;  %v1682_v41 = vadd.f32 %v5442_v10, %v1542_v37  ;;  %v1683_v53 = vadd.f32 %v5444_v31, %v1543_v61  ;;  %v1406_v29 = vmul.f32 %v3574_v11, %v4865_v6  ;;  %v1407_v56 = vmul.f32 %v3574_v11, %v4868_v52 }
 0x1f0   : > { %v1684_v7 = vadd.f32 %v5442_v10, %v1544_v1  ;;  %v1685_v39 = vadd.f32 %v5444_v31, %v1545_v16  ;;  %v1408_v59 = vmul.f32 %v3576_v3, %v4879_v12  ;;  %v1409_v62 = vmul.f32 %v3576_v3, %v4882_v46  ;;  %v1061_v17 = vpop.xlane.xlu1 %1060  ;;  %v1064_v9 = vpop.xlane.xlu0 %1063 }
 0x1f1   : > { %1810 = vst [vmem:[#allocation2 + $0x118] sm:$0xff] %v1682_v41  ;;  %1811 = vst [vmem:[#allocation2 + $0x98] sm:$0xff] %v1683_v53  ;;  %v1546_v54 = vmul.f32 %v5438_v28, %v1406_v29  ;;  %v1547_v58 = vmul.f32 %v5440_v63, %v1407_v56  ;;  %3585 = vrsqrt.f32 %v1277_v0  ;;  %v1278_v6 = vadd.f32 1e-05, %v1214_v40 }
 0x1f2   : > { %1812 = vst [vmem:[#allocation2 + $0x320] sm:$0xff] %v1684_v7  ;;  %1813 = vst [vmem:[#allocation2 + $0x150] sm:$0xff] %v1685_v39  ;;  %v1548_v52 = vmul.f32 %v5438_v28, %v1408_v59  ;;  %v1549_v51 = vmul.f32 %v5440_v63, %v1409_v62  ;;  %v1215_v23 = vmul.f32 0.00390625, %v1055_v57  ;;  %v1216_v12 = vmul.f32 0.00390625, %v1058_v49 }
 0x1f3   : > { %v3578_v4 = vpop.eup %3577  ;;  %v1686_v46 = vadd.f32 %v5442_v10, %v1546_v54  ;;  %v1687_v45 = vadd.f32 %v5444_v31, %v1547_v58  ;;  %3587 = vrsqrt.f32 %v1278_v6  ;;  %v1217_v55 = vmul.f32 0.00390625, %v1061_v17 }
 0x1f4   : > { %v1688_v60 = vadd.f32 %v5442_v10, %v1548_v52  ;;  %v1689_v33 = vadd.f32 %v5444_v31, %v1549_v51  ;;  %v1410_v43 = vmul.f32 %v3578_v4, %v4885_v34  ;;  %v1411_v37 = vmul.f32 %v3578_v4, %v4888_v14  ;;  %v1067_v61 = vpop.xlane.xlu1 %1066  ;;  %v1070_v0 = vpop.xlane.xlu0 %1069 }
 0x1f5   : > { %1814 = vst [vmem:[#allocation2 + $0x108] sm:$0xff] %v1686_v46  ;;  %1815 = vst [vmem:[#allocation2 + $0x60] sm:$0xff] %v1687_v45  ;;  %v1279_v57 = vadd.f32 1e-05, %v1215_v23  ;;  %v1280_v49 = vadd.f32 1e-05, %v1216_v12 }
 0x1f6   : > { %v1281_v11 = vadd.f32 1e-05, %v1217_v55  ;;  %v3580_v1 = vpop.eup %3579  ;;  %1816 = vst [vmem:[#allocation2 + $0x2e0] sm:$0xff] %v1688_v60  ;;  %1817 = vst [vmem:[#allocation2 + $0x388] sm:$0xff] %v1689_v33  ;;  %v1550_v16 = vmul.f32 %v5438_v28, %v1410_v43  ;;  %v1551_v40 = vmul.f32 %v5440_v63, %v1411_v37  ;;  %v1218_v3 = vmul.f32 0.00390625, %v1064_v9 }
 0x1f7   : > { %v1219_v41 = vmul.f32 0.00390625, %v1067_v61  ;;  %v1412_v34 = vmul.f32 %v3580_v1, %v4899_v18  ;;  %v1413_v14 = vmul.f32 %v3580_v1, %v4902_v47  ;;  %3589 = vrsqrt.f32 %v1279_v57 }
 0x1f8   : > { %v1220_v53 = vmul.f32 0.00390625, %v1070_v0  ;;  %v1690_v29 = vadd.f32 %v5442_v10, %v1550_v16  ;;  %v1691_v56 = vadd.f32 %v5444_v31, %v1551_v40  ;;  %3591 = vrsqrt.f32 %v1280_v49  ;;  %v1073_v39 = vpop.xlane.xlu1 %1072  ;;  %v1076_v59 = vpop.xlane.xlu0 %1075 }
 0x1f9   : > { %v1282_v7 = vadd.f32 1e-05, %v1218_v3  ;;  %v1552_v62 = vmul.f32 %v5438_v28, %v1412_v34  ;;  %v1553_v17 = vmul.f32 %v5440_v63, %v1413_v14  ;;  %3593 = vrsqrt.f32 %v1281_v11 }
 0x1fa   : > { %v1283_v9 = vadd.f32 1e-05, %v1219_v41  ;;  %v3582_v54 = vpop.eup %3581  ;;  %1818 = vst [vmem:[#allocation2 + $0x338] sm:$0xff] %v1690_v29  ;;  %1819 = vst [vmem:[#allocation2 + $0x340] sm:$0xff] %v1691_v56  ;;  %v1284_v18 = vadd.f32 1e-05, %v1220_v53 }
 0x1fb   : > { %3595 = vrsqrt.f32 %v1282_v7  ;;  %v1221_v47 = vmul.f32 0.00390625, %v1073_v39  ;;  %v1222_v58 = vmul.f32 0.00390625, %v1076_v59  ;;  %v3584_v6 = vpop.eup %3583  ;;  %v1692_v52 = vadd.f32 %v5442_v10, %v1552_v62 }
 0x1fc   : > { %v1693_v51 = vadd.f32 %v5444_v31, %v1553_v17  ;;  %v1414_v23 = vmul.f32 %v3582_v54, %v4905_v2  ;;  %v1415_v12 = vmul.f32 %v3582_v54, %v4908_v20  ;;  %v1416_v4 = vmul.f32 %v3584_v6, %v4919_v24  ;;  %v1079_v55 = vpop.xlane.xlu1 %1078  ;;  %v1082_v60 = vpop.xlane.xlu0 %1081 }
 0x1fd   : > { %v1417_v46 = vmul.f32 %v3584_v6, %v4922_v35  ;;  %3597 = vrsqrt.f32 %v1283_v9  ;;  %v1285_v45 = vadd.f32 1e-05, %v1221_v47  ;;  %1820 = vst [vmem:[#allocation2 + $0x80] sm:$0xff] %v1692_v52  ;;  %v1286_v37 = vadd.f32 1e-05, %v1222_v58 }
 0x1fe   : > { %1821 = vst [vmem:[#allocation2 + $0x1a8] sm:$0xff] %v1693_v51  ;;  %v1554_v33 = vmul.f32 %v5438_v28, %v1414_v23  ;;  %v1555_v43 = vmul.f32 %v5440_v63, %v1415_v12  ;;  %3599 = vrsqrt.f32 %v1284_v18  ;;  %v3586_v61 = vpop.eup %3585  ;;  %v1556_v2 = vmul.f32 %v5438_v28, %v1416_v4 }
 0x1ff   : > { %v1557_v20 = vmul.f32 %v5440_v63, %v1417_v46  ;;  %3601 = vrsqrt.f32 %v1285_v45  ;;  %v1223_v24 = vmul.f32 0.00390625, %v1079_v55  ;;  %v1418_v57 = vmul.f32 %v3586_v61, %v4925_v22 }
 0x200   : > { %v1694_v35 = vadd.f32 %v5442_v10, %v1554_v33  ;;  %v1695_v0 = vadd.f32 %v5444_v31, %v1555_v43  ;;  %v1419_v49 = vmul.f32 %v3586_v61, %v4928_v26  ;;  %v3588_v11 = vpop.eup %3587  ;;  %v1696_v1 = vadd.f32 %v5442_v10, %v1556_v2  ;;  %v1085_v3 = vpop.xlane.xlu1 %1084 }
 0x201   : > { %v1697_v16 = vadd.f32 %v5444_v31, %v1557_v20  ;;  %3603 = vrsqrt.f32 %v1286_v37  ;;  %v1287_v40 = vadd.f32 1e-05, %v1223_v24  ;;  %v1088_v41 = vpop.xlane.xlu0 %1087  ;;  %v1558_v34 = vmul.f32 %v5438_v28, %v1418_v57 }
 0x202   : > { %1822 = vst [vmem:[#allocation2 + $0x1b8] sm:$0xff] %v1694_v35  ;;  %1823 = vst [vmem:[#allocation2 + $0x168] sm:$0xff] %v1695_v0  ;;  %v1559_v14 = vmul.f32 %v5440_v63, %v1419_v49  ;;  %v1420_v53 = vmul.f32 %v3588_v11, %v4939_v30  ;;  %v1421_v22 = vmul.f32 %v3588_v11, %v4942_v8  ;;  %v1224_v26 = vmul.f32 0.00390625, %v1082_v60 }
 0x203   : > { %1824 = vst [vmem:[#allocation2 + $0x3e8] sm:$0xff] %v1696_v1  ;;  %1825 = vst [vmem:[#allocation2 + $0x2f8] sm:$0xff] %v1697_v16  ;;  %3605 = vrsqrt.f32 %v1287_v40  ;;  %v1225_v29 = vmul.f32 0.00390625, %v1085_v3  ;;  %v1226_v56 = vmul.f32 0.00390625, %v1088_v41  ;;  %v1698_v7 = vadd.f32 %v5442_v10, %v1558_v34 }
 0x204   : > { %v1699_v39 = vadd.f32 %v5444_v31, %v1559_v14  ;;  %v1560_v59 = vmul.f32 %v5438_v28, %v1420_v53  ;;  %v1561_v62 = vmul.f32 %v5440_v63, %v1421_v22  ;;  %v3590_v17 = vpop.eup %3589  ;;  %v1288_v9 = vadd.f32 1e-05, %v1224_v26  ;;  %v1091_v8 = vpop.xlane.xlu1 %1090 }
 0x205   : > { %v5534_v54 = vadd.f32 1e-05, %v1225_v29  ;;  %v5536_v30 = vadd.f32 1e-05, %v1226_v56  ;;  %v5538_v18 = vpop.xlane.xlu0 %1093  ;;  %v3592_v47 = vpop.eup %3591  ;;  %1826 = vst [vmem:[#allocation2 + $0x290] sm:$0xff] %v1698_v7  ;;  %v1422_v52 = vmul.f32 %v3590_v17, %v4945_v5  ;;  %v1423_v51 = vmul.f32 %v3590_v17, %v4948_v32  ;;  %v6986_v7 = vld [vmem:[#allocation109_spill] sm:$0xff] }
 0x206   : > { %1827 = vst [vmem:[#allocation2 + $0x28] sm:$0xff] %v1699_v39  ;;  %v1700_v58 = vadd.f32 %v5442_v10, %v1560_v59  ;;  %v1701_v6 = vadd.f32 %v5444_v31, %v1561_v62  ;;  %v3594_v23 = vpop.eup %3593  ;;  %v1424_v12 = vmul.f32 %v3592_v47, %v4959_v36  ;;  %v1425_v4 = vmul.f32 %v3592_v47, %v4962_v15  ;;  %v6987_v59 = vld [vmem:[#allocation110_spill] sm:$0xff] }
 0x207   : > { %3607 = vrsqrt.f32 %v1288_v9  ;;  %v5546_v46 = vmul.f32 0.00390625, %v1091_v8  ;;  %v1562_v55 = vmul.f32 %v5438_v28, %v1422_v52  ;;  %v1563_v60 = vmul.f32 %v5440_v63, %v1423_v51 }
 0x208   : > { %v3596_v45 = vpop.eup %3595  ;;  %1828 = vst [vmem:[#allocation2 + $0x138] sm:$0xff] %v1700_v58  ;;  %1829 = vst [vmem:[#allocation2 + $0xc0] sm:$0xff] %v1701_v6  ;;  %v1426_v33 = vmul.f32 %v3594_v23, %v4965_v13  ;;  %v1427_v5 = vmul.f32 %v3594_v23, %v4968_v38  ;;  %v1564_v32 = vmul.f32 %v5438_v28, %v1424_v12  ;;  %v5556_v37 = vpop.xlane.xlu1 %1096  ;;  %3609 = vrsqrt.f32 %v5534_v54 }
 0x209   : > { %v1565_v36 = vmul.f32 %v5440_v63, %v1425_v4  ;;  %v1428_v15 = vmul.f32 %v3596_v45, %v4979_v42  ;;  %v1429_v43 = vmul.f32 %v3596_v45, %v4982_v21  ;;  %v5558_v61 = vpop.xlane.xlu0 %1099  ;;  %v1702_v20 = vadd.f32 %v5442_v10, %v1562_v55  ;;  %v6988_v45 = vld [vmem:[#allocation111_spill] sm:$0xff] }
 0x20a   : > { %v3598_v2 = vpop.eup %3597  ;;  %v1703_v24 = vadd.f32 %v5444_v31, %v1563_v60  ;;  %v1566_v13 = vmul.f32 %v5438_v28, %v1426_v33  ;;  %v1567_v38 = vmul.f32 %v5440_v63, %v1427_v5  ;;  %v1704_v0 = vadd.f32 %v5442_v10, %v1564_v32  ;;  %v6989_v60 = vld [vmem:[#allocation112_spill] sm:$0xff] }
 0x20b   : > { %v3600_v35 = vpop.eup %3599  ;;  %v1705_v42 = vadd.f32 %v5444_v31, %v1565_v36  ;;  %v1568_v21 = vmul.f32 %v5438_v28, %v1428_v15  ;;  %v1569_v57 = vmul.f32 %v5440_v63, %v1429_v43  ;;  %1830 = vst [vmem:[#allocation2 + $0x1c0] sm:$0xff] %v1702_v20  ;;  %v1430_v16 = vmul.f32 %v3598_v2, %v4985_v19 }
 0x20c   : > { %v3602_v49 = vpop.eup %3601  ;;  %1831 = vst [vmem:[#allocation2 + $0x280] sm:$0xff] %v1703_v24  ;;  %v1706_v11 = vadd.f32 %v5442_v10, %v1566_v13  ;;  %v1707_v1 = vadd.f32 %v5444_v31, %v1567_v38  ;;  %v1431_v40 = vmul.f32 %v3598_v2, %v4988_v44  ;;  %1832 = vst [vmem:[#allocation2 + $0x100] sm:$0xff] %v1704_v0  ;;  %v1103_v53 = vpop.xlane.xlu1 %1102  ;;  %v1291_v36 = vadd.f32 1e-05, %v5546_v46  ;;  %v6990_v24 = vld [vmem:[#allocation113_spill] sm:$0xff]  ;;  %v6991_v38 = vld [vmem:[#allocation114_spill] sm:$0xff] }
 0x20d   : > { %1833 = vst [vmem:[#allocation2 + $0x3c0] sm:$0xff] %v1705_v42  ;;  %v1708_v3 = vadd.f32 %v5442_v10, %v1568_v21  ;;  %v1709_v41 = vadd.f32 %v5444_v31, %v1569_v57  ;;  %v1432_v34 = vmul.f32 %v3600_v35, %v4999_v48  ;;  %v1433_v14 = vmul.f32 %v3600_v35, %v5002_v27  ;;  %v5576_v22 = vpop.xlane.xlu0 %1105 }
 0x20e   : > { %v3604_v26 = vpop.eup %3603  ;;  %1834 = vst [vmem:[#allocation2 + $0x158] sm:$0xff] %v1706_v11  ;;  %1835 = vst [vmem:[#allocation2 + $0x3e0] sm:$0xff] %v1707_v1  ;;  %v1570_v19 = vmul.f32 %v5438_v28, %v1430_v16  ;;  %v1571_v44 = vmul.f32 %v5440_v63, %v1431_v40  ;;  %v1434_v29 = vmul.f32 %v3602_v49, %v5005_v25  ;;  %3611 = vrsqrt.f32 %v5536_v30 }
 0x20f   : > { %v1435_v56 = vmul.f32 %v3602_v49, %v5008_v50  ;;  %1836 = vst [vmem:[#allocation2 + $0x218] sm:$0xff] %v1708_v3  ;;  %1837 = vst [vmem:[#allocation2 + $0x3f8] sm:$0xff] %v1709_v41  ;;  %v1572_v48 = vmul.f32 %v5438_v28, %v1432_v34  ;;  %v1573_v27 = vmul.f32 %v5440_v63, %v1433_v14  ;;  %v1228_v20 = vmul.f32 0.00390625, %v5538_v18 }
 0x210   : > { %v1436_v39 = vmul.f32 %v3604_v26, %v6986_v7  ;;  %v1437_v62 = vmul.f32 %v3604_v26, %v6987_v59  ;;  %v3606_v17 = vpop.eup %3605  ;;  %v1710_v9 = vadd.f32 %v5442_v10, %v1570_v19  ;;  %v1711_v8 = vadd.f32 %v5444_v31, %v1571_v44  ;;  %v1109_v51 = vpop.xlane.xlu1 %1108 }
 0x211   : > { %v1574_v47 = vmul.f32 %v5438_v28, %v1434_v29  ;;  %v1575_v25 = vmul.f32 %v5440_v63, %v1435_v56  ;;  %v1712_v50 = vadd.f32 %v5442_v10, %v1572_v48  ;;  %v1713_v58 = vadd.f32 %v5444_v31, %v1573_v27  ;;  %v1112_v23 = vpop.xlane.xlu0 %1111 }
 0x212   : > { %v1576_v6 = vmul.f32 %v5438_v28, %v1436_v39  ;;  %v1577_v52 = vmul.f32 %v5440_v63, %v1437_v62  ;;  %1838 = vst [vmem:[#allocation2 + $0x8] sm:$0xff] %v1710_v9  ;;  %1839 = vst [vmem:[#allocation2 + $0x128] sm:$0xff] %v1711_v8  ;;  %v1438_v55 = vmul.f32 %v3606_v17, %v6988_v45  ;;  %3613 = vrsqrt.f32 %v1291_v36 }
 0x213   : > { %v1714_v12 = vadd.f32 %v5442_v10, %v1574_v47  ;;  %v1715_v4 = vadd.f32 %v5444_v31, %v1575_v25  ;;  %v1439_v33 = vmul.f32 %v3606_v17, %v6989_v60  ;;  %1840 = vst [vmem:[#allocation2 + $0x2a0] sm:$0xff] %v1712_v50  ;;  %1841 = vst [vmem:[#allocation2 + $0x3f0] sm:$0xff] %v1713_v58  ;;  %v1229_v54 = vmul.f32 0.00390625, %v5556_v37  ;;  %v6992_v58 = vld [vmem:[#allocation29_spill] sm:$0xff] }
 0x214   : > { %v1716_v5 = vadd.f32 %v5442_v10, %v1576_v6  ;;  %v1717_v32 = vadd.f32 %v5444_v31, %v1577_v52  ;;  %v3608_v15 = vpop.eup %3607  ;;  %v1578_v43 = vmul.f32 %v5438_v28, %v1438_v55  ;;  %v1115_v46 = vpop.xlane.xlu1 %1114  ;;  %v1292_v57 = vadd.f32 1e-05, %v1228_v20  ;;  %v6993_v52 = vld [vmem:[#allocation30_spill] sm:$0xff]  ;;  %v6994_v55 = vld [vmem:[#allocation31_spill] sm:$0xff] }
 0x215   : > { %1842 = vst [vmem:[#allocation2 + $0xa0] sm:$0xff] %v1714_v12  ;;  %1843 = vst [vmem:[#allocation2 + $0x2c0] sm:$0xff] %v1715_v4  ;;  %v1579_v2 = vmul.f32 %v5440_v63, %v1439_v33  ;;  %v1440_v13 = vmul.f32 %v3608_v15, %v6990_v24  ;;  %v1441_v35 = vmul.f32 %v3608_v15, %v6991_v38  ;;  %v1118_v0 = vpop.xlane.xlu0 %1117  ;;  %v1230_v30 = vmul.f32 0.00390625, %v5558_v61  ;;  %v3610_v47 = vpop.eup %3609  ;;  %v6995_v33 = vld [vmem:[#allocation32_spill] sm:$0xff]  ;;  %v6997_v20 = vld [vmem:[#allocation34_spill] sm:$0xff] }
 0x216   : > { %1844 = vst [vmem:[#allocation2 + $0xb0] sm:$0xff] %v1716_v5  ;;  %1845 = vst [vmem:[#allocation2 + $0x1e0] sm:$0xff] %v1717_v32  ;;  %v1718_v42 = vadd.f32 %v5442_v10, %v1578_v43  ;;  %v1293_v11 = vadd.f32 1e-05, %v1229_v54  ;;  %v1231_v1 = vmul.f32 0.00390625, %v1103_v53  ;;  %3615 = vrsqrt.f32 %v1292_v57  ;;  %v6996_v43 = vld [vmem:[#allocation33_spill] sm:$0xff] }
 0x217   : > { %v1719_v21 = vadd.f32 %v5444_v31, %v1579_v2  ;;  %v1580_v18 = vmul.f32 %v5438_v28, %v1440_v13  ;;  %v1581_v49 = vmul.f32 %v5440_v63, %v1441_v35  ;;  %v1294_v16 = vadd.f32 1e-05, %v1230_v30 }
 0x218   : > { %1846 = vst [vmem:[#allocation2 + $0x1f0] sm:$0xff] %v1718_v42  ;;  %v1232_v37 = vmul.f32 0.00390625, %v5576_v22  ;;  %v1233_v40 = vmul.f32 0.00390625, %v1109_v51  ;;  %3617 = vrsqrt.f32 %v1293_v11  ;;  %v1295_v34 = vadd.f32 1e-05, %v1231_v1  ;;  %v1121_v61 = vpop.xlane.xlu1 %1120  ;;  %v6998_v1 = vld [vmem:[#allocation35_spill] sm:$0xff] }
 0x219   : > { %1847 = vst [vmem:[#allocation2 + $0x10] sm:$0xff] %v1719_v21  ;;  %v1720_v3 = vadd.f32 %v5442_v10, %v1580_v18  ;;  %v1721_v41 = vadd.f32 %v5444_v31, %v1581_v49  ;;  %v1124_v14 = vpop.xlane.xlu0 %1123  ;;  %3619 = vrsqrt.f32 %v1294_v16  ;;  %v1234_v44 = vmul.f32 0.00390625, %v1112_v23 }
 0x21a   : > { %v1296_v26 = vadd.f32 1e-05, %v1232_v37  ;;  %v1297_v19 = vadd.f32 1e-05, %v1233_v40  ;;  %3621 = vrsqrt.f32 %v1295_v34  ;;  %v1235_v53 = vmul.f32 0.00390625, %v1115_v46  ;;  %v6999_v37 = vld [vmem:[#allocation36_spill] sm:$0xff] }
 0x21b   : > { %1848 = vst [vmem:[#allocation2 + $0x230] sm:$0xff] %v1720_v3  ;;  %1849 = vst [vmem:[#allocation2 + $0x240] sm:$0xff] %v1721_v41  ;;  %v1236_v29 = vmul.f32 0.00390625, %v1118_v0  ;;  %v1237_v56 = vmul.f32 0.00390625, %v1121_v61  ;;  %v1298_v22 = vadd.f32 1e-05, %v1234_v44  ;;  %v3612_v50 = vpop.eup %3611  ;;  %v1442_v6 = vmul.f32 %v3610_v47, %v6992_v58 }
 0x21c   : > { %3623 = vrsqrt.f32 %v1296_v26  ;;  %v1238_v48 = vmul.f32 0.00390625, %v1124_v14  ;;  %v1299_v27 = vadd.f32 1e-05, %v1235_v53  ;;  %v1127_v59 = vpop.xlane.xlu1 %1126  ;;  %v1443_v51 = vmul.f32 %v3610_v47, %v6993_v52  ;;  %v7000_v61 = vld [vmem:[#allocation37_spill] sm:$0xff]  ;;  %v7001_v26 = vld [vmem:[#allocation38_spill] sm:$0xff] }
 0x21d   : > { %3625 = vrsqrt.f32 %v1297_v19  ;;  %v1300_v7 = vadd.f32 1e-05, %v1236_v29  ;;  %v1301_v39 = vadd.f32 1e-05, %v1237_v56  ;;  %v1130_v62 = vpop.xlane.xlu0 %1129  ;;  %v1239_v9 = vmul.f32 0.00390625, %v1127_v59  ;;  %v7002_v56 = vld [vmem:[#allocation39_spill] sm:$0xff] }
 0x21e   : > { %3627 = vrsqrt.f32 %v1298_v22  ;;  %v1302_v17 = vadd.f32 1e-05, %v1238_v48  ;;  %v1240_v8 = vmul.f32 0.00390625, %v1130_v62  ;;  %v1444_v60 = vmul.f32 %v3612_v50, %v6994_v55  ;;  %v7003_v48 = vld [vmem:[#allocation40_spill] sm:$0xff]  ;;  %v7004_v62 = vld [vmem:[#allocation41_spill] sm:$0xff] }
 0x21f   : > { %3629 = vrsqrt.f32 %v1299_v27  ;;  %v1303_v25 = vadd.f32 1e-05, %v1239_v9  ;;  %v3614_v45 = vpop.eup %3613  ;;  %v1445_v5 = vmul.f32 %v3612_v50, %v6995_v33  ;;  %v1582_v36 = vmul.f32 %v5438_v28, %v1442_v6  ;;  %v7005_v9 = vld [vmem:[#allocation42_spill] sm:$0xff] }
 0x220   : > { %3631 = vrsqrt.f32 %v1300_v7  ;;  %v5619_v23 = vadd.f32 1e-05, %v1240_v8  ;;  %v1133_v12 = vpop.xlane.xlu1 %1132  ;;  %v1583_v15 = vmul.f32 %v5440_v63, %v1443_v51  ;;  %v1446_v2 = vmul.f32 %v3614_v45, %v6996_v43 }
 0x221   : > { %3633 = vrsqrt.f32 %v1301_v39  ;;  %v5621_v4 = vpop.xlane.xlu0 %1135  ;;  %v1241_v32 = vmul.f32 0.00390625, %v1133_v12  ;;  %v1447_v24 = vmul.f32 %v3614_v45, %v6997_v20  ;;  %v1584_v13 = vmul.f32 %v5438_v28, %v1444_v60 }
 0x222   : > { %3635 = vrsqrt.f32 %v1302_v17  ;;  %v1585_v38 = vmul.f32 %v5440_v63, %v1445_v5  ;;  %v1722_v46 = vadd.f32 %v5442_v10, %v1582_v36  ;;  %v1723_v0 = vadd.f32 %v5444_v31, %v1583_v15  ;;  %v7006_v15 = vld [vmem:[#allocation43_spill] sm:$0xff] }
 0x223   : > { %3637 = vrsqrt.f32 %v1303_v25  ;;  %v5631_v35 = vadd.f32 1e-05, %v1241_v32  ;;  %v3616_v54 = vpop.eup %3615  ;;  %v1586_v42 = vmul.f32 %v5438_v28, %v1446_v2  ;;  %v1587_v21 = vmul.f32 %v5440_v63, %v1447_v24  ;;  %v7007_v2 = vld [vmem:[#allocation44_spill] sm:$0xff] }
 0x224   : > { %v5637_v57 = vpop.xlane.xlu1 %1138  ;;  %v1724_v49 = vadd.f32 %v5442_v10, %v1584_v13  ;;  %v1725_v11 = vadd.f32 %v5444_v31, %v1585_v38  ;;  %v1448_v16 = vmul.f32 %v3616_v54, %v6998_v1  ;;  %v1449_v40 = vmul.f32 %v3616_v54, %v6999_v37  ;;  %1850 = vst [vmem:[#allocation2 + $0x90] sm:$0xff] %v1722_v46  ;;  %v7008_v54 = vld [vmem:[#allocation45_spill] sm:$0xff] }
 0x225   : > { %v5639_v30 = vpop.xlane.xlu0 %1141  ;;  %v3618_v18 = vpop.eup %3617  ;;  %1851 = vst [vmem:[#allocation2 + $0x3a0] sm:$0xff] %v1723_v0  ;;  %v1726_v41 = vadd.f32 %v5442_v10, %v1586_v42  ;;  %v1727_v34 = vadd.f32 %v5444_v31, %v1587_v21  ;;  %v7009_v0 = vld [vmem:[#allocation46_spill] sm:$0xff]  ;;  %3639 = vrsqrt.f32 %v5619_v23 }
 0x226   : > { %v3620_v3 = vpop.eup %3619  ;;  %v1450_v14 = vmul.f32 %v3618_v18, %v7000_v61  ;;  %v1451_v19 = vmul.f32 %v3618_v18, %v7001_v26  ;;  %1852 = vst [vmem:[#allocation2 + $0x208] sm:$0xff] %v1724_v49  ;;  %1853 = vst [vmem:[#allocation2 + $0xd0] sm:$0xff] %v1725_v11  ;;  %v1588_v53 = vmul.f32 %v5438_v28, %v1448_v16  ;;  %v7010_v16 = vld [vmem:[#allocation47_spill] sm:$0xff]  ;;  %3641 = vrsqrt.f32 %v5631_v35 }
 0x227   : > { %v3622_v44 = vpop.eup %3621  ;;  %v1589_v29 = vmul.f32 %v5440_v63, %v1449_v40  ;;  %v1452_v22 = vmul.f32 %v3620_v3, %v7002_v56  ;;  %v1453_v27 = vmul.f32 %v3620_v3, %v7003_v48  ;;  %1854 = vst [vmem:[#allocation2 + $0x88] sm:$0xff] %v1726_v41  ;;  %1855 = vst [vmem:[#allocation2 + $0x2f0] sm:$0xff] %v1727_v34  ;;  %v7011_v40 = vld [vmem:[#allocation48_spill] sm:$0xff] }
 0x228   : > { %v1590_v39 = vmul.f32 %v5438_v28, %v1450_v14  ;;  %v1591_v59 = vmul.f32 %v5440_v63, %v1451_v19  ;;  %v1454_v17 = vmul.f32 %v3622_v44, %v7004_v62  ;;  %v1455_v8 = vmul.f32 %v3622_v44, %v7005_v9  ;;  %v5657_v47 = vpop.xlane.xlu1 %1144  ;;  %v7012_v14 = vld [vmem:[#allocation49_spill] sm:$0xff]  ;;  %v7013_v19 = vld [vmem:[#allocation50_spill] sm:$0xff] }
 0x229   : > { %v3624_v7 = vpop.eup %3623  ;;  %v5659_v25 = vpop.xlane.xlu0 %1147  ;;  %v1728_v58 = vadd.f32 %v5442_v10, %v1588_v53  ;;  %v1729_v6 = vadd.f32 %v5444_v31, %v1589_v29  ;;  %v1592_v52 = vmul.f32 %v5438_v28, %v1452_v22  ;;  %v1593_v51 = vmul.f32 %v5440_v63, %v1453_v27 }
 0x22a   : > { %v3626_v50 = vpop.eup %3625  ;;  %v1730_v45 = vadd.f32 %v5442_v10, %v1590_v39  ;;  %v1731_v55 = vadd.f32 %v5444_v31, %v1591_v59  ;;  %v1594_v60 = vmul.f32 %v5438_v28, %v1454_v17  ;;  %v1595_v33 = vmul.f32 %v5440_v63, %v1455_v8 }
 0x22b   : > { %v3628_v12 = vpop.eup %3627  ;;  %1856 = vst [vmem:[#allocation2 + $0x358] sm:$0xff] %v1728_v58  ;;  %1857 = vst [vmem:[#allocation2 + $0x268] sm:$0xff] %v1729_v6  ;;  %v1732_v32 = vadd.f32 %v5442_v10, %v1592_v52  ;;  %v1733_v36 = vadd.f32 %v5444_v31, %v1593_v51  ;;  %v1456_v43 = vmul.f32 %v3624_v7, %v7006_v15  ;;  %v7015_v6 = vld [vmem:[#allocation52_spill] sm:$0xff]  ;;  %v1245_v23 = vmul.f32 0.00390625, %v5657_v47 }
 0x22c   : > { %v3630_v5 = vpop.eup %3629  ;;  %v1457_v20 = vmul.f32 %v3624_v7, %v7007_v2  ;;  %1858 = vst [vmem:[#allocation2 + $0x350] sm:$0xff] %v1730_v45  ;;  %1859 = vst [vmem:[#allocation2 + $0x188] sm:$0xff] %v1731_v55  ;;  %v1734_v13 = vadd.f32 %v5442_v10, %v1594_v60  ;;  %v1735_v38 = vadd.f32 %v5444_v31, %v1595_v33  ;;  %v5677_v21 = vpop.xlane.xlu1 %1150  ;;  %v7016_v45 = vld [vmem:[#allocation53_spill] sm:$0xff]  ;;  %v7017_v60 = vld [vmem:[#allocation54_spill] sm:$0xff] }
 0x22d   : > { %v3632_v24 = vpop.eup %3631  ;;  %v1458_v46 = vmul.f32 %v3626_v50, %v7008_v54  ;;  %v1459_v42 = vmul.f32 %v3626_v50, %v7009_v0  ;;  %v5679_v18 = vpop.xlane.xlu0 %1153  ;;  %1860 = vst [vmem:[#allocation2 + $0x1d8] sm:$0xff] %v1732_v32  ;;  %1861 = vst [vmem:[#allocation2 + $0x30] sm:$0xff] %v1733_v36  ;;  %v1596_v11 = vmul.f32 %v5438_v28, %v1456_v43  ;;  %v7014_v50 = vld [vmem:[#allocation51_spill] sm:$0xff]  ;;  %v7019_v43 = vld [vmem:[#allocation56_spill] sm:$0xff] }
 0x22e   : > { %v3634_v49 = vpop.eup %3633  ;;  %v1597_v1 = vmul.f32 %v5440_v63, %v1457_v20  ;;  %v1460_v37 = vmul.f32 %v3628_v12, %v7010_v16  ;;  %v1461_v3 = vmul.f32 %v3628_v12, %v7011_v40  ;;  %1862 = vst [vmem:[#allocation2 + $0x140] sm:$0xff] %v1734_v13  ;;  %1863 = vst [vmem:[#allocation2 + $0x2a8] sm:$0xff] %v1735_v38  ;;  %v7018_v36 = vld [vmem:[#allocation55_spill] sm:$0xff]  ;;  %v7020_v13 = vld [vmem:[#allocation57_spill] sm:$0xff]  ;;  %v1248_v35 = vmul.f32 0.00390625, %v5679_v18 }
 0x22f   : > { %v3636_v41 = vpop.eup %3635  ;;  %v1598_v34 = vmul.f32 %v5438_v28, %v1458_v46  ;;  %v1599_v61 = vmul.f32 %v5440_v63, %v1459_v42  ;;  %v1462_v26 = vmul.f32 %v3630_v5, %v7012_v14  ;;  %v1463_v44 = vmul.f32 %v3630_v5, %v7013_v19  ;;  %v7021_v54 = vld [vmem:[#allocation58_spill] sm:$0xff] }
 0x230   : > { %v1736_v53 = vadd.f32 %v5442_v10, %v1596_v11  ;;  %v1737_v29 = vadd.f32 %v5444_v31, %v1597_v1  ;;  %v1600_v56 = vmul.f32 %v5438_v28, %v1460_v37  ;;  %v1601_v22 = vmul.f32 %v5440_v63, %v1461_v3  ;;  %v3638_v48 = vpop.eup %3637  ;;  %v1157_v62 = vpop.xlane.xlu1 %1156 }
 0x231   : > { %v1738_v27 = vadd.f32 %v5442_v10, %v1598_v34  ;;  %v1739_v7 = vadd.f32 %v5444_v31, %v1599_v61  ;;  %v1602_v39 = vmul.f32 %v5438_v28, %v1462_v26  ;;  %v1603_v59 = vmul.f32 %v5440_v63, %v1463_v44  ;;  %v5697_v17 = vpop.xlane.xlu0 %1159 }
 0x232   : > { %1864 = vst [vmem:[#allocation2 + $0x130] sm:$0xff] %v1736_v53  ;;  %1865 = vst [vmem:[#allocation2 + $0x200] sm:$0xff] %v1737_v29  ;;  %v1740_v9 = vadd.f32 %v5442_v10, %v1600_v56  ;;  %v1741_v8 = vadd.f32 %v5444_v31, %v1601_v22  ;;  %v1464_v58 = vmul.f32 %v3632_v24, %v7014_v50  ;;  %v1242_v14 = vmul.f32 0.00390625, %v5621_v4 }
 0x233   : > { %v1465_v52 = vmul.f32 %v3632_v24, %v7015_v6  ;;  %1866 = vst [vmem:[#allocation2 + $0x318] sm:$0xff] %v1738_v27  ;;  %1867 = vst [vmem:[#allocation2 + $0x220] sm:$0xff] %v1739_v7  ;;  %v1742_v51 = vadd.f32 %v5442_v10, %v1602_v39  ;;  %v1743_v12 = vadd.f32 %v5444_v31, %v1603_v59  ;;  %v1243_v44 = vmul.f32 0.00390625, %v5637_v57 }
 0x234   : > { %v1466_v55 = vmul.f32 %v3634_v49, %v7016_v45  ;;  %v1467_v33 = vmul.f32 %v3634_v49, %v7017_v60  ;;  %1868 = vst [vmem:[#allocation2 + $0x70] sm:$0xff] %v1740_v9  ;;  %1869 = vst [vmem:[#allocation2 + $0x300] sm:$0xff] %v1741_v8  ;;  %v1604_v5 = vmul.f32 %v5438_v28, %v1464_v58  ;;  %v1163_v0 = vpop.xlane.xlu1 %1162  ;;  %v1306_v56 = vadd.f32 1e-05, %v1242_v14 }
 0x235   : > { %v1605_v32 = vmul.f32 %v5440_v63, %v1465_v52  ;;  %v1468_v15 = vmul.f32 %v3636_v41, %v7018_v36  ;;  %v1469_v2 = vmul.f32 %v3636_v41, %v7019_v43  ;;  %1870 = vst [vmem:[#allocation2 + $0xe0] sm:$0xff] %v1742_v51  ;;  %1871 = vst [vmem:[#allocation2 + $0x178] sm:$0xff] %v1743_v12  ;;  %v1166_v42 = vpop.xlane.xlu0 %1165  ;;  %v1244_v22 = vmul.f32 0.00390625, %v5639_v30 }
 0x236   : > { %v1606_v20 = vmul.f32 %v5438_v28, %v1466_v55  ;;  %v1607_v24 = vmul.f32 %v5440_v63, %v1467_v33  ;;  %v1470_v38 = vmul.f32 %v3638_v48, %v7020_v13  ;;  %v1471_v46 = vmul.f32 %v3638_v48, %v7021_v54  ;;  %v7022_v54 = vld [vmem:[#allocation59_spill] sm:$0xff] }
 0x237   : > { %v1744_v49 = vadd.f32 %v5442_v10, %v1604_v5  ;;  %v1745_v11 = vadd.f32 %v5444_v31, %v1605_v32  ;;  %v1608_v1 = vmul.f32 %v5438_v28, %v1468_v15  ;;  %v1609_v16 = vmul.f32 %v5440_v63, %v1469_v2  ;;  %v3640_v15 = vpop.eup %3639 }
 0x238   : > { %v1746_v37 = vadd.f32 %v5442_v10, %v1606_v20  ;;  %v1747_v40 = vadd.f32 %v5444_v31, %v1607_v24  ;;  %v1610_v3 = vmul.f32 %v5438_v28, %v1470_v38  ;;  %v1611_v41 = vmul.f32 %v5440_v63, %v1471_v46  ;;  %v1169_v53 = vpop.xlane.xlu1 %1168  ;;  %v3642_v38 = vpop.eup %3641 }
 0x239   : > { %1872 = vst [vmem:[#allocation2 + $0x328] sm:$0xff] %v1744_v49  ;;  %1873 = vst [vmem:[#allocation2 + $0x260] sm:$0xff] %v1745_v11  ;;  %v1748_v34 = vadd.f32 %v5442_v10, %v1608_v1  ;;  %v1749_v61 = vadd.f32 %v5444_v31, %v1609_v16  ;;  %v1172_v29 = vpop.xlane.xlu0 %1171  ;;  %v1246_v4 = vmul.f32 0.00390625, %v5659_v25  ;;  %v1307_v48 = vadd.f32 1e-05, %v1243_v44  ;;  %v7024_v11 = vld [vmem:[#allocation61_spill] sm:$0xff] }
 0x23a   : > { %1874 = vst [vmem:[#allocation2 + $0x3b8] sm:$0xff] %v1746_v37  ;;  %1875 = vst [vmem:[#allocation2 + $0x2b8] sm:$0xff] %v1747_v40  ;;  %v1750_v26 = vadd.f32 %v5442_v10, %v1610_v3  ;;  %v1751_v19 = vadd.f32 %v5444_v31, %v1611_v41  ;;  %v1247_v27 = vmul.f32 0.00390625, %v5677_v21  ;;  %v1249_v7 = vmul.f32 0.00390625, %v1157_v62  ;;  %v7025_v16 = vld [vmem:[#allocation62_spill] sm:$0xff] }
 0x23b   : > { %1876 = vst [vmem:[#allocation2 + $0x248] sm:$0xff] %v1748_v34  ;;  %1877 = vst [vmem:[#allocation2 + $0x40] sm:$0xff] %v1749_v61  ;;  %3643 = vrsqrt.f32 %v1306_v56  ;;  %v1308_v57 = vadd.f32 1e-05, %v1244_v22  ;;  %v1309_v39 = vadd.f32 1e-05, %v1245_v23  ;;  %v1472_v46 = vmul.f32 %v3640_v15, %v7022_v54 }
 0x23c   : > { %1878 = vst [vmem:[#allocation2 + $0x20] sm:$0xff] %v1750_v26  ;;  %1879 = vst [vmem:[#allocation2 + $0xe8] sm:$0xff] %v1751_v19  ;;  %v1310_v59 = vadd.f32 1e-05, %v1246_v4  ;;  %3645 = vrsqrt.f32 %v1307_v48  ;;  %v1311_v9 = vadd.f32 1e-05, %v1247_v27  ;;  %v1175_v30 = vpop.xlane.xlu1 %1174  ;;  %v1474_v1 = vmul.f32 %v3642_v38, %v7024_v11 }
 0x23d   : > { %v1312_v8 = vadd.f32 1e-05, %v1248_v35  ;;  %v1178_v50 = vpop.xlane.xlu0 %1177  ;;  %3647 = vrsqrt.f32 %v1308_v57  ;;  %v1250_v47 = vmul.f32 0.00390625, %v5697_v17  ;;  %v1251_v25 = vmul.f32 0.00390625, %v1163_v0  ;;  %v7023_v0 = vld [vmem:[#allocation60_spill] sm:$0xff]  ;;  %v7026_v56 = vld [vmem:[#allocation63_spill] sm:$0xff] }
 0x23e   : > { %v1252_v58 = vmul.f32 0.00390625, %v1166_v42  ;;  %3649 = vrsqrt.f32 %v1309_v39  ;;  %v1313_v6 = vadd.f32 1e-05, %v1249_v7  ;;  %v1253_v21 = vmul.f32 0.00390625, %v1169_v53  ;;  %v7027_v23 = vld [vmem:[#allocation64_spill] sm:$0xff]  ;;  %v7028_v7 = vld [vmem:[#allocation65_spill] sm:$0xff] }
 0x23f   : > { %3651 = vrsqrt.f32 %v1310_v59  ;;  %v1314_v18 = vadd.f32 1e-05, %v1250_v47  ;;  %v1254_v62 = vmul.f32 0.00390625, %v1172_v29  ;;  %v1255_v52 = vmul.f32 0.00390625, %v1175_v30  ;;  %v7029_v39 = vld [vmem:[#allocation66_spill] sm:$0xff] }
 0x240   : > { %3653 = vrsqrt.f32 %v1311_v9  ;;  %v1315_v51 = vadd.f32 1e-05, %v1251_v25  ;;  %v1316_v12 = vadd.f32 1e-05, %v1252_v58  ;;  %v1181_v45 = vpop.xlane.xlu1 %1180  ;;  %v1256_v60 = vmul.f32 0.00390625, %v1178_v50  ;;  %v7030_v50 = vld [vmem:[#allocation67_spill] sm:$0xff] }
 0x241   : > { %v1184_v55 = vpop.xlane.xlu0 %1183  ;;  %3655 = vrsqrt.f32 %v1312_v8  ;;  %v1257_v33 = vmul.f32 0.00390625, %v1181_v45  ;;  %v1317_v17 = vadd.f32 1e-05, %v1253_v21  ;;  %v1318_v32 = vadd.f32 1e-05, %v1254_v62  ;;  %v7031_v25 = vld [vmem:[#allocation68_spill] sm:$0xff] }
 0x242   : > { %v1258_v5 = vmul.f32 0.00390625, %v1184_v55  ;;  %3657 = vrsqrt.f32 %v1313_v6  ;;  %v1319_v36 = vadd.f32 1e-05, %v1255_v52  ;;  %v5737_v43 = vadd.f32 1e-05, %v1256_v60  ;;  %v7032_v62 = vld [vmem:[#allocation69_spill] sm:$0xff] }
 0x243   : > { %3659 = vrsqrt.f32 %v1314_v18  ;;  %v5739_v2 = vadd.f32 1e-05, %v1257_v33  ;;  %v1473_v42 = vmul.f32 %v3640_v15, %v7023_v0  ;;  %v1475_v37 = vmul.f32 %v3642_v38, %v7025_v16 }
 0x244   : > { %3661 = vrsqrt.f32 %v1315_v51  ;;  %v5741_v20 = vadd.f32 1e-05, %v1258_v5  ;;  %v1187_v24 = vpop.xlane.xlu1 %1186  ;;  %v1612_v3 = vmul.f32 %v5438_v28, %v1472_v46  ;;  %v1614_v14 = vmul.f32 %v5438_v28, %v1474_v1  ;;  %v7033_v51 = vld [vmem:[#allocation70_spill] sm:$0xff]  ;;  %v7034_v46 = vld [vmem:[#allocation71_spill] sm:$0xff] }
 0x245   : > { %v1190_v13 = vpop.xlane.xlu0 %1189  ;;  %3663 = vrsqrt.f32 %v1316_v12  ;;  %v1259_v49 = vmul.f32 0.00390625, %v1187_v24  ;;  %v1613_v41 = vmul.f32 %v5440_v63, %v1473_v42  ;;  %v1615_v26 = vmul.f32 %v5440_v63, %v1475_v37  ;;  %v7035_v42 = vld [vmem:[#allocation72_spill] sm:$0xff]  ;;  %v7036_v37 = vld [vmem:[#allocation73_spill] sm:$0xff] }
 0x246   : > { %3665 = vrsqrt.f32 %v1317_v17  ;;  %v1260_v40 = vmul.f32 0.00390625, %v1190_v13  ;;  %v1752_v53 = vadd.f32 %v5442_v10, %v1612_v3  ;;  %v1754_v27 = vadd.f32 %v5442_v10, %v1614_v14  ;;  %v7037_v3 = vld [vmem:[#allocation74_spill] sm:$0xff] }
 0x247   : > { %3667 = vrsqrt.f32 %v1318_v32  ;;  %v5749_v34 = vadd.f32 1e-05, %v1259_v49  ;;  %v1753_v29 = vadd.f32 %v5444_v31, %v1613_v41  ;;  %v1755_v35 = vadd.f32 %v5444_v31, %v1615_v26 }
 0x248   : > { %v3644_v61 = vpop.eup %3643  ;;  %3669 = vrsqrt.f32 %v1319_v36  ;;  %v5753_v19 = vadd.f32 1e-05, %v1260_v40  ;;  %1880 = vst [vmem:[#allocation2 + $0x288] sm:$0xff] %v1752_v53  ;;  %1882 = vst [vmem:[#allocation2 + $0x3c8] sm:$0xff] %v1754_v27 }
 0x249   : > { %v3646_v44 = vpop.eup %3645  ;;  %v1476_v22 = vmul.f32 %v3644_v61, %v7026_v56  ;;  %v1477_v4 = vmul.f32 %v3644_v61, %v7027_v23  ;;  %1881 = vst [vmem:[#allocation2 + $0x3a8] sm:$0xff] %v1753_v29  ;;  %1883 = vst [vmem:[#allocation2 + $0x160] sm:$0xff] %v1755_v35  ;;  %v7039_v29 = vld [vmem:[#allocation76_spill] sm:$0xff]  ;;  %v7041_v35 = vld [vmem:[#allocation78_spill] sm:$0xff]  ;;  %3671 = vrsqrt.f32 %v5737_v43 }
 0x24a   : > { %v3648_v48 = vpop.eup %3647  ;;  %v1478_v57 = vmul.f32 %v3646_v44, %v7028_v7  ;;  %v1479_v59 = vmul.f32 %v3646_v44, %v7029_v39  ;;  %v7038_v44 = vld [vmem:[#allocation75_spill] sm:$0xff]  ;;  %3673 = vrsqrt.f32 %v5739_v2 }
 0x24b   : > { %v3650_v9 = vpop.eup %3649  ;;  %v1616_v8 = vmul.f32 %v5438_v28, %v1476_v22  ;;  %v1617_v30 = vmul.f32 %v5440_v63, %v1477_v4  ;;  %v1480_v47 = vmul.f32 %v3648_v48, %v7030_v50  ;;  %v1481_v58 = vmul.f32 %v3648_v48, %v7031_v25  ;;  %v7040_v48 = vld [vmem:[#allocation77_spill] sm:$0xff] }
 0x24c   : > { %v3652_v6 = vpop.eup %3651  ;;  %v1618_v21 = vmul.f32 %v5438_v28, %v1478_v57  ;;  %v1619_v18 = vmul.f32 %v5440_v63, %v1479_v59  ;;  %v1482_v52 = vmul.f32 %v3650_v9, %v7032_v62  ;;  %v1483_v12 = vmul.f32 %v3650_v9, %v7033_v51  ;;  %v7042_v62 = vld [vmem:[#allocation79_spill] sm:$0xff]  ;;  %v7043_v51 = vld [vmem:[#allocation80_spill] sm:$0xff] }
 0x24d   : > { %v3654_v45 = vpop.eup %3653  ;;  %v1756_v55 = vadd.f32 %v5442_v10, %v1616_v8  ;;  %v1757_v60 = vadd.f32 %v5444_v31, %v1617_v30  ;;  %v1620_v33 = vmul.f32 %v5438_v28, %v1480_v47  ;;  %v1621_v5 = vmul.f32 %v5440_v63, %v1481_v58 }
 0x24e   : > { %v3656_v17 = vpop.eup %3655  ;;  %v1758_v32 = vadd.f32 %v5442_v10, %v1618_v21  ;;  %v1759_v36 = vadd.f32 %v5444_v31, %v1619_v18  ;;  %v1622_v15 = vmul.f32 %v5438_v28, %v1482_v52  ;;  %v1623_v24 = vmul.f32 %v5440_v63, %v1483_v12 }
 0x24f   : > { %v3658_v13 = vpop.eup %3657  ;;  %1884 = vst [vmem:[#allocation2 + $0x2c8] sm:$0xff] %v1756_v55  ;;  %1885 = vst [vmem:[#allocation2 + $0x210] sm:$0xff] %v1757_v60  ;;  %v1760_v38 = vadd.f32 %v5442_v10, %v1620_v33  ;;  %v1761_v54 = vadd.f32 %v5444_v31, %v1621_v5  ;;  %v1484_v0 = vmul.f32 %v3652_v6, %v7034_v46  ;;  %v7044_v60 = vld [vmem:[#allocation81_spill] sm:$0xff]  ;;  %v7045_v5 = vld [vmem:[#allocation82_spill] sm:$0xff]  ;;  %3675 = vrsqrt.f32 %v5741_v20 }
 0x250   : > { %v1485_v49 = vmul.f32 %v3652_v6, %v7035_v42  ;;  %v3660_v11 = vpop.eup %3659  ;;  %1886 = vst [vmem:[#allocation2 + $0x3d8] sm:$0xff] %v1758_v32  ;;  %1887 = vst [vmem:[#allocation2 + $0x1e8] sm:$0xff] %v1759_v36  ;;  %v1762_v1 = vadd.f32 %v5442_v10, %v1622_v15  ;;  %v1763_v16 = vadd.f32 %v5444_v31, %v1623_v24  ;;  %v7046_v15 = vld [vmem:[#allocation83_spill] sm:$0xff]  ;;  %3677 = vrsqrt.f32 %v5749_v34  ;;  %v7056_v34 = vld [vmem:[#allocation93_spill] sm:$0xff] }
 0x251   : > { %v1486_v40 = vmul.f32 %v3654_v45, %v7036_v37  ;;  %v1487_v41 = vmul.f32 %v3654_v45, %v7037_v3  ;;  %v3662_v61 = vpop.eup %3661  ;;  %1888 = vst [vmem:[#allocation2 + $0x1b0] sm:$0xff] %v1760_v38  ;;  %1889 = vst [vmem:[#allocation2 + $0x1c8] sm:$0xff] %v1761_v54  ;;  %v1624_v14 = vmul.f32 %v5438_v28, %v1484_v0  ;;  %v7048_v0 = vld [vmem:[#allocation85_spill] sm:$0xff]  ;;  %3679 = vrsqrt.f32 %v5753_v19 }
 0x252   : > { %v1625_v26 = vmul.f32 %v5440_v63, %v1485_v49  ;;  %v1488_v53 = vmul.f32 %v3656_v17, %v7038_v44  ;;  %v1489_v56 = vmul.f32 %v3656_v17, %v7039_v29  ;;  %v3664_v22 = vpop.eup %3663  ;;  %1890 = vst [vmem:[#allocation2 + $0x2d0] sm:$0xff] %v1762_v1  ;;  %1891 = vst [vmem:[#allocation2 + $0x1d0] sm:$0xff] %v1763_v16  ;;  %v7049_v49 = vld [vmem:[#allocation86_spill] sm:$0xff]  ;;  %v1193_v1 = vpop.xlane.xlu1 %1192  ;;  %v7050_v29 = vld [vmem:[#allocation87_spill] sm:$0xff] }
 0x253   : > { %v1626_v23 = vmul.f32 %v5438_v28, %v1486_v40  ;;  %v1627_v4 = vmul.f32 %v5440_v63, %v1487_v41  ;;  %v1490_v27 = vmul.f32 %v3658_v13, %v7040_v48  ;;  %v1491_v7 = vmul.f32 %v3658_v13, %v7041_v35  ;;  %v3666_v57 = vpop.eup %3665  ;;  %v7047_v13 = vld [vmem:[#allocation84_spill] sm:$0xff]  ;;  %v7052_v35 = vld [vmem:[#allocation89_spill] sm:$0xff] }
 0x254   : > { %v1764_v39 = vadd.f32 %v5442_v10, %v1624_v14  ;;  %v1765_v59 = vadd.f32 %v5444_v31, %v1625_v26  ;;  %v1628_v9 = vmul.f32 %v5438_v28, %v1488_v53  ;;  %v1629_v8 = vmul.f32 %v5440_v63, %v1489_v56  ;;  %v3668_v30 = vpop.eup %3667 }
 0x255   : > { %v1766_v50 = vadd.f32 %v5442_v10, %v1626_v23  ;;  %v1767_v47 = vadd.f32 %v5444_v31, %v1627_v4  ;;  %v1630_v25 = vmul.f32 %v5438_v28, %v1490_v27  ;;  %v1631_v58 = vmul.f32 %v5440_v63, %v1491_v7  ;;  %v3670_v6 = vpop.eup %3669  ;;  %v1196_v4 = vpop.xlane.xlu0 %1195 }
 0x256   : > { %1892 = vst [vmem:[#allocation2 + $0x58] sm:$0xff] %v1764_v39  ;;  %1893 = vst [vmem:[#allocation2 + $0x120] sm:$0xff] %v1765_v59  ;;  %v1768_v21 = vadd.f32 %v5442_v10, %v1628_v9  ;;  %v1769_v18 = vadd.f32 %v5444_v31, %v1629_v8  ;;  %v1492_v52 = vmul.f32 %v3660_v11, %v7042_v62  ;;  %v1261_v8 = vmul.f32 0.00390625, %v1193_v1  ;;  %v3672_v20 = vpop.eup %3671  ;;  %v7061_v1 = vld [vmem:[#allocation98_spill] sm:$0xff] }
 0x257   : > { %v1493_v12 = vmul.f32 %v3660_v11, %v7043_v51  ;;  %1894 = vst [vmem:[#allocation2 + $0x198] sm:$0xff] %v1766_v50  ;;  %1895 = vst [vmem:[#allocation2 + $0x2e8] sm:$0xff] %v1767_v47  ;;  %v1770_v45 = vadd.f32 %v5442_v10, %v1630_v25  ;;  %v1771_v55 = vadd.f32 %v5444_v31, %v1631_v58  ;;  %v1262_v47 = vmul.f32 0.00390625, %v1196_v4  ;;  %v1199_v25 = vpop.xlane.xlu1 %1198  ;;  %v3674_v51 = vpop.eup %3673 }
 0x258   : > { %v1494_v33 = vmul.f32 %v3662_v61, %v7044_v60  ;;  %v1495_v17 = vmul.f32 %v3662_v61, %v7045_v5  ;;  %1896 = vst [vmem:[#allocation2 + $0x1f8] sm:$0xff] %v1768_v21  ;;  %1897 = vst [vmem:[#allocation2 + $0x238] sm:$0xff] %v1769_v18  ;;  %v1632_v32 = vmul.f32 %v5438_v28, %v1492_v52  ;;  %v1325_v21 = vadd.f32 1e-05, %v1261_v8 }
 0x259   : > { %v1633_v36 = vmul.f32 %v5440_v63, %v1493_v12  ;;  %v1496_v24 = vmul.f32 %v3664_v22, %v7046_v15  ;;  %v1497_v38 = vmul.f32 %v3664_v22, %v7047_v13  ;;  %1898 = vst [vmem:[#allocation2 + $0x398] sm:$0xff] %v1770_v45  ;;  %1899 = vst [vmem:[#allocation2 + $0x390] sm:$0xff] %v1771_v55  ;;  %v7051_v22 = vld [vmem:[#allocation88_spill] sm:$0xff]  ;;  %v1326_v62 = vadd.f32 1e-05, %v1262_v47  ;;  %v7054_v12 = vld [vmem:[#allocation91_spill] sm:$0xff] }
 0x25a   : > { %v1634_v54 = vmul.f32 %v5438_v28, %v1494_v33  ;;  %v1635_v46 = vmul.f32 %v5440_v63, %v1495_v17  ;;  %v1498_v42 = vmul.f32 %v3666_v57, %v7048_v0  ;;  %v1499_v11 = vmul.f32 %v3666_v57, %v7049_v49  ;;  %v7053_v57 = vld [vmem:[#allocation90_spill] sm:$0xff]  ;;  %v7055_v55 = vld [vmem:[#allocation92_spill] sm:$0xff]  ;;  %v7060_v49 = vld [vmem:[#allocation97_spill] sm:$0xff] }
 0x25b   : > { %v1772_v16 = vadd.f32 %v5442_v10, %v1632_v32  ;;  %v1773_v37 = vadd.f32 %v5444_v31, %v1633_v36  ;;  %v1636_v40 = vmul.f32 %v5438_v28, %v1496_v24  ;;  %v1637_v3 = vmul.f32 %v5440_v63, %v1497_v38  ;;  %v7057_v17 = vld [vmem:[#allocation94_spill] sm:$0xff]  ;;  %v7058_v24 = vld [vmem:[#allocation95_spill] sm:$0xff]  ;;  %v7059_v38 = vld [vmem:[#allocation96_spill] sm:$0xff] }
 0x25c   : > { %v1774_v41 = vadd.f32 %v5442_v10, %v1634_v54  ;;  %v1775_v61 = vadd.f32 %v5444_v31, %v1635_v46  ;;  %v1638_v14 = vmul.f32 %v5438_v28, %v1498_v42  ;;  %v1639_v26 = vmul.f32 %v5440_v63, %v1499_v11  ;;  %v3676_v33 = vpop.eup %3675  ;;  %v7066_v47 = vld [vmem:[#allocation115_spill] sm:$0xff] }
 0x25d   : > { %1900 = vst [vmem:[#allocation2 + $0x1a0] sm:$0xff] %v1772_v16  ;;  %1901 = vst [vmem:[#allocation2 + $0xa8] sm:$0xff] %v1773_v37  ;;  %v1776_v44 = vadd.f32 %v5442_v10, %v1636_v40  ;;  %v1777_v53 = vadd.f32 %v5444_v31, %v1637_v3  ;;  %v1500_v56 = vmul.f32 %v3668_v30, %v7050_v29  ;;  %v1263_v2 = vmul.f32 0.00390625, %v1199_v25  ;;  %v3678_v36 = vpop.eup %3677 }
 0x25e   : > { %v1501_v23 = vmul.f32 %v3668_v30, %v7051_v22  ;;  %1902 = vst [vmem:[#allocation2 + $0x258] sm:$0xff] %v1774_v41  ;;  %1903 = vst [vmem:[#allocation2 + $0x2d8] sm:$0xff] %v1775_v61  ;;  %v1778_v48 = vadd.f32 %v5442_v10, %v1638_v14  ;;  %v1779_v27 = vadd.f32 %v5444_v31, %v1639_v26  ;;  %3681 = vrsqrt.f32 %v1325_v21  ;;  %v3680_v46 = vpop.eup %3679 }
 0x25f   : > { %v1502_v7 = vmul.f32 %v3670_v6, %v7052_v35  ;;  %v1503_v39 = vmul.f32 %v3670_v6, %v7053_v57  ;;  %1904 = vst [vmem:[#allocation2 + $0xf0] sm:$0xff] %v1776_v44  ;;  %1905 = vst [vmem:[#allocation2 + $0x180] sm:$0xff] %v1777_v53  ;;  %v1640_v59 = vmul.f32 %v5438_v28, %v1500_v56  ;;  %3683 = vrsqrt.f32 %v1326_v62 }
 0x260   : > { %v1641_v9 = vmul.f32 %v5440_v63, %v1501_v23  ;;  %1906 = vst [vmem:[#allocation2 + $0x170] sm:$0xff] %v1778_v48  ;;  %1907 = vst [vmem:[#allocation2 + $0x3d0] sm:$0xff] %v1779_v27  ;;  %v1327_v52 = vadd.f32 1e-05, %v1263_v2  ;;  %v1504_v45 = vmul.f32 %v3672_v20, %v7054_v12  ;;  %v1505_v60 = vmul.f32 %v3672_v20, %v7055_v55  ;;  %v7062_v23 = vld [vmem:[#allocation99_spill] sm:$0xff]  ;;  %v7063_v48 = vld [vmem:[#allocation100_spill] sm:$0xff] }
 0x261   : > { %v1642_v30 = vmul.f32 %v5438_v28, %v1502_v7  ;;  %v1643_v50 = vmul.f32 %v5440_v63, %v1503_v39  ;;  %v1780_v58 = vadd.f32 %v5442_v10, %v1640_v59  ;;  %v1506_v5 = vmul.f32 %v3674_v51, %v7056_v34  ;;  %v7064_v39 = vld [vmem:[#allocation101_spill] sm:$0xff]  ;;  %v7069_v2 = vld [vmem:[#allocation104_spill] sm:$0xff] }
 0x262   : > { %v1781_v6 = vadd.f32 %v5444_v31, %v1641_v9  ;;  %3685 = vrsqrt.f32 %v1327_v52  ;;  %v1507_v32 = vmul.f32 %v3674_v51, %v7057_v17  ;;  %v1644_v19 = vmul.f32 %v5438_v28, %v1504_v45  ;;  %v7065_v9 = vld [vmem:[#allocation102_spill] sm:$0xff] }
 0x263   : > { %v1782_v43 = vadd.f32 %v5442_v10, %v1642_v30  ;;  %v1783_v18 = vadd.f32 %v5444_v31, %v1643_v50  ;;  %1908 = vst [vmem:[#allocation2 + $0x250] sm:$0xff] %v1780_v58  ;;  %v1645_v15 = vmul.f32 %v5440_v63, %v1505_v60  ;;  %v1508_v13 = vmul.f32 %v3676_v33, %v7058_v24  ;;  %v7067_v58 = vld [vmem:[#allocation103_spill] sm:$0xff] }
 0x264   : > { %1909 = vst [vmem:[#allocation2 + $0x378] sm:$0xff] %v1781_v6  ;;  %v1509_v54 = vmul.f32 %v3676_v33, %v7059_v38  ;;  %v1646_v0 = vmul.f32 %v5438_v28, %v1506_v5  ;;  %v1647_v42 = vmul.f32 %v5440_v63, %v1507_v32  ;;  %v1510_v11 = vmul.f32 %v3678_v36, %v7060_v49 }
 0x265   : > { %1910 = vst [vmem:[#allocation2 + $0xb8] sm:$0xff] %v1782_v43  ;;  %1911 = vst [vmem:[#allocation2 + $0x38] sm:$0xff] %v1783_v18  ;;  %v1511_v16 = vmul.f32 %v3678_v36, %v7061_v1  ;;  %v1784_v40 = vadd.f32 %v5442_v10, %v1644_v19  ;;  %v1785_v3 = vadd.f32 %v5444_v31, %v1645_v15  ;;  %v7068_v18 = vld [vmem:[#allocation116_spill] sm:$0xff] }
 0x266   : > { %v1648_v41 = vmul.f32 %v5438_v28, %v1508_v13  ;;  %v1649_v61 = vmul.f32 %v5440_v63, %v1509_v54  ;;  %v1786_v26 = vadd.f32 %v5442_v10, %v1646_v0  ;;  %v1787_v44 = vadd.f32 %v5444_v31, %v1647_v42 }
 0x267   : > { %v1650_v53 = vmul.f32 %v5438_v28, %v1510_v11  ;;  %v1651_v29 = vmul.f32 %v5440_v63, %v1511_v16  ;;  %1912 = vst [vmem:[#allocation2 + $0x78] sm:$0xff] %v1784_v40  ;;  %1913 = vst [vmem:[#allocation2 + $0x308] sm:$0xff] %v1785_v3  ;;  %v1512_v4 = vmul.f32 %v3680_v46, %v7062_v23 }
 0x268   : > { %v1788_v56 = vadd.f32 %v5442_v10, %v1648_v41  ;;  %v1789_v22 = vadd.f32 %v5444_v31, %v1649_v61  ;;  %v1513_v27 = vmul.f32 %v3680_v46, %v7063_v48  ;;  %1914 = vst [vmem:[#allocation2 + $0x370] sm:$0xff] %v1786_v26  ;;  %1915 = vst [vmem:[#allocation2 + $0xc8] sm:$0xff] %v1787_v44 }
 0x269   : > { %v1790_v7 = vadd.f32 %v5442_v10, %v1650_v53  ;;  %v1791_v57 = vadd.f32 %v5444_v31, %v1651_v29  ;;  %v1652_v30 = vmul.f32 %v5438_v28, %v1512_v4 }
 0x26a   : > { %1916 = vst [vmem:[#allocation2 + $0x278] sm:$0xff] %v1788_v56  ;;  %1917 = vst [vmem:[#allocation2 + $0x360] sm:$0xff] %v1789_v22  ;;  %v1653_v50 = vmul.f32 %v5440_v63, %v1513_v27 }
 0x26b   : > { %v3682_v37 = vpop.eup %3681  ;;  %1918 = vst [vmem:[#allocation2 + $0x228] sm:$0xff] %v1790_v7  ;;  %1919 = vst [vmem:[#allocation2 + $0x348] sm:$0xff] %v1791_v57  ;;  %v1792_v20 = vadd.f32 %v5442_v10, %v1652_v30 }
 0x26c   : > { %v3684_v14 = vpop.eup %3683  ;;  %v1514_v59 = vmul.f32 %v3682_v37, %v7064_v39  ;;  %v1515_v8 = vmul.f32 %v3682_v37, %v7065_v9  ;;  %v1793_v51 = vadd.f32 %v5444_v31, %v1653_v50 }
 0x26d   : > { %v1516_v25 = vmul.f32 %v3684_v14, %v7066_v47  ;;  %v1517_v6 = vmul.f32 %v3684_v14, %v7067_v58  ;;  %1920 = vst [vmem:[#allocation2 + $0x148] sm:$0xff] %v1792_v20 }
 0x26e   : > { %v1654_v21 = vmul.f32 %v5438_v28, %v1514_v59  ;;  %v1655_v43 = vmul.f32 %v5440_v63, %v1515_v8  ;;  %1921 = vst [vmem:[#allocation2 + $0xf8] sm:$0xff] %v1793_v51 }
 0x26f   : > { %v3686_v35 = vpop.eup %3685  ;;  %v1656_v12 = vmul.f32 %v5438_v28, %v1516_v25  ;;  %v1657_v45 = vmul.f32 %v5440_v63, %v1517_v6 }
 0x270   : > { %v1518_v62 = vmul.f32 %v3686_v35, %v7068_v18  ;;  %v1519_v52 = vmul.f32 %v3686_v35, %v7069_v2  ;;  %v1794_v55 = vadd.f32 %v5442_v10, %v1654_v21  ;;  %v1795_v60 = vadd.f32 %v5444_v31, %v1655_v43 }
 0x271   : > { %v1796_v5 = vadd.f32 %v5442_v10, %v1656_v12  ;;  %v1797_v17 = vadd.f32 %v5444_v31, %v1657_v45 }
 0x272   : > { %v1658_v33 = vmul.f32 %v5438_v28, %v1518_v62  ;;  %v1659_v34 = vmul.f32 %v5440_v63, %v1519_v52  ;;  %1922 = vst [vmem:[#allocation2 + $0x68] sm:$0xff] %v1794_v55  ;;  %1923 = vst [vmem:[#allocation2] sm:$0xff] %v1795_v60 }
 0x273   : > { %1924 = vst [vmem:[#allocation2 + $0x298] sm:$0xff] %v1796_v5  ;;  %1925 = vst [vmem:[#allocation2 + $0x270] sm:$0xff] %v1797_v17 }
 0x274   : > { %v1798_v32 = vadd.f32 %v5442_v10, %v1658_v33  ;;  %v1799_v36 = vadd.f32 %v5444_v31, %v1659_v34 }
 0x276   : > { %1926 = vst [vmem:[#allocation2 + $0x310] sm:$0xff] %v1798_v32  ;;  %1927 = vst [vmem:[#allocation2 + $0x190] sm:$0xff] %v1799_v36 }
 0x277 PF: > { %v2102_v28 = vld [vmem:[%s4271_s17 + $0x170] sm:$0xff]  ;;  %v2101_v63 = vld [vmem:[%s4271_s17 + $0x168] sm:$0xff]  ;;  %v2103_v19 = vld [vmem:[%s4271_s17 + $0x178] sm:$0xff]  ;;  %v3987_v10 = vmov 0.0   ;;  %s7070_s10 = sld [smem:[#allocation20_spill]]  ;;  %s3212_s16 = sshll.u32 %s4283_s12, 4  ;;  %s6420_s16 = int_to_ptr.vmem [resolvable:$true] %s3212_s16 }
 0x278   : > { %2169 = vmatprep.subr.mxu0 %v2102_v28  ;;  %2618 = vmatprep.subr.mxu1 %v3987_v10  ;;  %v2099_v31 = vld [vmem:[%s4271_s17 + $0x158] sm:$0xff]  ;;  %v2098_v15 = vld [vmem:[%s4271_s17 + $0x150] sm:$0xff]  ;;  %v2100_v24 = vld [vmem:[%s4271_s17 + $0x160] sm:$0xff]  ;;  %s7071_s14 = sld [smem:[#allocation21_spill]]  ;;  %s6428_s15 = scalar_lea.sflag [#allocation5], %s355_s1 }
 0x279   : > { %2170 = vmatpush1.msra.mxu0 %v2101_v63  ;;  %2619 = vmatpush1.msra.mxu1 %v2103_v19  ;;  %v2096_v13 = vld [vmem:[%s4271_s17 + $0x140] sm:$0xff]  ;;  %v2095_v38 = vld [vmem:[%s4271_s17 + $0x138] sm:$0xff]  ;;  %v2097_v54 = vld [vmem:[%s4271_s17 + $0x148] sm:$0xff]  ;;  %s7073_s9 = sld [smem:[#allocation25_spill]]  ;;  %s3823_s3 = scalar_lea.vmem %s6420_s16, 24576 }
 0x27a   : > { %2171 = vmatprep.subr.mxu0 %v2099_v31  ;;  %2620 = vmatprep.subr.mxu1 %v3987_v10  ;;  %v2093_v46 = vld [vmem:[%s4271_s17 + $0x128] sm:$0xff]  ;;  %v2092_v0 = vld [vmem:[%s4271_s17 + $0x120] sm:$0xff]  ;;  %v2094_v42 = vld [vmem:[%s4271_s17 + $0x130] sm:$0xff]  ;;  %s7074_s28 = sld [smem:[#allocation121_spill]]  ;;  %p3824_p1 = scmp.ne.s32.totalorder %s6420_s16, %s3823_s3 }
 0x27b   : > { %2172 = vmatpush1.msra.mxu0 %v2098_v15  ;;  %2621 = vmatpush1.msra.mxu1 %v2100_v24  ;;  %v2090_v49 = vld [vmem:[%s4271_s17 + $0x110] sm:$0xff]  ;;  %v2089_v11 = vld [vmem:[%s4271_s17 + $0x108] sm:$0xff]  ;;  %v2091_v1 = vld [vmem:[%s4271_s17 + $0x118] sm:$0xff] }
 0x27c   : > { %2173 = vmatprep.subr.mxu0 %v2096_v13  ;;  %2622 = vmatprep.subr.mxu1 %v3987_v10  ;;  %v2087_v16 = vld [vmem:[%s4271_s17 + $0xf8] sm:$0xff]  ;;  %v2086_v37 = vld [vmem:[%s4271_s17 + $0xf0] sm:$0xff]  ;;  %v2088_v40 = vld [vmem:[%s4271_s17 + $0x100] sm:$0xff] }
 0x27d   : > { %2174 = vmatpush1.msra.mxu0 %v2095_v38  ;;  %2623 = vmatpush1.msra.mxu1 %v2097_v54  ;;  %v2084_v3 = vld [vmem:[%s4271_s17 + $0xe0] sm:$0xff]  ;;  %v2083_v41 = vld [vmem:[%s4271_s17 + $0xd8] sm:$0xff]  ;;  %v2085_v61 = vld [vmem:[%s4271_s17 + $0xe8] sm:$0xff]  ;;  %s3204_s5 = smul.u32 3, %s7070_s10 }
 0x27e   : > { %2175 = vmatprep.subr.mxu0 %v2093_v46  ;;  %2624 = vmatprep.subr.mxu1 %v3987_v10  ;;  %v2081_v14 = vld [vmem:[%s4271_s17 + $0xc8] sm:$0xff]  ;;  %v2080_v26 = vld [vmem:[%s4271_s17 + $0xc0] sm:$0xff]  ;;  %v2082_v44 = vld [vmem:[%s4271_s17 + $0xd0] sm:$0xff]  ;;  %s3392_s7 = smul.u32 384, %s7071_s14 }
 0x27f   : > { %2176 = vmatpush1.msra.mxu0 %v2092_v0  ;;  %2625 = vmatpush1.msra.mxu1 %v2094_v42  ;;  %v2078_v53 = vld [vmem:[%s4271_s17 + $0xb0] sm:$0xff]  ;;  %v2077_v29 = vld [vmem:[%s4271_s17 + $0xa8] sm:$0xff]  ;;  %v2079_v56 = vld [vmem:[%s4271_s17 + $0xb8] sm:$0xff]  ;;  %p7076_p8 = scmp.ne.s32.totalorder %s7073_s9, 0 }
 0x280   : > { %2177 = vmatprep.subr.mxu0 %v2090_v49  ;;  %2626 = vmatprep.subr.mxu1 %v3987_v10  ;;  %v2075_v22 = vld [vmem:[%s4271_s17 + $0x98] sm:$0xff]  ;;  %v2074_v23 = vld [vmem:[%s4271_s17 + $0x90] sm:$0xff]  ;;  %v2076_v4 = vld [vmem:[%s4271_s17 + $0xa0] sm:$0xff]  ;;  %s3209_s0 = sadd.s32 %s3392_s7, %s3204_s5 }
 0x281   : > { %2178 = vmatpush1.msra.mxu0 %v2089_v11  ;;  %2627 = vmatpush1.msra.mxu1 %v2091_v1  ;;  %v2072_v48 = vld [vmem:[%s4271_s17 + $0x80] sm:$0xff]  ;;  %v2071_v27 = vld [vmem:[%s4271_s17 + $0x78] sm:$0xff]  ;;  %v2073_v35 = vld [vmem:[%s4271_s17 + $0x88] sm:$0xff]  ;;  %s3380_s13 = sshll.u32 %s3209_s0, 7  ;;  %p3825_p6 = pnand %p3824_p1, %p7076_p8 }
 0x282   : > { %2179 = vmatprep.subr.mxu0 %v2087_v16  ;;  %2628 = vmatprep.subr.mxu1 %v3987_v10  ;;  %v2069_v7 = vld [vmem:[%s4271_s17 + $0x68] sm:$0xff]  ;;  %v2068_v57 = vld [vmem:[%s4271_s17 + $0x60] sm:$0xff]  ;;  %v2070_v39 = vld [vmem:[%s4271_s17 + $0x70] sm:$0xff]  ;;  %s6418_s18 = scalar_lea.hbm %s7074_s28, %s3380_s13 }
 0x283   : > { %2180 = vmatpush1.msra.mxu0 %v2086_v37  ;;  %2629 = vmatpush1.msra.mxu1 %v2088_v40  ;;  %v2066_v59 = vld [vmem:[%s4271_s17 + $0x50] sm:$0xff]  ;;  %v2065_v9 = vld [vmem:[%s4271_s17 + $0x48] sm:$0xff]  ;;  %v2067_v8 = vld [vmem:[%s4271_s17 + $0x58] sm:$0xff]  ;;  %p3826_p12 = pneg %p3825_p6 }
 0x284   : > { %2181 = vmatprep.subr.mxu0 %v2084_v3  ;;  %2630 = vmatprep.subr.mxu1 %v3987_v10  ;;  %v2063_v30 = vld [vmem:[%s4271_s17 + $0x38] sm:$0xff]  ;;  %v2062_v50 = vld [vmem:[%s4271_s17 + $0x30] sm:$0xff]  ;;  %v2064_v47 = vld [vmem:[%s4271_s17 + $0x40] sm:$0xff] }
 0x285   : > { %2182 = vmatpush1.msra.mxu0 %v2083_v41  ;;  %2631 = vmatpush1.msra.mxu1 %v2085_v61  ;;  %v2060_v25 = vld [vmem:[%s4271_s17 + $0x20] sm:$0xff]  ;;  %v2059_v58 = vld [vmem:[%s4271_s17 + $0x18] sm:$0xff]  ;;  %v2061_v6 = vld [vmem:[%s4271_s17 + $0x28] sm:$0xff] }
 0x286   : > { %2183 = vmatprep.subr.mxu0 %v2081_v14  ;;  %2632 = vmatprep.subr.mxu1 %v3987_v10  ;;  %v2057_v21 = vld [vmem:[%s4271_s17 + $0x8] sm:$0xff]  ;;  %v2056_v43 = vld [vmem:[%s4271_s17] sm:$0xff]  ;;  %v2058_v18 = vld [vmem:[%s4271_s17 + $0x10] sm:$0xff] }
 0x287   : > { %2184 = vmatpush1.msra.mxu0 %v2080_v26  ;;  %2633 = vmatpush1.msra.mxu1 %v2082_v44  ;;  %v2150_v62 = vld [vmem:[%s4271_s17 + $0x2f0] sm:$0xff]  ;;  %v2149_v2 = vld [vmem:[%s4271_s17 + $0x2e8] sm:$0xff]  ;;  %v2151_v52 = vld [vmem:[%s4271_s17 + $0x2f8] sm:$0xff] }
 0x288   : > { %2185 = vmatprep.subr.mxu0 %v2078_v53  ;;  %2634 = vmatprep.subr.mxu1 %v3987_v10  ;;  %v2147_v20 = vld [vmem:[%s4271_s17 + $0x2d8] sm:$0xff]  ;;  %v2146_v51 = vld [vmem:[%s4271_s17 + $0x2d0] sm:$0xff]  ;;  %v2148_v12 = vld [vmem:[%s4271_s17 + $0x2e0] sm:$0xff] }
 0x289   : > { %2186 = vmatpush1.msra.mxu0 %v2077_v29  ;;  %2635 = vmatpush1.msra.mxu1 %v2079_v56  ;;  %v2144_v45 = vld [vmem:[%s4271_s17 + $0x2c0] sm:$0xff]  ;;  %v2143_v55 = vld [vmem:[%s4271_s17 + $0x2b8] sm:$0xff]  ;;  %v2145_v60 = vld [vmem:[%s4271_s17 + $0x2c8] sm:$0xff] }
 0x28a   : > { %2187 = vmatprep.subr.mxu0 %v2075_v22  ;;  %2636 = vmatprep.subr.mxu1 %v3987_v10  ;;  %v2141_v33 = vld [vmem:[%s4271_s17 + $0x2a8] sm:$0xff]  ;;  %v2140_v34 = vld [vmem:[%s4271_s17 + $0x2a0] sm:$0xff]  ;;  %v2142_v5 = vld [vmem:[%s4271_s17 + $0x2b0] sm:$0xff] }
 0x28b   : > { %2188 = vmatpush1.msra.mxu0 %v2074_v23  ;;  %2637 = vmatpush1.msra.mxu1 %v2076_v4  ;;  %v2138_v17 = vld [vmem:[%s4271_s17 + $0x290] sm:$0xff]  ;;  %v2137_v32 = vld [vmem:[%s4271_s17 + $0x288] sm:$0xff]  ;;  %v2139_v36 = vld [vmem:[%s4271_s17 + $0x298] sm:$0xff] }
 0x28c   : > { %2189 = vmatprep.subr.mxu0 %v2072_v48  ;;  %2638 = vmatprep.subr.mxu1 %v3987_v10  ;;  %v2135_v28 = vld [vmem:[%s4271_s17 + $0x278] sm:$0xff]  ;;  %v2134_v63 = vld [vmem:[%s4271_s17 + $0x270] sm:$0xff]  ;;  %v2136_v19 = vld [vmem:[%s4271_s17 + $0x280] sm:$0xff] }
 0x28d   : > { %2190 = vmatpush1.msra.mxu0 %v2071_v27  ;;  %2639 = vmatpush1.msra.mxu1 %v2073_v35  ;;  %v2132_v31 = vld [vmem:[%s4271_s17 + $0x260] sm:$0xff]  ;;  %v2131_v15 = vld [vmem:[%s4271_s17 + $0x258] sm:$0xff]  ;;  %v2133_v24 = vld [vmem:[%s4271_s17 + $0x268] sm:$0xff] }
 0x28e   : > { %2191 = vmatprep.subr.mxu0 %v2069_v7  ;;  %2640 = vmatprep.subr.mxu1 %v3987_v10  ;;  %v2129_v13 = vld [vmem:[%s4271_s17 + $0x248] sm:$0xff]  ;;  %v2128_v38 = vld [vmem:[%s4271_s17 + $0x240] sm:$0xff]  ;;  %v2130_v54 = vld [vmem:[%s4271_s17 + $0x250] sm:$0xff] }
 0x28f   : > { %2192 = vmatpush1.msra.mxu0 %v2068_v57  ;;  %2641 = vmatpush1.msra.mxu1 %v2070_v39  ;;  %v2126_v46 = vld [vmem:[%s4271_s17 + $0x230] sm:$0xff]  ;;  %v2125_v0 = vld [vmem:[%s4271_s17 + $0x228] sm:$0xff]  ;;  %v2127_v42 = vld [vmem:[%s4271_s17 + $0x238] sm:$0xff] }
 0x290   : > { %2193 = vmatprep.subr.mxu0 %v2066_v59  ;;  %2642 = vmatprep.subr.mxu1 %v3987_v10  ;;  %v2123_v49 = vld [vmem:[%s4271_s17 + $0x218] sm:$0xff]  ;;  %v2122_v11 = vld [vmem:[%s4271_s17 + $0x210] sm:$0xff]  ;;  %v2124_v1 = vld [vmem:[%s4271_s17 + $0x220] sm:$0xff] }
 0x291   : > { %2194 = vmatpush1.msra.mxu0 %v2065_v9  ;;  %2643 = vmatpush1.msra.mxu1 %v2067_v8  ;;  %v2120_v16 = vld [vmem:[%s4271_s17 + $0x200] sm:$0xff]  ;;  %v2119_v37 = vld [vmem:[%s4271_s17 + $0x1f8] sm:$0xff]  ;;  %v2121_v40 = vld [vmem:[%s4271_s17 + $0x208] sm:$0xff] }
 0x292   : > { %2195 = vmatprep.subr.mxu0 %v2063_v30  ;;  %2644 = vmatprep.subr.mxu1 %v3987_v10  ;;  %v2117_v3 = vld [vmem:[%s4271_s17 + $0x1e8] sm:$0xff]  ;;  %v2116_v41 = vld [vmem:[%s4271_s17 + $0x1e0] sm:$0xff]  ;;  %v2118_v61 = vld [vmem:[%s4271_s17 + $0x1f0] sm:$0xff] }
 0x293   : > { %2196 = vmatpush1.msra.mxu0 %v2062_v50  ;;  %2645 = vmatpush1.msra.mxu1 %v2064_v47  ;;  %v2114_v14 = vld [vmem:[%s4271_s17 + $0x1d0] sm:$0xff]  ;;  %v2113_v26 = vld [vmem:[%s4271_s17 + $0x1c8] sm:$0xff]  ;;  %v2115_v44 = vld [vmem:[%s4271_s17 + $0x1d8] sm:$0xff] }
 0x294   : > { %2197 = vmatprep.subr.mxu0 %v2060_v25  ;;  %2646 = vmatprep.subr.mxu1 %v3987_v10  ;;  %v2111_v53 = vld [vmem:[%s4271_s17 + $0x1b8] sm:$0xff]  ;;  %v2110_v29 = vld [vmem:[%s4271_s17 + $0x1b0] sm:$0xff]  ;;  %v2112_v56 = vld [vmem:[%s4271_s17 + $0x1c0] sm:$0xff] }
 0x295   : > { %2198 = vmatpush1.msra.mxu0 %v2059_v58  ;;  %2647 = vmatpush1.msra.mxu1 %v2061_v6  ;;  %v2108_v22 = vld [vmem:[%s4271_s17 + $0x1a0] sm:$0xff]  ;;  %v2107_v23 = vld [vmem:[%s4271_s17 + $0x198] sm:$0xff]  ;;  %v2109_v4 = vld [vmem:[%s4271_s17 + $0x1a8] sm:$0xff] }
 0x296   : > { %2199 = vmatprep.subr.mxu0 %v2057_v21  ;;  %2648 = vmatprep.subr.mxu1 %v3987_v10  ;;  %v2105_v48 = vld [vmem:[%s4271_s17 + $0x188] sm:$0xff]  ;;  %v2104_v27 = vld [vmem:[%s4271_s17 + $0x180] sm:$0xff]  ;;  %v2106_v7 = vld [vmem:[%s4271_s17 + $0x190] sm:$0xff]  ;;  %s7075_s17 = smov %s7074_s28 }
 0x297   : > { %2200 = vmatpush1.msra.mxu0 %v2056_v43  ;;  %2649 = vmatpush1.msra.mxu1 %v2058_v18  ;;  %v1929_v35 = vld [vmem:[#allocation2 + $0x3b0] sm:$0xff]  ;;  %v1931_v39 = vld [vmem:[#allocation2 + $0x18] sm:$0xff]  ;;  %v1933_v9 = vld [vmem:[#allocation2 + $0x368] sm:$0xff] }
 0x298   : > { %2201 = vmatprep.subr.mxu0 %v2150_v62  ;;  %2650 = vmatprep.subr.mxu1 %v3987_v10  ;;  %v1928_v57 = vld [vmem:[#allocation2 + $0x2b0] sm:$0xff]  ;;  %v1930_v59 = vld [vmem:[#allocation2 + $0xd8] sm:$0xff]  ;;  %v1935_v30 = vld [vmem:[#allocation2 + $0x48] sm:$0xff] }
 0x299   : > { %2202 = vmatpush2.msra.mxu0 %v2149_v2  ;;  %2651 = vmatpush2.msra.mxu1 %v2151_v52  ;;  %v1932_v8 = vld [vmem:[#allocation2 + $0x50] sm:$0xff]  ;;  %v1936_v47 = vld [vmem:[#allocation2 + $0x380] sm:$0xff]  ;;  %v1939_v25 = vld [vmem:[#allocation2 + $0x98] sm:$0xff] }
 0x29a   : > { %2203 = vmatprep.subr.mxu0 %v2147_v20  ;;  %2652 = vmatprep.subr.mxu1 %v3987_v10  ;;  %v1937_v50 = vld [vmem:[#allocation2 + $0x110] sm:$0xff]  ;;  %v1938_v58 = vld [vmem:[#allocation2 + $0x118] sm:$0xff]  ;;  %v1940_v21 = vld [vmem:[#allocation2 + $0x320] sm:$0xff] }
 0x29b   : > { %2204 = vmatpush2.msra.mxu0 %v2146_v51  ;;  %2653 = vmatpush2.msra.mxu1 %v2148_v12  ;;  %v1941_v6 = vld [vmem:[#allocation2 + $0x150] sm:$0xff]  ;;  %v1943_v43 = vld [vmem:[#allocation2 + $0x60] sm:$0xff]  ;;  %v1942_v18 = vld [vmem:[#allocation2 + $0x108] sm:$0xff] }
 0x29c   : > { %2205 = vmatprep.subr.mxu0 %v2144_v45  ;;  %2654 = vmatprep.subr.mxu1 %v3987_v10  ;;  %v1945_v62 = vld [vmem:[#allocation2 + $0x388] sm:$0xff]  ;;  %v1944_v2 = vld [vmem:[#allocation2 + $0x2e0] sm:$0xff]  ;;  %v1946_v20 = vld [vmem:[#allocation2 + $0x338] sm:$0xff] }
 0x29d   : > { %2206 = vmatpush2.msra.mxu0 %v2143_v55  ;;  %2655 = vmatpush2.msra.mxu1 %v2145_v60  ;;  %v1947_v52 = vld [vmem:[#allocation2 + $0x340] sm:$0xff]  ;;  %v1949_v51 = vld [vmem:[#allocation2 + $0x1a8] sm:$0xff]  ;;  %v1950_v55 = vld [vmem:[#allocation2 + $0x1b8] sm:$0xff] }
 0x29e   : > { %2207 = vmatprep.subr.mxu0 %v2141_v33  ;;  %2656 = vmatprep.subr.mxu1 %v3987_v10  ;;  %v1948_v12 = vld [vmem:[#allocation2 + $0x80] sm:$0xff]  ;;  %v1951_v45 = vld [vmem:[#allocation2 + $0x168] sm:$0xff]  ;;  %v1953_v60 = vld [vmem:[#allocation2 + $0x2f8] sm:$0xff] }
 0x29f   : > { %2208 = vmatpush2.msra.mxu0 %v2140_v34  ;;  %2657 = vmatpush2.msra.mxu1 %v2142_v5  ;;  %v1952_v33 = vld [vmem:[#allocation2 + $0x3e8] sm:$0xff]  ;;  %v1954_v5 = vld [vmem:[#allocation2 + $0x290] sm:$0xff] }
 0x2a0   : > { %2209 = vmatprep.subr.mxu0 %v2138_v17  ;;  %2658 = vmatprep.subr.mxu1 %v3987_v10  ;;  %v1955_v34 = vld [vmem:[#allocation2 + $0x28] sm:$0xff]  ;;  %v1957_v17 = vld [vmem:[#allocation2 + $0xc0] sm:$0xff] }
 0x2a1   : > { %2210 = vmatpush2.msra.mxu0 %v2137_v32  ;;  %2659 = vmatpush2.msra.mxu1 %v2139_v36  ;;  %v1956_v32 = vld [vmem:[#allocation2 + $0x138] sm:$0xff]  ;;  %v1959_v36 = vld [vmem:[#allocation2 + $0x280] sm:$0xff] }
 0x2a2   : > { %2211 = vmatprep.subr.mxu0 %v2135_v28  ;;  %2660 = vmatprep.subr.mxu1 %v3987_v10  ;;  %v1958_v28 = vld [vmem:[#allocation2 + $0x1c0] sm:$0xff] }
 0x2a3   : > { %2212 = vmatpush2.msra.mxu0 %v2134_v63  ;;  %2661 = vmatpush2.msra.mxu1 %v2136_v19  ;;  %v1961_v63 = vld [vmem:[#allocation2 + $0x3c0] sm:$0xff] }
 0x2a4   : > { %2213 = vmatprep.subr.mxu0 %v2132_v31  ;;  %2662 = vmatprep.subr.mxu1 %v3987_v10  ;;  %v1960_v19 = vld [vmem:[#allocation2 + $0x100] sm:$0xff] }
 0x2a5   : > { %2214 = vmatpush2.msra.mxu0 %v2131_v15  ;;  %2663 = vmatpush2.msra.mxu1 %v2133_v24  ;;  %v1963_v31 = vld [vmem:[#allocation2 + $0x3e0] sm:$0xff]  ;;  %v1962_v15 = vld [vmem:[#allocation2 + $0x158] sm:$0xff] }
 0x2a6   : > { %2215 = vmatprep.subr.mxu0 %v2129_v13  ;;  %2664 = vmatprep.subr.mxu1 %v3987_v10  ;;  %v1965_v24 = vld [vmem:[#allocation2 + $0x3f8] sm:$0xff] }
 0x2a7   : > { %2216 = vmatpush2.msra.mxu0 %v2128_v38  ;;  %2665 = vmatpush2.msra.mxu1 %v2130_v54  ;;  %v1964_v13 = vld [vmem:[#allocation2 + $0x218] sm:$0xff]  ;;  %v1967_v38 = vld [vmem:[#allocation2 + $0x128] sm:$0xff] }
 0x2a8   : > { %2217 = vmatprep.subr.mxu0 %v2126_v46  ;;  %2666 = vmatprep.subr.mxu1 %v3987_v10  ;;  %v1966_v54 = vld [vmem:[#allocation2 + $0x8] sm:$0xff]  ;;  %v1969_v46 = vld [vmem:[#allocation2 + $0x3f0] sm:$0xff] }
 0x2a9   : > { %2218 = vmatpush2.msra.mxu0 %v2125_v0  ;;  %2667 = vmatpush2.msra.mxu1 %v2127_v42  ;;  %v1968_v0 = vld [vmem:[#allocation2 + $0x2a0] sm:$0xff] }
 0x2aa   : > { %2219 = vmatprep.subr.mxu0 %v2123_v49  ;;  %2668 = vmatprep.subr.mxu1 %v3987_v10  ;;  %v1971_v42 = vld [vmem:[#allocation2 + $0x2c0] sm:$0xff] }
 0x2ab   : > { %2220 = vmatpush2.msra.mxu0 %v2122_v11  ;;  %2669 = vmatpush2.msra.mxu1 %v2124_v1  ;;  %v1970_v49 = vld [vmem:[#allocation2 + $0xa0] sm:$0xff]  ;;  %v1972_v1 = vld [vmem:[#allocation2 + $0xb0] sm:$0xff] }
 0x2ac   : > { %2221 = vmatprep.subr.mxu0 %v2120_v16  ;;  %2670 = vmatprep.subr.mxu1 %v3987_v10  ;;  %v1973_v11 = vld [vmem:[#allocation2 + $0x1e0] sm:$0xff]  ;;  %v1975_v16 = vld [vmem:[#allocation2 + $0x10] sm:$0xff] }
 0x2ad   : > { %2222 = vmatpush2.msra.mxu0 %v2119_v37  ;;  %2671 = vmatpush2.msra.mxu1 %v2121_v40  ;;  %v1974_v37 = vld [vmem:[#allocation2 + $0x1f0] sm:$0xff]  ;;  %v1977_v40 = vld [vmem:[#allocation2 + $0x240] sm:$0xff] }
 0x2ae   : > { %2223 = vmatprep.subr.mxu0 %v2117_v3  ;;  %2672 = vmatprep.subr.mxu1 %v3987_v10  ;;  %v1976_v3 = vld [vmem:[#allocation2 + $0x230] sm:$0xff] }
 0x2af   : > { %2224 = vmatpush2.msra.mxu0 %v2116_v41  ;;  %2673 = vmatpush2.msra.mxu1 %v2118_v61  ;;  %v1979_v41 = vld [vmem:[#allocation2 + $0x3a0] sm:$0xff]  ;;  %v1978_v61 = vld [vmem:[#allocation2 + $0x90] sm:$0xff] }
 0x2b0   : > { %2225 = vmatprep.subr.mxu0 %v2114_v14  ;;  %2674 = vmatprep.subr.mxu1 %v3987_v10  ;;  %v1981_v14 = vld [vmem:[#allocation2 + $0xd0] sm:$0xff] }
 0x2b1   : > { %2226 = vmatpush2.msra.mxu0 %v2113_v26  ;;  %2675 = vmatpush2.msra.mxu1 %v2115_v44  ;;  %v1980_v26 = vld [vmem:[#allocation2 + $0x208] sm:$0xff]  ;;  %v1983_v44 = vld [vmem:[#allocation2 + $0x2f0] sm:$0xff] }
 0x2b2   : > { %2227 = vmatprep.subr.mxu0 %v2111_v53  ;;  %2676 = vmatprep.subr.mxu1 %v3987_v10  ;;  %v1982_v53 = vld [vmem:[#allocation2 + $0x88] sm:$0xff] }
 0x2b3   : > { %2228 = vmatpush2.msra.mxu0 %v2110_v29  ;;  %2677 = vmatpush2.msra.mxu1 %v2112_v56  ;;  %v1985_v29 = vld [vmem:[#allocation2 + $0x268] sm:$0xff]  ;;  %v1984_v56 = vld [vmem:[#allocation2 + $0x358] sm:$0xff] }
 0x2b4   : > { %2229 = vmatprep.subr.mxu0 %v2108_v22  ;;  %2678 = vmatprep.subr.mxu1 %v3987_v10  ;;  %v1987_v22 = vld [vmem:[#allocation2 + $0x188] sm:$0xff] }
 0x2b5   : > { %2230 = vmatpush2.msra.mxu0 %v2107_v23  ;;  %2679 = vmatpush2.msra.mxu1 %v2109_v4  ;;  %v1986_v23 = vld [vmem:[#allocation2 + $0x350] sm:$0xff] }
 0x2b6   : > { %2231 = vmatprep.subr.mxu0 %v2105_v48  ;;  %2680 = vmatprep.subr.mxu1 %v3987_v10  ;;  %v1934_v10 = vld [vmem:[#allocation2 + $0x330] sm:$0xff]  ;;  %v1988_v48 = vld [vmem:[#allocation2 + $0x1d8] sm:$0xff] }
 0x2b7   : > { %2232 = vmatpush2.msra.mxu0 %v2104_v27  ;;  %2233 = vmatprep.mubr.f32.mxu0 %v1929_v35  ;;  %v1989_v4 = vld [vmem:[#allocation2 + $0x30] sm:$0xff]  ;;  %v1991_v27 = vld [vmem:[#allocation2 + $0x2a8] sm:$0xff] }
 0x2b8   : > { %2681 = vmatpush2.msra.mxu1 %v2106_v7  ;;  %2682 = vmatprep.mubr.f32.mxu1 %v1929_v35  ;;  %v1990_v35 = vld [vmem:[#allocation2 + $0x140] sm:$0xff] }
 0x2b9   : > { %2234 = vmatmul.mubr.f32.vlgmr.msra.gmra.mxu0 %v1928_v57  ;;  %2683 = vmatmul.mubr.f32.vlgmr.msra.gmra.mxu1 %v1928_v57  ;;  %v1993_v7 = vld [vmem:[#allocation2 + $0x200] sm:$0xff]  ;;  %v1992_v57 = vld [vmem:[#allocation2 + $0x130] sm:$0xff] }
 0x2ba   : > { %2239 = vmatprep.mubr.f32.mxu0 %v1931_v39  ;;  %2687 = vmatprep.mubr.f32.mxu1 %v1931_v39  ;;  %v1995_v39 = vld [vmem:[#allocation2 + $0x220] sm:$0xff] }
 0x2bd   : > { %2240 = vmatmul.mubr.f32.gmra.mxu0 %v1930_v59  ;;  %2688 = vmatmul.mubr.f32.gmra.mxu1 %v1930_v59  ;;  %v1994_v59 = vld [vmem:[#allocation2 + $0x318] sm:$0xff] }
 0x2be   : > { %2245 = vmatprep.mubr.f32.mxu0 %v1933_v9  ;;  %2692 = vmatprep.mubr.f32.mxu1 %v1933_v9  ;;  %v1997_v9 = vld [vmem:[#allocation2 + $0x300] sm:$0xff] }
 0x2c1   : > { %2246 = vmatmul.mubr.f32.gmra.mxu0 %v1932_v8  ;;  %2693 = vmatmul.mubr.f32.gmra.mxu1 %v1932_v8  ;;  %v1996_v8 = vld [vmem:[#allocation2 + $0x70] sm:$0xff] }
 0x2c2   : > { %2251 = vmatprep.mubr.f32.mxu0 %v1935_v30  ;;  %2697 = vmatprep.mubr.f32.mxu1 %v1935_v30  ;;  %v1999_v30 = vld [vmem:[#allocation2 + $0x178] sm:$0xff] }
 0x2c5   : > { %2252 = vmatmul.mubr.f32.gmra.mxu0 %v1934_v10  ;;  %2698 = vmatmul.mubr.f32.gmra.mxu1 %v1934_v10  ;;  %v1998_v10 = vld [vmem:[#allocation2 + $0xe0] sm:$0xff] }
 0x2c6   : > { %2257 = vmatprep.mubr.f32.mxu0 %v1937_v50  ;;  %2702 = vmatprep.mubr.f32.mxu1 %v1937_v50  ;;  %v2001_v50 = vld [vmem:[#allocation2 + $0x260] sm:$0xff] }
 0x2c9   : > { %2258 = vmatmul.mubr.f32.gmra.mxu0 %v1936_v47  ;;  %2703 = vmatmul.mubr.f32.gmra.mxu1 %v1936_v47  ;;  %v2000_v47 = vld [vmem:[#allocation2 + $0x328] sm:$0xff] }
 0x2ca   : > { %2263 = vmatprep.mubr.f32.mxu0 %v1939_v25  ;;  %2707 = vmatprep.mubr.f32.mxu1 %v1939_v25  ;;  %v2003_v25 = vld [vmem:[#allocation2 + $0x2b8] sm:$0xff] }
 0x2cd   : > { %2264 = vmatmul.mubr.f32.gmra.mxu0 %v1938_v58  ;;  %2708 = vmatmul.mubr.f32.gmra.mxu1 %v1938_v58  ;;  %v2002_v58 = vld [vmem:[#allocation2 + $0x3b8] sm:$0xff] }
 0x2ce   : > { %2269 = vmatprep.mubr.f32.mxu0 %v1941_v6  ;;  %2712 = vmatprep.mubr.f32.mxu1 %v1941_v6  ;;  %v2005_v6 = vld [vmem:[#allocation2 + $0x40] sm:$0xff] }
 0x2d1   : > { %2270 = vmatmul.mubr.f32.gmra.mxu0 %v1940_v21  ;;  %2713 = vmatmul.mubr.f32.gmra.mxu1 %v1940_v21  ;;  %v2004_v21 = vld [vmem:[#allocation2 + $0x248] sm:$0xff] }
 0x2d2   : > { %2275 = vmatprep.mubr.f32.mxu0 %v1943_v43  ;;  %2717 = vmatprep.mubr.f32.mxu1 %v1943_v43  ;;  %v2007_v43 = vld [vmem:[#allocation2 + $0xe8] sm:$0xff] }
 0x2d5   : > { %2276 = vmatmul.mubr.f32.gmra.mxu0 %v1942_v18  ;;  %2718 = vmatmul.mubr.f32.gmra.mxu1 %v1942_v18  ;;  %v2006_v18 = vld [vmem:[#allocation2 + $0x20] sm:$0xff] }
 0x2d6   : > { %2281 = vmatprep.mubr.f32.mxu0 %v1945_v62  ;;  %2722 = vmatprep.mubr.f32.mxu1 %v1945_v62  ;;  %v2009_v62 = vld [vmem:[#allocation2 + $0x3a8] sm:$0xff] }
 0x2d9   : > { %2282 = vmatmul.mubr.f32.gmra.mxu0 %v1944_v2  ;;  %2723 = vmatmul.mubr.f32.gmra.mxu1 %v1944_v2  ;;  %v2008_v2 = vld [vmem:[#allocation2 + $0x288] sm:$0xff] }
 0x2da   : > { %2287 = vmatprep.mubr.f32.mxu0 %v1947_v52  ;;  %2727 = vmatprep.mubr.f32.mxu1 %v1947_v52  ;;  %v2011_v52 = vld [vmem:[#allocation2 + $0x160] sm:$0xff] }
 0x2dd   : > { %2288 = vmatmul.mubr.f32.gmra.mxu0 %v1946_v20  ;;  %2728 = vmatmul.mubr.f32.gmra.mxu1 %v1946_v20  ;;  %v2010_v20 = vld [vmem:[#allocation2 + $0x3c8] sm:$0xff] }
 0x2de   : > { %2293 = vmatprep.mubr.f32.mxu0 %v1949_v51  ;;  %2732 = vmatprep.mubr.f32.mxu1 %v1949_v51  ;;  %v2013_v51 = vld [vmem:[#allocation2 + $0x210] sm:$0xff] }
 0x2e1   : > { %2294 = vmatmul.mubr.f32.gmra.mxu0 %v1948_v12  ;;  %2733 = vmatmul.mubr.f32.gmra.mxu1 %v1948_v12  ;;  %v2012_v12 = vld [vmem:[#allocation2 + $0x2c8] sm:$0xff] }
 0x2e2   : > { %2299 = vmatprep.mubr.f32.mxu0 %v1951_v45  ;;  %2737 = vmatprep.mubr.f32.mxu1 %v1951_v45  ;;  %v2015_v45 = vld [vmem:[#allocation2 + $0x1e8] sm:$0xff] }
 0x2e5   : > { %2300 = vmatmul.mubr.f32.gmra.mxu0 %v1950_v55  ;;  %2738 = vmatmul.mubr.f32.gmra.mxu1 %v1950_v55  ;;  %v2014_v55 = vld [vmem:[#allocation2 + $0x3d8] sm:$0xff] }
 0x2e6   : > { %2305 = vmatprep.mubr.f32.mxu0 %v1953_v60  ;;  %2742 = vmatprep.mubr.f32.mxu1 %v1953_v60  ;;  %v2017_v60 = vld [vmem:[#allocation2 + $0x1c8] sm:$0xff] }
 0x2e9   : > { %2306 = vmatmul.mubr.f32.gmra.mxu0 %v1952_v33  ;;  %2743 = vmatmul.mubr.f32.gmra.mxu1 %v1952_v33  ;;  %v2016_v33 = vld [vmem:[#allocation2 + $0x1b0] sm:$0xff] }
 0x2ea   : > { %2311 = vmatprep.mubr.f32.mxu0 %v1955_v34  ;;  %2747 = vmatprep.mubr.f32.mxu1 %v1955_v34  ;;  %v2019_v34 = vld [vmem:[#allocation2 + $0x1d0] sm:$0xff] }
 0x2ed   : > { %2312 = vmatmul.mubr.f32.gmra.mxu0 %v1954_v5  ;;  %2748 = vmatmul.mubr.f32.gmra.mxu1 %v1954_v5  ;;  %v2018_v5 = vld [vmem:[#allocation2 + $0x2d0] sm:$0xff] }
 0x2ee   : > { %2317 = vmatprep.mubr.f32.mxu0 %v1957_v17  ;;  %2752 = vmatprep.mubr.f32.mxu1 %v1957_v17  ;;  %v2154_v17 = vlaneseq }
 0x2f1   : > { %2318 = vmatmul.mubr.f32.gmra.mxu0 %v1956_v32  ;;  %2753 = vmatmul.mubr.f32.gmra.mxu1 %v1956_v32  ;;  %v2021_v32 = vld [vmem:[#allocation2 + $0x120] sm:$0xff] }
 0x2f2   : > { %2323 = vmatprep.mubr.f32.mxu0 %v1959_v36  ;;  %2757 = vmatprep.mubr.f32.mxu1 %v1959_v36  ;;  %v2020_v36 = vld [vmem:[#allocation2 + $0x58] sm:$0xff] }
 0x2f5   : > { %2324 = vmatmul.mubr.f32.gmra.mxu0 %v1958_v28  ;;  %2758 = vmatmul.mubr.f32.gmra.mxu1 %v1958_v28  ;;  %v2155_v28 = vshrl.u32 %v2154_v17, 7 }
 0x2f6   : > { %2329 = vmatprep.mubr.f32.mxu0 %v1961_v63  ;;  %2762 = vmatprep.mubr.f32.mxu1 %v1961_v63  ;;  %v2023_v63 = vld [vmem:[#allocation2 + $0x2e8] sm:$0xff] }
 0x2f9   : > { %2330 = vmatmul.mubr.f32.gmra.mxu0 %v1960_v19  ;;  %2763 = vmatmul.mubr.f32.gmra.mxu1 %v1960_v19  ;;  %v2022_v19 = vld [vmem:[#allocation2 + $0x198] sm:$0xff] }
 0x2fa   : > { %2335 = vmatprep.mubr.f32.mxu0 %v1963_v31  ;;  %2767 = vmatprep.mubr.f32.mxu1 %v1963_v31  ;;  %v2156_v31 = vsub.s32 0, %v2155_v28 }
 0x2fd   : > { %2336 = vmatmul.mubr.f32.gmra.mxu0 %v1962_v15  ;;  %2768 = vmatmul.mubr.f32.gmra.mxu1 %v1962_v15  ;;  %v2164_v15 = vsub.s32 2, %v2155_v28 }
 0x2fe   : > { %2341 = vmatprep.mubr.f32.mxu0 %v1965_v24  ;;  %2772 = vmatprep.mubr.f32.mxu1 %v1965_v24  ;;  %v2025_v24 = vld [vmem:[#allocation2 + $0x238] sm:$0xff] }
 0x301   : > { %2342 = vmatmul.mubr.f32.gmra.mxu0 %v1964_v13  ;;  %2773 = vmatmul.mubr.f32.gmra.mxu1 %v1964_v13  ;;  %v2152_v13 = vld [vmem:[%s321_s8] sm:$0x7]  ;;  %s3988_s8 = smov [#allocation12]  }
 0x302   : > { %2347 = vmatprep.mubr.f32.mxu0 %v1967_v38  ;;  %2777 = vmatprep.mubr.f32.mxu1 %v1967_v38  ;;  %v2160_v38 = vsub.s32 1, %v2155_v28  ;;  %s3827_s22 = sshll.u32 %s3988_s8, 4  ;;  %s3828_s22 = int_to_ptr.vmem [resolvable:$false] %s3827_s22 }
 0x303   : > { %s3829_s10 = scalar_lea.vmem %s3828_s22, 49152  ;;  %p3830_p3 = scmp.lt.s32.totalorder %s6420_s16, %s3828_s22 }
 0x304   : > { %p3831_p11 = scmp.lt.s32.totalorder %s3829_s10, %s3823_s3 }
 0x305   : > { %2348 = vmatmul.mubr.f32.gmra.mxu0 %v1966_v54  ;;  %2778 = vmatmul.mubr.f32.gmra.mxu1 %v1966_v54  ;;  %v6026_v54 = vrot.slane %v2152_v13, %v2156_v31 }
 0x306   : > { %2353 = vmatprep.mubr.f32.mxu0 %v1969_v46  ;;  %2782 = vmatprep.mubr.f32.mxu1 %v1969_v46  ;;  %v2024_v46 = vld [vmem:[#allocation2 + $0x1f8] sm:$0xff]  ;;  %p3832_p13 = por %p3831_p11, %p3830_p3 }
 0x308   : > { %p3833_p2 = pnand %p3832_p13, %p3826_p12 }
 0x309   : > { %2354 = vmatmul.mubr.f32.gmra.mxu0 %v1968_v0  ;;  %2783 = vmatmul.mubr.f32.gmra.mxu1 %v1968_v0  ;;  %v6028_v0 = vrot.slane %v2152_v13, %v2164_v15 }
 0x30a   : > { %2359 = vmatprep.mubr.f32.mxu0 %v1971_v42  ;;  %2787 = vmatprep.mubr.f32.mxu1 %v1971_v42  ;;  %v2027_v42 = vld [vmem:[#allocation2 + $0x390] sm:$0xff] }
 0x30d   : > { %2360 = vmatmul.mubr.f32.gmra.mxu0 %v1970_v49  ;;  %2788 = vmatmul.mubr.f32.gmra.mxu1 %v1970_v49  ;;  %v6030_v49 = vrot.slane %v2152_v13, %v2160_v38  ;;  %v2038_v38 = vld [vmem:[#allocation2 + $0xb8] sm:$0xff] }
 0x30e   : > { %2365 = vmatprep.mubr.f32.mxu0 %v1973_v11  ;;  %2792 = vmatprep.mubr.f32.mxu1 %v1973_v11 }
 0x311   : > { %2366 = vmatmul.mubr.f32.gmra.mxu0 %v1972_v1  ;;  %2793 = vmatmul.mubr.f32.gmra.mxu1 %v1972_v1 }
 0x312   : > { %2371 = vmatprep.mubr.f32.mxu0 %v1975_v16  ;;  %2797 = vmatprep.mubr.f32.mxu1 %v1975_v16 }
 0x315   : > { %2372 = vmatmul.mubr.f32.gmra.mxu0 %v1974_v37  ;;  %2798 = vmatmul.mubr.f32.gmra.mxu1 %v1974_v37 }
 0x316   : > { %2377 = vmatprep.mubr.f32.mxu0 %v1977_v40  ;;  %2802 = vmatprep.mubr.f32.mxu1 %v1977_v40  ;;  %v2026_v40 = vld [vmem:[#allocation2 + $0x398] sm:$0xff] }
 0x319   : > { %2378 = vmatmul.mubr.f32.gmra.mxu0 %v1976_v3  ;;  %2803 = vmatmul.mubr.f32.gmra.mxu1 %v1976_v3 }
 0x31a   : > { %2383 = vmatprep.mubr.f32.mxu0 %v1979_v41  ;;  %2807 = vmatprep.mubr.f32.mxu1 %v1979_v41 }
 0x31d   : > { %2384 = vmatmul.mubr.f32.gmra.mxu0 %v1978_v61  ;;  %2808 = vmatmul.mubr.f32.gmra.mxu1 %v1978_v61  ;;  %v2029_v61 = vld [vmem:[#allocation2 + $0xa8] sm:$0xff] }
 0x31e   : > { %2389 = vmatprep.mubr.f32.mxu0 %v1981_v14  ;;  %2812 = vmatprep.mubr.f32.mxu1 %v1981_v14 }
 0x321   : > { %2390 = vmatmul.mubr.f32.gmra.mxu0 %v1980_v26  ;;  %2813 = vmatmul.mubr.f32.gmra.mxu1 %v1980_v26 }
 0x322   : > { %2395 = vmatprep.mubr.f32.mxu0 %v1983_v44  ;;  %2817 = vmatprep.mubr.f32.mxu1 %v1983_v44 }
 0x325   : > { %2396 = vmatmul.mubr.f32.gmra.mxu0 %v1982_v53  ;;  %2818 = vmatmul.mubr.f32.gmra.mxu1 %v1982_v53 }
 0x326   : > { %2401 = vmatprep.mubr.f32.mxu0 %v1985_v29  ;;  %2822 = vmatprep.mubr.f32.mxu1 %v1985_v29 }
 0x329   : > { %2402 = vmatmul.mubr.f32.gmra.mxu0 %v1984_v56  ;;  %2823 = vmatmul.mubr.f32.gmra.mxu1 %v1984_v56  ;;  %v2028_v56 = vld [vmem:[#allocation2 + $0x1a0] sm:$0xff] }
 0x32a   : > { %2407 = vmatprep.mubr.f32.mxu0 %v1987_v22  ;;  %2827 = vmatprep.mubr.f32.mxu1 %v1987_v22 }
 0x32d   : > { %2408 = vmatmul.mubr.f32.gmra.mxu0 %v1986_v23  ;;  %2828 = vmatmul.mubr.f32.gmra.mxu1 %v1986_v23 }
 0x32e   : > { %2413 = vmatprep.mubr.f32.mxu0 %v1989_v4  ;;  %2832 = vmatprep.mubr.f32.mxu1 %v1989_v4  ;;  %v2031_v4 = vld [vmem:[#allocation2 + $0x2d8] sm:$0xff] }
 0x331   : > { %2414 = vmatmul.mubr.f32.gmra.mxu0 %v1988_v48  ;;  %2833 = vmatmul.mubr.f32.gmra.mxu1 %v1988_v48 }
 0x332   : > { %2419 = vmatprep.mubr.f32.mxu0 %v1991_v27  ;;  %2837 = vmatprep.mubr.f32.mxu1 %v1991_v27 }
 0x335   : > { %2420 = vmatmul.mubr.f32.gmra.mxu0 %v1990_v35  ;;  %2838 = vmatmul.mubr.f32.gmra.mxu1 %v1990_v35 }
 0x336   : > { %2425 = vmatprep.mubr.f32.mxu0 %v1993_v7  ;;  %2842 = vmatprep.mubr.f32.mxu1 %v1993_v7 }
 0x339   : > { %2426 = vmatmul.mubr.f32.gmra.mxu0 %v1992_v57  ;;  %2843 = vmatmul.mubr.f32.gmra.mxu1 %v1992_v57 }
 0x33a   : > { %2431 = vmatprep.mubr.f32.mxu0 %v1995_v39  ;;  %2847 = vmatprep.mubr.f32.mxu1 %v1995_v39  ;;  %v2030_v39 = vld [vmem:[#allocation2 + $0x258] sm:$0xff] }
 0x33d   : > { %2432 = vmatmul.mubr.f32.gmra.mxu0 %v1994_v59  ;;  %2848 = vmatmul.mubr.f32.gmra.mxu1 %v1994_v59 }
 0x33e   : > { %2437 = vmatprep.mubr.f32.mxu0 %v1997_v9  ;;  %2852 = vmatprep.mubr.f32.mxu1 %v1997_v9 }
 0x341   : > { %2438 = vmatmul.mubr.f32.gmra.mxu0 %v1996_v8  ;;  %2853 = vmatmul.mubr.f32.gmra.mxu1 %v1996_v8  ;;  %v2033_v8 = vld [vmem:[#allocation2 + $0x180] sm:$0xff] }
 0x342   : > { %2443 = vmatprep.mubr.f32.mxu0 %v1999_v30  ;;  %2857 = vmatprep.mubr.f32.mxu1 %v1999_v30 }
 0x345   : > { %2444 = vmatmul.mubr.f32.gmra.mxu0 %v1998_v10  ;;  %2858 = vmatmul.mubr.f32.gmra.mxu1 %v1998_v10 }
 0x346   : > { %2449 = vmatprep.mubr.f32.mxu0 %v2001_v50  ;;  %2862 = vmatprep.mubr.f32.mxu1 %v2001_v50 }
 0x349   : > { %2450 = vmatmul.mubr.f32.gmra.mxu0 %v2000_v47  ;;  %2863 = vmatmul.mubr.f32.gmra.mxu1 %v2000_v47 }
 0x34a   : > { %2455 = vmatprep.mubr.f32.mxu0 %v2003_v25  ;;  %2867 = vmatprep.mubr.f32.mxu1 %v2003_v25 }
 0x34d   : > { %2456 = vmatmul.mubr.f32.gmra.mxu0 %v2002_v58  ;;  %2868 = vmatmul.mubr.f32.gmra.mxu1 %v2002_v58  ;;  %v2032_v58 = vld [vmem:[#allocation2 + $0xf0] sm:$0xff] }
 0x34e   : > { %2461 = vmatprep.mubr.f32.mxu0 %v2005_v6  ;;  %2872 = vmatprep.mubr.f32.mxu1 %v2005_v6 }
 0x351   : > { %2462 = vmatmul.mubr.f32.gmra.mxu0 %v2004_v21  ;;  %2873 = vmatmul.mubr.f32.gmra.mxu1 %v2004_v21 }
 0x352   : > { %2467 = vmatprep.mubr.f32.mxu0 %v2007_v43  ;;  %2877 = vmatprep.mubr.f32.mxu1 %v2007_v43  ;;  %v2035_v43 = vld [vmem:[#allocation2 + $0x3d0] sm:$0xff] }
 0x355   : > { %2468 = vmatmul.mubr.f32.gmra.mxu0 %v2006_v18  ;;  %2878 = vmatmul.mubr.f32.gmra.mxu1 %v2006_v18 }
 0x356   : > { %2473 = vmatprep.mubr.f32.mxu0 %v2009_v62  ;;  %2882 = vmatprep.mubr.f32.mxu1 %v2009_v62 }
 0x359   : > { %2474 = vmatmul.mubr.f32.gmra.mxu0 %v2008_v2  ;;  %2883 = vmatmul.mubr.f32.gmra.mxu1 %v2008_v2 }
 0x35a   : > { %2479 = vmatprep.mubr.f32.mxu0 %v2011_v52  ;;  %2887 = vmatprep.mubr.f32.mxu1 %v2011_v52 }
 0x35d   : > { %2480 = vmatmul.mubr.f32.gmra.mxu0 %v2010_v20  ;;  %2888 = vmatmul.mubr.f32.gmra.mxu1 %v2010_v20 }
 0x35e   : > { %2485 = vmatprep.mubr.f32.mxu0 %v2013_v51  ;;  %2892 = vmatprep.mubr.f32.mxu1 %v2013_v51  ;;  %v2034_v51 = vld [vmem:[#allocation2 + $0x170] sm:$0xff] }
 0x361   : > { %2486 = vmatmul.mubr.f32.gmra.mxu0 %v2012_v12  ;;  %2893 = vmatmul.mubr.f32.gmra.mxu1 %v2012_v12 }
 0x362   : > { %2491 = vmatprep.mubr.f32.mxu0 %v2015_v45  ;;  %2897 = vmatprep.mubr.f32.mxu1 %v2015_v45 }
 0x365   : > { %2492 = vmatmul.mubr.f32.gmra.mxu0 %v2014_v55  ;;  %2898 = vmatmul.mubr.f32.gmra.mxu1 %v2014_v55  ;;  %v2037_v55 = vld [vmem:[#allocation2 + $0x378] sm:$0xff] }
 0x366   : > { %2497 = vmatprep.mubr.f32.mxu0 %v2017_v60  ;;  %2902 = vmatprep.mubr.f32.mxu1 %v2017_v60 }
 0x369   : > { %2498 = vmatmul.mubr.f32.gmra.mxu0 %v2016_v33  ;;  %2903 = vmatmul.mubr.f32.gmra.mxu1 %v2016_v33 }
 0x36a   : > { %2503 = vmatprep.mubr.f32.mxu0 %v2019_v34  ;;  %2907 = vmatprep.mubr.f32.mxu1 %v2019_v34 }
 0x36d   : > { %2504 = vmatmul.mubr.f32.gmra.mxu0 %v2018_v5  ;;  %2908 = vmatmul.mubr.f32.gmra.mxu1 %v2018_v5 }
 0x36e   : > { %2509 = vmatprep.mubr.f32.mxu0 %v2021_v32  ;;  %2912 = vmatprep.mubr.f32.mxu1 %v2021_v32  ;;  %v2036_v32 = vld [vmem:[#allocation2 + $0x250] sm:$0xff] }
 0x371   : > { %2510 = vmatmul.mubr.f32.gmra.mxu0 %v2020_v36  ;;  %2913 = vmatmul.mubr.f32.gmra.mxu1 %v2020_v36 }
 0x372   : > { %2515 = vmatprep.mubr.f32.mxu0 %v2023_v63  ;;  %2917 = vmatprep.mubr.f32.mxu1 %v2023_v63  ;;  %v2039_v63 = vld [vmem:[#allocation2 + $0x38] sm:$0xff] }
 0x375   : > { %2516 = vmatmul.mubr.f32.gmra.mxu0 %v2022_v19  ;;  %2918 = vmatmul.mubr.f32.gmra.mxu1 %v2022_v19 }
 0x376   : > { %2521 = vmatprep.mubr.f32.mxu0 %v2025_v24  ;;  %2922 = vmatprep.mubr.f32.mxu1 %v2025_v24 }
 0x379   : > { %v2235_v11 = vpop.f32.mrf.mxu0  ;;  %2522 = vmatmul.mubr.f32.gmra.mxu0 %v2024_v46  ;;  %v2684_v1 = vpop.f32.mrf.mxu1  ;;  %2923 = vmatmul.mubr.f32.gmra.mxu1 %v2024_v46 }
 0x37a   : > { %v2236_v16 = vadd.f32 %v2235_v11, %v6026_v54  ;;  %v2685_v37 = vadd.f32 %v2684_v1, %v6028_v0  ;;  %2527 = vmatprep.mubr.f32.mxu0 %v2027_v42  ;;  %2927 = vmatprep.mubr.f32.mxu1 %v2027_v42  ;;  %v2041_v11 = vld [vmem:[#allocation2 + $0x308] sm:$0xff] }
 0x37b   : > { %v2237_v3 = vpop.f32.mrf.mxu0  ;;  %v2686_v41 = vpop.f32.mrf.mxu1 }
 0x37c   : > { %3003 = vst [vmem:[%s4283_s12] sm:$0xff] %v2236_v16  ;;  %3005 = vst [vmem:[%s4283_s12 + $0x10] sm:$0xff] %v2685_v37  ;;  %v2238_v14 = vadd.f32 %v2237_v3, %v6030_v49  ;;  %v2040_v41 = vld [vmem:[#allocation2 + $0x78] sm:$0xff] }
 0x37d   : > { %v2241_v26 = vpop.f32.mrf.mxu0  ;;  %2528 = vmatmul.mubr.f32.gmra.mxu0 %v2026_v40  ;;  %v2689_v44 = vpop.f32.mrf.mxu1  ;;  %2928 = vmatmul.mubr.f32.gmra.mxu1 %v2026_v40 }
 0x37e   : > { %3004 = vst [vmem:[%s4283_s12 + $0x8] sm:$0xff] %v2238_v14  ;;  %v2242_v53 = vadd.f32 %v2241_v26, %v6026_v54  ;;  %v2690_v29 = vadd.f32 %v2689_v44, %v6028_v0  ;;  %2533 = vmatprep.mubr.f32.mxu0 %v2029_v61  ;;  %2932 = vmatprep.mubr.f32.mxu1 %v2029_v61  ;;  %v2043_v26 = vld [vmem:[#allocation2 + $0xc8] sm:$0xff] }
 0x37f   : > { %v2243_v22 = vpop.f32.mrf.mxu0  ;;  %v2691_v23 = vpop.f32.mrf.mxu1 }
 0x380   : > { %3006 = vst [vmem:[%s4283_s12 + $0x18] sm:$0xff] %v2242_v53  ;;  %3008 = vst [vmem:[%s4283_s12 + $0x28] sm:$0xff] %v2690_v29  ;;  %v2244_v48 = vadd.f32 %v2243_v22, %v6030_v49  ;;  %v2042_v23 = vld [vmem:[#allocation2 + $0x370] sm:$0xff] }
 0x381   : > { %v2247_v27 = vpop.f32.mrf.mxu0  ;;  %2534 = vmatmul.mubr.f32.gmra.mxu0 %v2028_v56  ;;  %v2694_v35 = vpop.f32.mrf.mxu1  ;;  %2933 = vmatmul.mubr.f32.gmra.mxu1 %v2028_v56 }
 0x382   : > { %3007 = vst [vmem:[%s4283_s12 + $0x20] sm:$0xff] %v2244_v48  ;;  %v2248_v7 = vadd.f32 %v2247_v27, %v6026_v54  ;;  %v2695_v57 = vadd.f32 %v2694_v35, %v6028_v0  ;;  %2539 = vmatprep.mubr.f32.mxu0 %v2031_v4  ;;  %2937 = vmatprep.mubr.f32.mxu1 %v2031_v4  ;;  %v2045_v27 = vld [vmem:[#allocation2 + $0x360] sm:$0xff] }
 0x383   : > { %v2249_v59 = vpop.f32.mrf.mxu0  ;;  %v2696_v9 = vpop.f32.mrf.mxu1 }
 0x384   : > { %3009 = vst [vmem:[%s4283_s12 + $0x30] sm:$0xff] %v2248_v7  ;;  %3011 = vst [vmem:[%s4283_s12 + $0x40] sm:$0xff] %v2695_v57  ;;  %v2250_v30 = vadd.f32 %v2249_v59, %v6030_v49  ;;  %v2044_v9 = vld [vmem:[#allocation2 + $0x278] sm:$0xff] }
 0x385   : > { %v2253_v10 = vpop.f32.mrf.mxu0  ;;  %2540 = vmatmul.mubr.f32.gmra.mxu0 %v2030_v39  ;;  %v2699_v50 = vpop.f32.mrf.mxu1  ;;  %2938 = vmatmul.mubr.f32.gmra.mxu1 %v2030_v39 }
 0x386   : > { %3010 = vst [vmem:[%s4283_s12 + $0x38] sm:$0xff] %v2250_v30  ;;  %v2254_v47 = vadd.f32 %v2253_v10, %v6026_v54  ;;  %v2700_v25 = vadd.f32 %v2699_v50, %v6028_v0  ;;  %2545 = vmatprep.mubr.f32.mxu0 %v2033_v8  ;;  %2942 = vmatprep.mubr.f32.mxu1 %v2033_v8  ;;  %v2047_v10 = vld [vmem:[#allocation2 + $0x348] sm:$0xff] }
 0x387   : > { %v2255_v6 = vpop.f32.mrf.mxu0  ;;  %v2701_v21 = vpop.f32.mrf.mxu1 }
 0x388   : > { %3012 = vst [vmem:[%s4283_s12 + $0x48] sm:$0xff] %v2254_v47  ;;  %3014 = vst [vmem:[%s4283_s12 + $0x58] sm:$0xff] %v2700_v25  ;;  %v2256_v18 = vadd.f32 %v2255_v6, %v6030_v49  ;;  %v2046_v21 = vld [vmem:[#allocation2 + $0x228] sm:$0xff] }
 0x389   : > { %v2259_v62 = vpop.f32.mrf.mxu0  ;;  %2546 = vmatmul.mubr.f32.gmra.mxu0 %v2032_v58  ;;  %v2704_v2 = vpop.f32.mrf.mxu1  ;;  %2943 = vmatmul.mubr.f32.gmra.mxu1 %v2032_v58 }
 0x38a   : > { %3013 = vst [vmem:[%s4283_s12 + $0x50] sm:$0xff] %v2256_v18  ;;  %v2260_v52 = vadd.f32 %v2259_v62, %v6026_v54  ;;  %v2705_v20 = vadd.f32 %v2704_v2, %v6028_v0  ;;  %2551 = vmatprep.mubr.f32.mxu0 %v2035_v43  ;;  %2947 = vmatprep.mubr.f32.mxu1 %v2035_v43  ;;  %v2049_v62 = vld [vmem:[#allocation2 + $0xf8] sm:$0xff] }
 0x38b   : > { %v2261_v12 = vpop.f32.mrf.mxu0  ;;  %v2706_v45 = vpop.f32.mrf.mxu1 }
 0x38c   : > { %3015 = vst [vmem:[%s4283_s12 + $0x60] sm:$0xff] %v2260_v52  ;;  %3017 = vst [vmem:[%s4283_s12 + $0x70] sm:$0xff] %v2705_v20  ;;  %v2262_v60 = vadd.f32 %v2261_v12, %v6030_v49  ;;  %v2048_v45 = vld [vmem:[#allocation2 + $0x148] sm:$0xff] }
 0x38d   : > { %v2265_v33 = vpop.f32.mrf.mxu0  ;;  %2552 = vmatmul.mubr.f32.gmra.mxu0 %v2034_v51  ;;  %v2709_v34 = vpop.f32.mrf.mxu1  ;;  %2948 = vmatmul.mubr.f32.gmra.mxu1 %v2034_v51 }
 0x38e   : > { %3016 = vst [vmem:[%s4283_s12 + $0x68] sm:$0xff] %v2262_v60  ;;  %v2266_v5 = vadd.f32 %v2265_v33, %v6026_v54  ;;  %v2710_v17 = vadd.f32 %v2709_v34, %v6028_v0  ;;  %2557 = vmatprep.mubr.f32.mxu0 %v2037_v55  ;;  %2952 = vmatprep.mubr.f32.mxu1 %v2037_v55  ;;  %v2051_v33 = vld [vmem:[#allocation2] sm:$0xff] }
 0x38f   : > { %v2267_v36 = vpop.f32.mrf.mxu0  ;;  %v2711_v28 = vpop.f32.mrf.mxu1 }
 0x390   : > { %3018 = vst [vmem:[%s4283_s12 + $0x78] sm:$0xff] %v2266_v5  ;;  %3020 = vst [vmem:[%s4283_s12 + $0x88] sm:$0xff] %v2710_v17  ;;  %v2268_v19 = vadd.f32 %v2267_v36, %v6030_v49  ;;  %v2050_v28 = vld [vmem:[#allocation2 + $0x68] sm:$0xff] }
 0x391   : > { %v2271_v31 = vpop.f32.mrf.mxu0  ;;  %2558 = vmatmul.mubr.f32.gmra.mxu0 %v2036_v32  ;;  %v2714_v15 = vpop.f32.mrf.mxu1  ;;  %2953 = vmatmul.mubr.f32.gmra.mxu1 %v2036_v32 }
 0x392   : > { %3019 = vst [vmem:[%s4283_s12 + $0x80] sm:$0xff] %v2268_v19  ;;  %v2272_v24 = vadd.f32 %v2271_v31, %v6026_v54  ;;  %v2715_v13 = vadd.f32 %v2714_v15, %v6028_v0  ;;  %2563 = vmatprep.mubr.f32.mxu0 %v2039_v63  ;;  %2957 = vmatprep.mubr.f32.mxu1 %v2039_v63  ;;  %v2053_v31 = vld [vmem:[#allocation2 + $0x270] sm:$0xff] }
 0x393   : > { %v2273_v46 = vpop.f32.mrf.mxu0  ;;  %v2716_v42 = vpop.f32.mrf.mxu1 }
 0x394   : > { %3021 = vst [vmem:[%s4283_s12 + $0x90] sm:$0xff] %v2272_v24  ;;  %3023 = vst [vmem:[%s4283_s12 + $0xa0] sm:$0xff] %v2715_v13  ;;  %v2274_v1 = vadd.f32 %v2273_v46, %v6030_v49  ;;  %v2052_v42 = vld [vmem:[#allocation2 + $0x298] sm:$0xff] }
 0x395   : > { %v2277_v16 = vpop.f32.mrf.mxu0  ;;  %2564 = vmatmul.mubr.f32.gmra.mxu0 %v2038_v38  ;;  %v2719_v37 = vpop.f32.mrf.mxu1  ;;  %2958 = vmatmul.mubr.f32.gmra.mxu1 %v2038_v38 }
 0x396   : > { %3022 = vst [vmem:[%s4283_s12 + $0x98] sm:$0xff] %v2274_v1  ;;  %v2278_v40 = vadd.f32 %v2277_v16, %v6026_v54  ;;  %v2720_v3 = vadd.f32 %v2719_v37, %v6028_v0  ;;  %2569 = vmatprep.mubr.f32.mxu0 %v2041_v11  ;;  %2962 = vmatprep.mubr.f32.mxu1 %v2041_v11  ;;  %v2055_v16 = vld [vmem:[#allocation2 + $0x190] sm:$0xff] }
 0x397   : > { %v2279_v61 = vpop.f32.mrf.mxu0  ;;  %v2721_v14 = vpop.f32.mrf.mxu1 }
 0x398   : > { %3024 = vst [vmem:[%s4283_s12 + $0xa8] sm:$0xff] %v2278_v40  ;;  %3026 = vst [vmem:[%s4283_s12 + $0xb8] sm:$0xff] %v2720_v3  ;;  %v2280_v44 = vadd.f32 %v2279_v61, %v6030_v49  ;;  %v2054_v14 = vld [vmem:[#allocation2 + $0x310] sm:$0xff] }
 0x399   : > { %v2283_v53 = vpop.f32.mrf.mxu0  ;;  %2570 = vmatmul.mubr.f32.gmra.mxu0 %v2040_v41  ;;  %v2724_v29 = vpop.f32.mrf.mxu1  ;;  %2963 = vmatmul.mubr.f32.gmra.mxu1 %v2040_v41 }
 0x39a   : > { %3025 = vst [vmem:[%s4283_s12 + $0xb0] sm:$0xff] %v2280_v44  ;;  %v2284_v56 = vadd.f32 %v2283_v53, %v6026_v54  ;;  %v2725_v22 = vadd.f32 %v2724_v29, %v6028_v0  ;;  %2575 = vmatprep.mubr.f32.mxu0 %v2043_v26  ;;  %2967 = vmatprep.mubr.f32.mxu1 %v2043_v26 }
 0x39b   : > { %v2285_v4 = vpop.f32.mrf.mxu0  ;;  %v2726_v48 = vpop.f32.mrf.mxu1 }
 0x39c   : > { %3027 = vst [vmem:[%s4283_s12 + $0xc0] sm:$0xff] %v2284_v56  ;;  %3029 = vst [vmem:[%s4283_s12 + $0xd0] sm:$0xff] %v2725_v22  ;;  %v2286_v35 = vadd.f32 %v2285_v4, %v6030_v49 }
 0x39d   : > { %v2289_v7 = vpop.f32.mrf.mxu0  ;;  %2576 = vmatmul.mubr.f32.gmra.mxu0 %v2042_v23  ;;  %v2729_v57 = vpop.f32.mrf.mxu1  ;;  %2968 = vmatmul.mubr.f32.gmra.mxu1 %v2042_v23 }
 0x39e   : > { %3028 = vst [vmem:[%s4283_s12 + $0xc8] sm:$0xff] %v2286_v35  ;;  %v2290_v39 = vadd.f32 %v2289_v7, %v6026_v54  ;;  %v2730_v59 = vadd.f32 %v2729_v57, %v6028_v0  ;;  %2581 = vmatprep.mubr.f32.mxu0 %v2045_v27  ;;  %2972 = vmatprep.mubr.f32.mxu1 %v2045_v27 }
 0x39f   : > { %v2291_v8 = vpop.f32.mrf.mxu0  ;;  %v2731_v30 = vpop.f32.mrf.mxu1 }
 0x3a0   : > { %3030 = vst [vmem:[%s4283_s12 + $0xd8] sm:$0xff] %v2290_v39  ;;  %3032 = vst [vmem:[%s4283_s12 + $0xe8] sm:$0xff] %v2730_v59  ;;  %v2292_v50 = vadd.f32 %v2291_v8, %v6030_v49 }
 0x3a1   : > { %v2295_v47 = vpop.f32.mrf.mxu0  ;;  %2582 = vmatmul.mubr.f32.gmra.mxu0 %v2044_v9  ;;  %v2734_v25 = vpop.f32.mrf.mxu1  ;;  %2973 = vmatmul.mubr.f32.gmra.mxu1 %v2044_v9 }
 0x3a2   : > { %3031 = vst [vmem:[%s4283_s12 + $0xe0] sm:$0xff] %v2292_v50  ;;  %v2296_v58 = vadd.f32 %v2295_v47, %v6026_v54  ;;  %v2735_v6 = vadd.f32 %v2734_v25, %v6028_v0  ;;  %2587 = vmatprep.mubr.f32.mxu0 %v2047_v10  ;;  %2977 = vmatprep.mubr.f32.mxu1 %v2047_v10 }
 0x3a3   : > { %v2297_v43 = vpop.f32.mrf.mxu0  ;;  %v2736_v18 = vpop.f32.mrf.mxu1 }
 0x3a4   : > { %3033 = vst [vmem:[%s4283_s12 + $0xf0] sm:$0xff] %v2296_v58  ;;  %3035 = vst [vmem:[%s4283_s12 + $0x100] sm:$0xff] %v2735_v6  ;;  %v2298_v2 = vadd.f32 %v2297_v43, %v6030_v49 }
 0x3a5   : > { %v2301_v52 = vpop.f32.mrf.mxu0  ;;  %2588 = vmatmul.mubr.f32.gmra.mxu0 %v2046_v21  ;;  %v2739_v20 = vpop.f32.mrf.mxu1  ;;  %2978 = vmatmul.mubr.f32.gmra.mxu1 %v2046_v21 }
 0x3a6   : > { %3034 = vst [vmem:[%s4283_s12 + $0xf8] sm:$0xff] %v2298_v2  ;;  %v2302_v51 = vadd.f32 %v2301_v52, %v6026_v54  ;;  %v2740_v12 = vadd.f32 %v2739_v20, %v6028_v0  ;;  %2593 = vmatprep.mubr.f32.mxu0 %v2049_v62  ;;  %2982 = vmatprep.mubr.f32.mxu1 %v2049_v62 }
 0x3a7   : > { %v2303_v55 = vpop.f32.mrf.mxu0  ;;  %v2741_v60 = vpop.f32.mrf.mxu1 }
 0x3a8   : > { %3036 = vst [vmem:[%s4283_s12 + $0x108] sm:$0xff] %v2302_v51  ;;  %3038 = vst [vmem:[%s4283_s12 + $0x118] sm:$0xff] %v2740_v12  ;;  %v2304_v34 = vadd.f32 %v2303_v55, %v6030_v49 }
 0x3a9   : > { %v2307_v5 = vpop.f32.mrf.mxu0  ;;  %2594 = vmatmul.mubr.f32.gmra.mxu0 %v2048_v45  ;;  %v2744_v17 = vpop.f32.mrf.mxu1  ;;  %2983 = vmatmul.mubr.f32.gmra.mxu1 %v2048_v45 }
 0x3aa   : > { %3037 = vst [vmem:[%s4283_s12 + $0x110] sm:$0xff] %v2304_v34  ;;  %v2308_v32 = vadd.f32 %v2307_v5, %v6026_v54  ;;  %v2745_v36 = vadd.f32 %v2744_v17, %v6028_v0  ;;  %2599 = vmatprep.mubr.f32.mxu0 %v2051_v33  ;;  %2987 = vmatprep.mubr.f32.mxu1 %v2051_v33 }
 0x3ab   : > { %v2309_v63 = vpop.f32.mrf.mxu0  ;;  %v2746_v19 = vpop.f32.mrf.mxu1 }
 0x3ac   : > { %3039 = vst [vmem:[%s4283_s12 + $0x120] sm:$0xff] %v2308_v32  ;;  %3041 = vst [vmem:[%s4283_s12 + $0x130] sm:$0xff] %v2745_v36  ;;  %v2310_v15 = vadd.f32 %v2309_v63, %v6030_v49 }
 0x3ad   : > { %v2313_v24 = vpop.f32.mrf.mxu0  ;;  %2600 = vmatmul.mubr.f32.gmra.mxu0 %v2050_v28  ;;  %v2749_v13 = vpop.f32.mrf.mxu1  ;;  %2988 = vmatmul.mubr.f32.gmra.mxu1 %v2050_v28 }
 0x3ae   : > { %3040 = vst [vmem:[%s4283_s12 + $0x128] sm:$0xff] %v2310_v15  ;;  %v2314_v38 = vadd.f32 %v2313_v24, %v6026_v54  ;;  %v2750_v46 = vadd.f32 %v2749_v13, %v6028_v0  ;;  %2605 = vmatprep.mubr.f32.mxu0 %v2053_v31  ;;  %2992 = vmatprep.mubr.f32.mxu1 %v2053_v31 }
 0x3af   : > { %v2315_v11 = vpop.f32.mrf.mxu0  ;;  %v2751_v1 = vpop.f32.mrf.mxu1 }
 0x3b0   : > { %3042 = vst [vmem:[%s4283_s12 + $0x138] sm:$0xff] %v2314_v38  ;;  %3044 = vst [vmem:[%s4283_s12 + $0x148] sm:$0xff] %v2750_v46  ;;  %v2316_v37 = vadd.f32 %v2315_v11, %v6030_v49 }
 0x3b1   : > { %v2319_v40 = vpop.f32.mrf.mxu0  ;;  %2606 = vmatmul.mubr.f32.gmra.mxu0 %v2052_v42  ;;  %v2754_v3 = vpop.f32.mrf.mxu1  ;;  %2993 = vmatmul.mubr.f32.gmra.mxu1 %v2052_v42 }
 0x3b2   : > { %3043 = vst [vmem:[%s4283_s12 + $0x140] sm:$0xff] %v2316_v37  ;;  %v2320_v41 = vadd.f32 %v2319_v40, %v6026_v54  ;;  %v2755_v61 = vadd.f32 %v2754_v3, %v6028_v0  ;;  %2611 = vmatprep.mubr.f32.mxu0 %v2055_v16  ;;  %2997 = vmatprep.mubr.f32.mxu1 %v2055_v16 }
 0x3b3   : > { %v2321_v26 = vpop.f32.mrf.mxu0  ;;  %v2756_v44 = vpop.f32.mrf.mxu1 }
 0x3b4   : > { %3045 = vst [vmem:[%s4283_s12 + $0x150] sm:$0xff] %v2320_v41  ;;  %3047 = vst [vmem:[%s4283_s12 + $0x160] sm:$0xff] %v2755_v61  ;;  %v2322_v53 = vadd.f32 %v2321_v26, %v6030_v49 }
 0x3b5   : > { %v2325_v29 = vpop.f32.mrf.mxu0  ;;  %2612 = vmatmul.mubr.f32.gmra.mxu0 %v2054_v14  ;;  %v2759_v56 = vpop.f32.mrf.mxu1  ;;  %2998 = vmatmul.mubr.f32.gmra.mxu1 %v2054_v14 }
 0x3b6   : > { %3046 = vst [vmem:[%s4283_s12 + $0x158] sm:$0xff] %v2322_v53  ;;  %v2326_v22 = vadd.f32 %v2325_v29, %v6026_v54  ;;  %v2760_v23 = vadd.f32 %v2759_v56, %v6028_v0 }
 0x3b7   : > { %v2327_v4 = vpop.f32.mrf.mxu0  ;;  %v2761_v48 = vpop.f32.mrf.mxu1 }
 0x3b8   : > { %3048 = vst [vmem:[%s4283_s12 + $0x168] sm:$0xff] %v2326_v22  ;;  %3050 = vst [vmem:[%s4283_s12 + $0x178] sm:$0xff] %v2760_v23  ;;  %v2328_v27 = vadd.f32 %v2327_v4, %v6030_v49 }
 0x3b9   : > { %v2331_v35 = vpop.f32.mrf.mxu0  ;;  %v2764_v7 = vpop.f32.mrf.mxu1 }
 0x3ba   : > { %3049 = vst [vmem:[%s4283_s12 + $0x170] sm:$0xff] %v2328_v27  ;;  %v2332_v57 = vadd.f32 %v2331_v35, %v6026_v54  ;;  %v2765_v39 = vadd.f32 %v2764_v7, %v6028_v0 }
 0x3bb   : > { %v2333_v59 = vpop.f32.mrf.mxu0  ;;  %v2766_v9 = vpop.f32.mrf.mxu1 }
 0x3bc   : > { %3051 = vst [vmem:[%s4283_s12 + $0x180] sm:$0xff] %v2332_v57  ;;  %3053 = vst [vmem:[%s4283_s12 + $0x190] sm:$0xff] %v2765_v39  ;;  %v2334_v8 = vadd.f32 %v2333_v59, %v6030_v49 }
 0x3bd   : > { %v2337_v30 = vpop.f32.mrf.mxu0  ;;  %v2769_v10 = vpop.f32.mrf.mxu1 }
 0x3be   : > { %3052 = vst [vmem:[%s4283_s12 + $0x188] sm:$0xff] %v2334_v8  ;;  %v2338_v50 = vadd.f32 %v2337_v30, %v6026_v54  ;;  %v2770_v47 = vadd.f32 %v2769_v10, %v6028_v0 }
 0x3bf   : > { %v2339_v25 = vpop.f32.mrf.mxu0  ;;  %v2771_v58 = vpop.f32.mrf.mxu1 }
 0x3c0   : > { %3054 = vst [vmem:[%s4283_s12 + $0x198] sm:$0xff] %v2338_v50  ;;  %3056 = vst [vmem:[%s4283_s12 + $0x1a8] sm:$0xff] %v2770_v47  ;;  %v2340_v6 = vadd.f32 %v2339_v25, %v6030_v49 }
 0x3c1   : > { %v2343_v21 = vpop.f32.mrf.mxu0  ;;  %v2774_v43 = vpop.f32.mrf.mxu1 }
 0x3c2   : > { %3055 = vst [vmem:[%s4283_s12 + $0x1a0] sm:$0xff] %v2340_v6  ;;  %v2344_v18 = vadd.f32 %v2343_v21, %v6026_v54  ;;  %v2775_v62 = vadd.f32 %v2774_v43, %v6028_v0 }
 0x3c3   : > { %v2345_v2 = vpop.f32.mrf.mxu0  ;;  %v2776_v52 = vpop.f32.mrf.mxu1 }
 0x3c4   : > { %3057 = vst [vmem:[%s4283_s12 + $0x1b0] sm:$0xff] %v2344_v18  ;;  %3059 = vst [vmem:[%s4283_s12 + $0x1c0] sm:$0xff] %v2775_v62  ;;  %v2346_v20 = vadd.f32 %v2345_v2, %v6030_v49 }
 0x3c5   : > { %v2349_v51 = vpop.f32.mrf.mxu0  ;;  %v2779_v12 = vpop.f32.mrf.mxu1 }
 0x3c6   : > { %3058 = vst [vmem:[%s4283_s12 + $0x1b8] sm:$0xff] %v2346_v20  ;;  %v2350_v45 = vadd.f32 %v2349_v51, %v6026_v54  ;;  %v2780_v55 = vadd.f32 %v2779_v12, %v6028_v0 }
 0x3c7   : > { %v2351_v60 = vpop.f32.mrf.mxu0  ;;  %v2781_v33 = vpop.f32.mrf.mxu1 }
 0x3c8   : > { %3060 = vst [vmem:[%s4283_s12 + $0x1c8] sm:$0xff] %v2350_v45  ;;  %3062 = vst [vmem:[%s4283_s12 + $0x1d8] sm:$0xff] %v2780_v55  ;;  %v2352_v34 = vadd.f32 %v2351_v60, %v6030_v49 }
 0x3c9   : > { %v2355_v5 = vpop.f32.mrf.mxu0  ;;  %v2784_v17 = vpop.f32.mrf.mxu1 }
 0x3ca   : > { %3061 = vst [vmem:[%s4283_s12 + $0x1d0] sm:$0xff] %v2352_v34  ;;  %v2356_v32 = vadd.f32 %v2355_v5, %v6026_v54  ;;  %v2785_v36 = vadd.f32 %v2784_v17, %v6028_v0 }
 0x3cb   : > { %v2357_v28 = vpop.f32.mrf.mxu0  ;;  %v2786_v63 = vpop.f32.mrf.mxu1 }
 0x3cc   : > { %3063 = vst [vmem:[%s4283_s12 + $0x1e0] sm:$0xff] %v2356_v32  ;;  %3065 = vst [vmem:[%s4283_s12 + $0x1f0] sm:$0xff] %v2785_v36  ;;  %v2358_v19 = vadd.f32 %v2357_v28, %v6030_v49 }
 0x3cd   : > { %v2361_v31 = vpop.f32.mrf.mxu0  ;;  %v2789_v15 = vpop.f32.mrf.mxu1 }
 0x3ce   : > { %3064 = vst [vmem:[%s4283_s12 + $0x1e8] sm:$0xff] %v2358_v19  ;;  %v2362_v24 = vadd.f32 %v2361_v31, %v6026_v54  ;;  %v2790_v13 = vadd.f32 %v2789_v15, %v6028_v0 }
 0x3cf   : > { %v2363_v38 = vpop.f32.mrf.mxu0  ;;  %v2791_v46 = vpop.f32.mrf.mxu1 }
 0x3d0   : > { %3066 = vst [vmem:[%s4283_s12 + $0x1f8] sm:$0xff] %v2362_v24  ;;  %3068 = vst [vmem:[%s4283_s12 + $0x208] sm:$0xff] %v2790_v13  ;;  %v2364_v42 = vadd.f32 %v2363_v38, %v6030_v49 }
 0x3d1   : > { %v2367_v11 = vpop.f32.mrf.mxu0  ;;  %v2794_v1 = vpop.f32.mrf.mxu1 }
 0x3d2   : > { %3067 = vst [vmem:[%s4283_s12 + $0x200] sm:$0xff] %v2364_v42  ;;  %v2368_v16 = vadd.f32 %v2367_v11, %v6026_v54  ;;  %v2795_v37 = vadd.f32 %v2794_v1, %v6028_v0 }
 0x3d3   : > { %v2369_v40 = vpop.f32.mrf.mxu0  ;;  %v2796_v3 = vpop.f32.mrf.mxu1 }
 0x3d4   : > { %3069 = vst [vmem:[%s4283_s12 + $0x210] sm:$0xff] %v2368_v16  ;;  %3071 = vst [vmem:[%s4283_s12 + $0x220] sm:$0xff] %v2795_v37  ;;  %v2370_v41 = vadd.f32 %v2369_v40, %v6030_v49 }
 0x3d5   : > { %v2373_v61 = vpop.f32.mrf.mxu0  ;;  %v2799_v14 = vpop.f32.mrf.mxu1 }
 0x3d6   : > { %3070 = vst [vmem:[%s4283_s12 + $0x218] sm:$0xff] %v2370_v41  ;;  %v2374_v26 = vadd.f32 %v2373_v61, %v6026_v54  ;;  %v2800_v44 = vadd.f32 %v2799_v14, %v6028_v0 }
 0x3d7   : > { %v2375_v53 = vpop.f32.mrf.mxu0  ;;  %v2801_v29 = vpop.f32.mrf.mxu1 }
 0x3d8   : > { %3072 = vst [vmem:[%s4283_s12 + $0x228] sm:$0xff] %v2374_v26  ;;  %3074 = vst [vmem:[%s4283_s12 + $0x238] sm:$0xff] %v2800_v44  ;;  %v2376_v56 = vadd.f32 %v2375_v53, %v6030_v49 }
 0x3d9   : > { %v2379_v22 = vpop.f32.mrf.mxu0  ;;  %v2804_v23 = vpop.f32.mrf.mxu1 }
 0x3da   : > { %3073 = vst [vmem:[%s4283_s12 + $0x230] sm:$0xff] %v2376_v56  ;;  %v2380_v4 = vadd.f32 %v2379_v22, %v6026_v54  ;;  %v2805_v48 = vadd.f32 %v2804_v23, %v6028_v0 }
 0x3db   : > { %v2381_v27 = vpop.f32.mrf.mxu0  ;;  %v2806_v35 = vpop.f32.mrf.mxu1 }
 0x3dc   : > { %3075 = vst [vmem:[%s4283_s12 + $0x240] sm:$0xff] %v2380_v4  ;;  %3077 = vst [vmem:[%s4283_s12 + $0x250] sm:$0xff] %v2805_v48  ;;  %v2382_v7 = vadd.f32 %v2381_v27, %v6030_v49 }
 0x3dd   : > { %v2385_v57 = vpop.f32.mrf.mxu0  ;;  %v2809_v39 = vpop.f32.mrf.mxu1 }
 0x3de   : > { %3076 = vst [vmem:[%s4283_s12 + $0x248] sm:$0xff] %v2382_v7  ;;  %v2386_v59 = vadd.f32 %v2385_v57, %v6026_v54  ;;  %v2810_v9 = vadd.f32 %v2809_v39, %v6028_v0 }
 0x3df   : > { %v2387_v8 = vpop.f32.mrf.mxu0  ;;  %v2811_v30 = vpop.f32.mrf.mxu1 }
 0x3e0   : > { %3078 = vst [vmem:[%s4283_s12 + $0x258] sm:$0xff] %v2386_v59  ;;  %3080 = vst [vmem:[%s4283_s12 + $0x268] sm:$0xff] %v2810_v9  ;;  %v2388_v10 = vadd.f32 %v2387_v8, %v6030_v49 }
 0x3e1   : > { %v2391_v50 = vpop.f32.mrf.mxu0  ;;  %v2814_v47 = vpop.f32.mrf.mxu1 }
 0x3e2   : > { %3079 = vst [vmem:[%s4283_s12 + $0x260] sm:$0xff] %v2388_v10  ;;  %v2392_v25 = vadd.f32 %v2391_v50, %v6026_v54  ;;  %v2815_v58 = vadd.f32 %v2814_v47, %v6028_v0 }
 0x3e3   : > { %v2393_v6 = vpop.f32.mrf.mxu0  ;;  %v2816_v21 = vpop.f32.mrf.mxu1 }
 0x3e4   : > { %3081 = vst [vmem:[%s4283_s12 + $0x270] sm:$0xff] %v2392_v25  ;;  %3083 = vst [vmem:[%s4283_s12 + $0x280] sm:$0xff] %v2815_v58  ;;  %v2394_v43 = vadd.f32 %v2393_v6, %v6030_v49 }
 0x3e5   : > { %v2397_v18 = vpop.f32.mrf.mxu0  ;;  %v2819_v62 = vpop.f32.mrf.mxu1 }
 0x3e6   : > { %3082 = vst [vmem:[%s4283_s12 + $0x278] sm:$0xff] %v2394_v43  ;;  %v2398_v2 = vadd.f32 %v2397_v18, %v6026_v54  ;;  %v2820_v52 = vadd.f32 %v2819_v62, %v6028_v0 }
 0x3e7   : > { %v2399_v20 = vpop.f32.mrf.mxu0  ;;  %v2821_v51 = vpop.f32.mrf.mxu1 }
 0x3e8   : > { %3084 = vst [vmem:[%s4283_s12 + $0x288] sm:$0xff] %v2398_v2  ;;  %3086 = vst [vmem:[%s4283_s12 + $0x298] sm:$0xff] %v2820_v52  ;;  %v2400_v12 = vadd.f32 %v2399_v20, %v6030_v49 }
 0x3e9   : > { %v2403_v45 = vpop.f32.mrf.mxu0  ;;  %v2824_v55 = vpop.f32.mrf.mxu1 }
 0x3ea   : > { %3085 = vst [vmem:[%s4283_s12 + $0x290] sm:$0xff] %v2400_v12  ;;  %v2404_v60 = vadd.f32 %v2403_v45, %v6026_v54  ;;  %v2825_v33 = vadd.f32 %v2824_v55, %v6028_v0 }
 0x3eb   : > { %v2405_v34 = vpop.f32.mrf.mxu0  ;;  %v2826_v5 = vpop.f32.mrf.mxu1 }
 0x3ec   : > { %3087 = vst [vmem:[%s4283_s12 + $0x2a0] sm:$0xff] %v2404_v60  ;;  %3089 = vst [vmem:[%s4283_s12 + $0x2b0] sm:$0xff] %v2825_v33  ;;  %v2406_v17 = vadd.f32 %v2405_v34, %v6030_v49 }
 0x3ed   : > { %v2409_v32 = vpop.f32.mrf.mxu0  ;;  %v2829_v36 = vpop.f32.mrf.mxu1 }
 0x3ee   : > { %3088 = vst [vmem:[%s4283_s12 + $0x2a8] sm:$0xff] %v2406_v17  ;;  %v2410_v28 = vadd.f32 %v2409_v32, %v6026_v54  ;;  %v2830_v63 = vadd.f32 %v2829_v36, %v6028_v0 }
 0x3ef   : > { %v2411_v19 = vpop.f32.mrf.mxu0  ;;  %v2831_v31 = vpop.f32.mrf.mxu1 }
 0x3f0   : > { %3090 = vst [vmem:[%s4283_s12 + $0x2b8] sm:$0xff] %v2410_v28  ;;  %3092 = vst [vmem:[%s4283_s12 + $0x2c8] sm:$0xff] %v2830_v63  ;;  %v2412_v15 = vadd.f32 %v2411_v19, %v6030_v49 }
 0x3f1   : > { %v2415_v24 = vpop.f32.mrf.mxu0  ;;  %v2834_v13 = vpop.f32.mrf.mxu1 }
 0x3f2   : > { %3091 = vst [vmem:[%s4283_s12 + $0x2c0] sm:$0xff] %v2412_v15  ;;  %v2416_v38 = vadd.f32 %v2415_v24, %v6026_v54  ;;  %v2835_v46 = vadd.f32 %v2834_v13, %v6028_v0 }
 0x3f3   : > { %v2417_v42 = vpop.f32.mrf.mxu0  ;;  %v2836_v11 = vpop.f32.mrf.mxu1 }
 0x3f4   : > { %3093 = vst [vmem:[%s4283_s12 + $0x2d0] sm:$0xff] %v2416_v38  ;;  %3095 = vst [vmem:[%s4283_s12 + $0x2e0] sm:$0xff] %v2835_v46  ;;  %v2418_v1 = vadd.f32 %v2417_v42, %v6030_v49 }
 0x3f5   : > { %v2421_v16 = vpop.f32.mrf.mxu0  ;;  %v2839_v37 = vpop.f32.mrf.mxu1 }
 0x3f6   : > { %3094 = vst [vmem:[%s4283_s12 + $0x2d8] sm:$0xff] %v2418_v1  ;;  %v2422_v40 = vadd.f32 %v2421_v16, %v6026_v54  ;;  %v2840_v3 = vadd.f32 %v2839_v37, %v6028_v0 }
 0x3f7   : > { %v2423_v41 = vpop.f32.mrf.mxu0  ;;  %v2841_v61 = vpop.f32.mrf.mxu1 }
 0x3f8   : > { %3096 = vst [vmem:[%s4283_s12 + $0x2e8] sm:$0xff] %v2422_v40  ;;  %3098 = vst [vmem:[%s4283_s12 + $0x2f8] sm:$0xff] %v2840_v3  ;;  %v2424_v14 = vadd.f32 %v2423_v41, %v6030_v49 }
 0x3f9   : > { %v2427_v26 = vpop.f32.mrf.mxu0  ;;  %v2844_v44 = vpop.f32.mrf.mxu1 }
 0x3fa   : > { %3097 = vst [vmem:[%s4283_s12 + $0x2f0] sm:$0xff] %v2424_v14  ;;  %v2428_v53 = vadd.f32 %v2427_v26, %v6026_v54  ;;  %v2845_v29 = vadd.f32 %v2844_v44, %v6028_v0 }
 0x3fb   : > { %v2429_v56 = vpop.f32.mrf.mxu0  ;;  %v2846_v22 = vpop.f32.mrf.mxu1 }
 0x3fc   : > { %3099 = vst [vmem:[%s4283_s12 + $0x300] sm:$0xff] %v2428_v53  ;;  %3101 = vst [vmem:[%s4283_s12 + $0x310] sm:$0xff] %v2845_v29  ;;  %v2430_v23 = vadd.f32 %v2429_v56, %v6030_v49 }
 0x3fd   : > { %v2433_v4 = vpop.f32.mrf.mxu0  ;;  %v2849_v48 = vpop.f32.mrf.mxu1 }
 0x3fe   : > { %3100 = vst [vmem:[%s4283_s12 + $0x308] sm:$0xff] %v2430_v23  ;;  %v2434_v27 = vadd.f32 %v2433_v4, %v6026_v54  ;;  %v2850_v35 = vadd.f32 %v2849_v48, %v6028_v0 }
 0x3ff   : > { %v2435_v7 = vpop.f32.mrf.mxu0  ;;  %v2851_v57 = vpop.f32.mrf.mxu1 }
 0x400   : > { %3102 = vst [vmem:[%s4283_s12 + $0x318] sm:$0xff] %v2434_v27  ;;  %3104 = vst [vmem:[%s4283_s12 + $0x328] sm:$0xff] %v2850_v35  ;;  %v2436_v39 = vadd.f32 %v2435_v7, %v6030_v49 }
 0x401   : > { %v2439_v59 = vpop.f32.mrf.mxu0  ;;  %v2854_v9 = vpop.f32.mrf.mxu1 }
 0x402   : > { %3103 = vst [vmem:[%s4283_s12 + $0x320] sm:$0xff] %v2436_v39  ;;  %v2440_v8 = vadd.f32 %v2439_v59, %v6026_v54  ;;  %v2855_v30 = vadd.f32 %v2854_v9, %v6028_v0 }
 0x403   : > { %v2441_v10 = vpop.f32.mrf.mxu0  ;;  %v2856_v50 = vpop.f32.mrf.mxu1 }
 0x404   : > { %3105 = vst [vmem:[%s4283_s12 + $0x330] sm:$0xff] %v2440_v8  ;;  %3107 = vst [vmem:[%s4283_s12 + $0x340] sm:$0xff] %v2855_v30  ;;  %v2442_v47 = vadd.f32 %v2441_v10, %v6030_v49 }
 0x405   : > { %v2445_v25 = vpop.f32.mrf.mxu0  ;;  %v2859_v58 = vpop.f32.mrf.mxu1 }
 0x406   : > { %3106 = vst [vmem:[%s4283_s12 + $0x338] sm:$0xff] %v2442_v47  ;;  %v2446_v6 = vadd.f32 %v2445_v25, %v6026_v54  ;;  %v2860_v21 = vadd.f32 %v2859_v58, %v6028_v0 }
 0x407   : > { %v2447_v43 = vpop.f32.mrf.mxu0  ;;  %v2861_v18 = vpop.f32.mrf.mxu1 }
 0x408   : > { %3108 = vst [vmem:[%s4283_s12 + $0x348] sm:$0xff] %v2446_v6  ;;  %3110 = vst [vmem:[%s4283_s12 + $0x358] sm:$0xff] %v2860_v21  ;;  %v2448_v62 = vadd.f32 %v2447_v43, %v6030_v49 }
 0x409   : > { %v2451_v2 = vpop.f32.mrf.mxu0  ;;  %v2864_v52 = vpop.f32.mrf.mxu1 }
 0x40a   : > { %3109 = vst [vmem:[%s4283_s12 + $0x350] sm:$0xff] %v2448_v62  ;;  %v2452_v20 = vadd.f32 %v2451_v2, %v6026_v54  ;;  %v2865_v51 = vadd.f32 %v2864_v52, %v6028_v0 }
 0x40b   : > { %v2453_v12 = vpop.f32.mrf.mxu0  ;;  %v2866_v45 = vpop.f32.mrf.mxu1 }
 0x40c   : > { %3111 = vst [vmem:[%s4283_s12 + $0x360] sm:$0xff] %v2452_v20  ;;  %3113 = vst [vmem:[%s4283_s12 + $0x370] sm:$0xff] %v2865_v51  ;;  %v2454_v55 = vadd.f32 %v2453_v12, %v6030_v49 }
 0x40d   : > { %v2457_v60 = vpop.f32.mrf.mxu0  ;;  %v2869_v33 = vpop.f32.mrf.mxu1 }
 0x40e   : > { %3112 = vst [vmem:[%s4283_s12 + $0x368] sm:$0xff] %v2454_v55  ;;  %v2458_v34 = vadd.f32 %v2457_v60, %v6026_v54  ;;  %v2870_v5 = vadd.f32 %v2869_v33, %v6028_v0 }
 0x40f   : > { %v2459_v17 = vpop.f32.mrf.mxu0  ;;  %v2871_v32 = vpop.f32.mrf.mxu1 }
 0x410   : > { %3114 = vst [vmem:[%s4283_s12 + $0x378] sm:$0xff] %v2458_v34  ;;  %3116 = vst [vmem:[%s4283_s12 + $0x388] sm:$0xff] %v2870_v5  ;;  %v2460_v36 = vadd.f32 %v2459_v17, %v6030_v49 }
 0x411   : > { %v2463_v28 = vpop.f32.mrf.mxu0  ;;  %v2874_v63 = vpop.f32.mrf.mxu1 }
 0x412   : > { %3115 = vst [vmem:[%s4283_s12 + $0x380] sm:$0xff] %v2460_v36  ;;  %v2464_v19 = vadd.f32 %v2463_v28, %v6026_v54  ;;  %v2875_v31 = vadd.f32 %v2874_v63, %v6028_v0 }
 0x413   : > { %v2465_v15 = vpop.f32.mrf.mxu0  ;;  %v2876_v24 = vpop.f32.mrf.mxu1 }
 0x414   : > { %3117 = vst [vmem:[%s4283_s12 + $0x390] sm:$0xff] %v2464_v19  ;;  %3119 = vst [vmem:[%s4283_s12 + $0x3a0] sm:$0xff] %v2875_v31  ;;  %v2466_v13 = vadd.f32 %v2465_v15, %v6030_v49 }
 0x415   : > { %v2469_v38 = vpop.f32.mrf.mxu0  ;;  %v2879_v46 = vpop.f32.mrf.mxu1 }
 0x416   : > { %3118 = vst [vmem:[%s4283_s12 + $0x398] sm:$0xff] %v2466_v13  ;;  %v2470_v42 = vadd.f32 %v2469_v38, %v6026_v54  ;;  %v2880_v11 = vadd.f32 %v2879_v46, %v6028_v0 }
 0x417   : > { %v2471_v1 = vpop.f32.mrf.mxu0  ;;  %v2881_v16 = vpop.f32.mrf.mxu1 }
 0x418   : > { %3120 = vst [vmem:[%s4283_s12 + $0x3a8] sm:$0xff] %v2470_v42  ;;  %3122 = vst [vmem:[%s4283_s12 + $0x3b8] sm:$0xff] %v2880_v11  ;;  %v2472_v37 = vadd.f32 %v2471_v1, %v6030_v49 }
 0x419   : > { %v2475_v40 = vpop.f32.mrf.mxu0  ;;  %v2884_v3 = vpop.f32.mrf.mxu1 }
 0x41a   : > { %3121 = vst [vmem:[%s4283_s12 + $0x3b0] sm:$0xff] %v2472_v37  ;;  %v2476_v41 = vadd.f32 %v2475_v40, %v6026_v54  ;;  %v2885_v61 = vadd.f32 %v2884_v3, %v6028_v0 }
 0x41b   : > { %v2477_v14 = vpop.f32.mrf.mxu0  ;;  %v2886_v26 = vpop.f32.mrf.mxu1 }
 0x41c   : > { %3123 = vst [vmem:[%s4283_s12 + $0x3c0] sm:$0xff] %v2476_v41  ;;  %3125 = vst [vmem:[%s4283_s12 + $0x3d0] sm:$0xff] %v2885_v61  ;;  %v2478_v44 = vadd.f32 %v2477_v14, %v6030_v49 }
 0x41d   : > { %v2481_v53 = vpop.f32.mrf.mxu0  ;;  %v2889_v29 = vpop.f32.mrf.mxu1 }
 0x41e   : > { %3124 = vst [vmem:[%s4283_s12 + $0x3c8] sm:$0xff] %v2478_v44  ;;  %v2482_v56 = vadd.f32 %v2481_v53, %v6026_v54  ;;  %v2890_v22 = vadd.f32 %v2889_v29, %v6028_v0 }
 0x41f   : > { %v2483_v23 = vpop.f32.mrf.mxu0  ;;  %v2891_v4 = vpop.f32.mrf.mxu1 }
 0x420   : > { %3126 = vst [vmem:[%s4283_s12 + $0x3d8] sm:$0xff] %v2482_v56  ;;  %3128 = vst [vmem:[%s4283_s12 + $0x3e8] sm:$0xff] %v2890_v22  ;;  %v2484_v48 = vadd.f32 %v2483_v23, %v6030_v49 }
 0x421   : > { %v2487_v27 = vpop.f32.mrf.mxu0  ;;  %v2894_v35 = vpop.f32.mrf.mxu1 }
 0x422   : > { %3127 = vst [vmem:[%s4283_s12 + $0x3e0] sm:$0xff] %v2484_v48  ;;  %v2488_v7 = vadd.f32 %v2487_v27, %v6026_v54  ;;  %v2895_v57 = vadd.f32 %v2894_v35, %v6028_v0 }
 0x423   : > { %v2489_v39 = vpop.f32.mrf.mxu0  ;;  %v2896_v59 = vpop.f32.mrf.mxu1 }
 0x424   : > { %3129 = vst [vmem:[%s4283_s12 + $0x3f0] sm:$0xff] %v2488_v7  ;;  %3131 = vst [vmem:[%s4283_s12 + $0x400] sm:$0xff] %v2895_v57  ;;  %v2490_v9 = vadd.f32 %v2489_v39, %v6030_v49 }
 0x425   : > { %v2493_v8 = vpop.f32.mrf.mxu0  ;;  %v2899_v30 = vpop.f32.mrf.mxu1 }
 0x426   : > { %3130 = vst [vmem:[%s4283_s12 + $0x3f8] sm:$0xff] %v2490_v9  ;;  %v2494_v10 = vadd.f32 %v2493_v8, %v6026_v54  ;;  %v2900_v50 = vadd.f32 %v2899_v30, %v6028_v0 }
 0x427   : > { %v2495_v47 = vpop.f32.mrf.mxu0  ;;  %v2901_v25 = vpop.f32.mrf.mxu1 }
 0x428   : > { %3132 = vst [vmem:[%s4283_s12 + $0x408] sm:$0xff] %v2494_v10  ;;  %3134 = vst [vmem:[%s4283_s12 + $0x418] sm:$0xff] %v2900_v50  ;;  %v2496_v58 = vadd.f32 %v2495_v47, %v6030_v49 }
 0x429   : > { %v2499_v6 = vpop.f32.mrf.mxu0  ;;  %v2904_v21 = vpop.f32.mrf.mxu1 }
 0x42a   : > { %3133 = vst [vmem:[%s4283_s12 + $0x410] sm:$0xff] %v2496_v58  ;;  %v2500_v43 = vadd.f32 %v2499_v6, %v6026_v54  ;;  %v2905_v18 = vadd.f32 %v2904_v21, %v6028_v0 }
 0x42b   : > { %v2501_v62 = vpop.f32.mrf.mxu0  ;;  %v2906_v2 = vpop.f32.mrf.mxu1 }
 0x42c   : > { %3135 = vst [vmem:[%s4283_s12 + $0x420] sm:$0xff] %v2500_v43  ;;  %3137 = vst [vmem:[%s4283_s12 + $0x430] sm:$0xff] %v2905_v18  ;;  %v2502_v52 = vadd.f32 %v2501_v62, %v6030_v49 }
 0x42d   : > { %v2505_v20 = vpop.f32.mrf.mxu0  ;;  %v2909_v51 = vpop.f32.mrf.mxu1 }
 0x42e   : > { %3136 = vst [vmem:[%s4283_s12 + $0x428] sm:$0xff] %v2502_v52  ;;  %v2506_v12 = vadd.f32 %v2505_v20, %v6026_v54  ;;  %v2910_v45 = vadd.f32 %v2909_v51, %v6028_v0 }
 0x42f   : > { %v2507_v55 = vpop.f32.mrf.mxu0  ;;  %v2911_v60 = vpop.f32.mrf.mxu1 }
 0x430   : > { %3138 = vst [vmem:[%s4283_s12 + $0x438] sm:$0xff] %v2506_v12  ;;  %3140 = vst [vmem:[%s4283_s12 + $0x448] sm:$0xff] %v2910_v45  ;;  %v2508_v33 = vadd.f32 %v2507_v55, %v6030_v49 }
 0x431   : > { %v2511_v34 = vpop.f32.mrf.mxu0  ;;  %v2914_v5 = vpop.f32.mrf.mxu1 }
 0x432   : > { %3139 = vst [vmem:[%s4283_s12 + $0x440] sm:$0xff] %v2508_v33  ;;  %v2512_v17 = vadd.f32 %v2511_v34, %v6026_v54  ;;  %v2915_v32 = vadd.f32 %v2914_v5, %v6028_v0 }
 0x433   : > { %v2513_v36 = vpop.f32.mrf.mxu0  ;;  %v2916_v28 = vpop.f32.mrf.mxu1 }
 0x434   : > { %3141 = vst [vmem:[%s4283_s12 + $0x450] sm:$0xff] %v2512_v17  ;;  %3143 = vst [vmem:[%s4283_s12 + $0x460] sm:$0xff] %v2915_v32  ;;  %v2514_v63 = vadd.f32 %v2513_v36, %v6030_v49 }
 0x435   : > { %v2517_v19 = vpop.f32.mrf.mxu0  ;;  %v2919_v31 = vpop.f32.mrf.mxu1 }
 0x436   : > { %3142 = vst [vmem:[%s4283_s12 + $0x458] sm:$0xff] %v2514_v63  ;;  %v2518_v15 = vadd.f32 %v2517_v19, %v6026_v54  ;;  %v2920_v24 = vadd.f32 %v2919_v31, %v6028_v0 }
 0x437   : > { %v2519_v13 = vpop.f32.mrf.mxu0  ;;  %v2921_v38 = vpop.f32.mrf.mxu1 }
 0x438   : > { %3144 = vst [vmem:[%s4283_s12 + $0x468] sm:$0xff] %v2518_v15  ;;  %3146 = vst [vmem:[%s4283_s12 + $0x478] sm:$0xff] %v2920_v24  ;;  %v2520_v46 = vadd.f32 %v2519_v13, %v6030_v49 }
 0x439   : > { %v2523_v42 = vpop.f32.mrf.mxu0  ;;  %v2924_v11 = vpop.f32.mrf.mxu1 }
 0x43a   : > { %3145 = vst [vmem:[%s4283_s12 + $0x470] sm:$0xff] %v2520_v46  ;;  %v2524_v1 = vadd.f32 %v2523_v42, %v6026_v54  ;;  %v2925_v16 = vadd.f32 %v2924_v11, %v6028_v0 }
 0x43b   : > { %v2525_v37 = vpop.f32.mrf.mxu0  ;;  %v2926_v40 = vpop.f32.mrf.mxu1 }
 0x43c   : > { %3147 = vst [vmem:[%s4283_s12 + $0x480] sm:$0xff] %v2524_v1  ;;  %3149 = vst [vmem:[%s4283_s12 + $0x490] sm:$0xff] %v2925_v16  ;;  %v2526_v3 = vadd.f32 %v2525_v37, %v6030_v49 }
 0x43d   : > { %v2529_v41 = vpop.f32.mrf.mxu0  ;;  %v2929_v61 = vpop.f32.mrf.mxu1 }
 0x43e   : > { %3148 = vst [vmem:[%s4283_s12 + $0x488] sm:$0xff] %v2526_v3  ;;  %v2530_v14 = vadd.f32 %v2529_v41, %v6026_v54  ;;  %v2930_v26 = vadd.f32 %v2929_v61, %v6028_v0 }
 0x43f   : > { %v2531_v44 = vpop.f32.mrf.mxu0  ;;  %v2931_v53 = vpop.f32.mrf.mxu1 }
 0x440   : > { %3150 = vst [vmem:[%s4283_s12 + $0x498] sm:$0xff] %v2530_v14  ;;  %3152 = vst [vmem:[%s4283_s12 + $0x4a8] sm:$0xff] %v2930_v26  ;;  %v2532_v29 = vadd.f32 %v2531_v44, %v6030_v49 }
 0x441   : > { %v2535_v56 = vpop.f32.mrf.mxu0  ;;  %v2934_v22 = vpop.f32.mrf.mxu1 }
 0x442   : > { %3151 = vst [vmem:[%s4283_s12 + $0x4a0] sm:$0xff] %v2532_v29  ;;  %v2536_v23 = vadd.f32 %v2535_v56, %v6026_v54  ;;  %v2935_v4 = vadd.f32 %v2934_v22, %v6028_v0 }
 0x443   : > { %v2537_v48 = vpop.f32.mrf.mxu0  ;;  %v2936_v27 = vpop.f32.mrf.mxu1 }
 0x444   : > { %3153 = vst [vmem:[%s4283_s12 + $0x4b0] sm:$0xff] %v2536_v23  ;;  %3155 = vst [vmem:[%s4283_s12 + $0x4c0] sm:$0xff] %v2935_v4  ;;  %v2538_v35 = vadd.f32 %v2537_v48, %v6030_v49 }
 0x445   : > { %v2541_v7 = vpop.f32.mrf.mxu0  ;;  %v2939_v57 = vpop.f32.mrf.mxu1 }
 0x446   : > { %3154 = vst [vmem:[%s4283_s12 + $0x4b8] sm:$0xff] %v2538_v35  ;;  %v2542_v39 = vadd.f32 %v2541_v7, %v6026_v54  ;;  %v2940_v59 = vadd.f32 %v2939_v57, %v6028_v0 }
 0x447   : > { %v2543_v9 = vpop.f32.mrf.mxu0  ;;  %v2941_v8 = vpop.f32.mrf.mxu1 }
 0x448   : > { %3156 = vst [vmem:[%s4283_s12 + $0x4c8] sm:$0xff] %v2542_v39  ;;  %3158 = vst [vmem:[%s4283_s12 + $0x4d8] sm:$0xff] %v2940_v59  ;;  %v2544_v30 = vadd.f32 %v2543_v9, %v6030_v49 }
 0x449   : > { %v2547_v10 = vpop.f32.mrf.mxu0  ;;  %v2944_v50 = vpop.f32.mrf.mxu1 }
 0x44a   : > { %3157 = vst [vmem:[%s4283_s12 + $0x4d0] sm:$0xff] %v2544_v30  ;;  %v2548_v47 = vadd.f32 %v2547_v10, %v6026_v54  ;;  %v2945_v25 = vadd.f32 %v2944_v50, %v6028_v0 }
 0x44b   : > { %v2549_v58 = vpop.f32.mrf.mxu0  ;;  %v2946_v6 = vpop.f32.mrf.mxu1 }
 0x44c   : > { %3159 = vst [vmem:[%s4283_s12 + $0x4e0] sm:$0xff] %v2548_v47  ;;  %3161 = vst [vmem:[%s4283_s12 + $0x4f0] sm:$0xff] %v2945_v25  ;;  %v2550_v21 = vadd.f32 %v2549_v58, %v6030_v49 }
 0x44d   : > { %v2553_v43 = vpop.f32.mrf.mxu0  ;;  %v2949_v18 = vpop.f32.mrf.mxu1 }
 0x44e   : > { %3160 = vst [vmem:[%s4283_s12 + $0x4e8] sm:$0xff] %v2550_v21  ;;  %v2554_v62 = vadd.f32 %v2553_v43, %v6026_v54  ;;  %v2950_v2 = vadd.f32 %v2949_v18, %v6028_v0 }
 0x44f   : > { %v2555_v52 = vpop.f32.mrf.mxu0  ;;  %v2951_v20 = vpop.f32.mrf.mxu1 }
 0x450   : > { %3162 = vst [vmem:[%s4283_s12 + $0x4f8] sm:$0xff] %v2554_v62  ;;  %3164 = vst [vmem:[%s4283_s12 + $0x508] sm:$0xff] %v2950_v2  ;;  %v2556_v51 = vadd.f32 %v2555_v52, %v6030_v49 }
 0x451   : > { %v2559_v12 = vpop.f32.mrf.mxu0  ;;  %v2954_v45 = vpop.f32.mrf.mxu1 }
 0x452   : > { %3163 = vst [vmem:[%s4283_s12 + $0x500] sm:$0xff] %v2556_v51  ;;  %v2560_v55 = vadd.f32 %v2559_v12, %v6026_v54  ;;  %v2955_v60 = vadd.f32 %v2954_v45, %v6028_v0 }
 0x453   : > { %v2561_v33 = vpop.f32.mrf.mxu0  ;;  %v2956_v34 = vpop.f32.mrf.mxu1 }
 0x454   : > { %3165 = vst [vmem:[%s4283_s12 + $0x510] sm:$0xff] %v2560_v55  ;;  %3167 = vst [vmem:[%s4283_s12 + $0x520] sm:$0xff] %v2955_v60  ;;  %v2562_v5 = vadd.f32 %v2561_v33, %v6030_v49 }
 0x455   : > { %v2565_v17 = vpop.f32.mrf.mxu0  ;;  %v2959_v32 = vpop.f32.mrf.mxu1 }
 0x456   : > { %3166 = vst [vmem:[%s4283_s12 + $0x518] sm:$0xff] %v2562_v5  ;;  %v2566_v36 = vadd.f32 %v2565_v17, %v6026_v54  ;;  %v2960_v28 = vadd.f32 %v2959_v32, %v6028_v0 }
 0x457   : > { %v2567_v63 = vpop.f32.mrf.mxu0  ;;  %v2961_v19 = vpop.f32.mrf.mxu1 }
 0x458   : > { %3168 = vst [vmem:[%s4283_s12 + $0x528] sm:$0xff] %v2566_v36  ;;  %3170 = vst [vmem:[%s4283_s12 + $0x538] sm:$0xff] %v2960_v28  ;;  %v2568_v31 = vadd.f32 %v2567_v63, %v6030_v49 }
 0x459   : > { %v2571_v15 = vpop.f32.mrf.mxu0  ;;  %v2964_v24 = vpop.f32.mrf.mxu1 }
 0x45a   : > { %3169 = vst [vmem:[%s4283_s12 + $0x530] sm:$0xff] %v2568_v31  ;;  %v2572_v13 = vadd.f32 %v2571_v15, %v6026_v54  ;;  %v2965_v38 = vadd.f32 %v2964_v24, %v6028_v0 }
 0x45b   : > { %v2573_v46 = vpop.f32.mrf.mxu0  ;;  %v2966_v42 = vpop.f32.mrf.mxu1 }
 0x45c   : > { %3171 = vst [vmem:[%s4283_s12 + $0x540] sm:$0xff] %v2572_v13  ;;  %3173 = vst [vmem:[%s4283_s12 + $0x550] sm:$0xff] %v2965_v38  ;;  %v2574_v11 = vadd.f32 %v2573_v46, %v6030_v49 }
 0x45d   : > { %v2577_v1 = vpop.f32.mrf.mxu0  ;;  %v2969_v16 = vpop.f32.mrf.mxu1 }
 0x45e   : > { %3172 = vst [vmem:[%s4283_s12 + $0x548] sm:$0xff] %v2574_v11  ;;  %v2578_v37 = vadd.f32 %v2577_v1, %v6026_v54  ;;  %v2970_v40 = vadd.f32 %v2969_v16, %v6028_v0 }
 0x45f   : > { %v2579_v3 = vpop.f32.mrf.mxu0  ;;  %v2971_v41 = vpop.f32.mrf.mxu1 }
 0x460   : > { %3174 = vst [vmem:[%s4283_s12 + $0x558] sm:$0xff] %v2578_v37  ;;  %3176 = vst [vmem:[%s4283_s12 + $0x568] sm:$0xff] %v2970_v40  ;;  %v2580_v61 = vadd.f32 %v2579_v3, %v6030_v49 }
 0x461   : > { %v2583_v14 = vpop.f32.mrf.mxu0  ;;  %v2974_v26 = vpop.f32.mrf.mxu1 }
 0x462   : > { %3175 = vst [vmem:[%s4283_s12 + $0x560] sm:$0xff] %v2580_v61  ;;  %v2584_v44 = vadd.f32 %v2583_v14, %v6026_v54  ;;  %v2975_v53 = vadd.f32 %v2974_v26, %v6028_v0 }
 0x463   : > { %v2585_v29 = vpop.f32.mrf.mxu0  ;;  %v2976_v56 = vpop.f32.mrf.mxu1 }
 0x464   : > { %3177 = vst [vmem:[%s4283_s12 + $0x570] sm:$0xff] %v2584_v44  ;;  %3179 = vst [vmem:[%s4283_s12 + $0x580] sm:$0xff] %v2975_v53  ;;  %v2586_v22 = vadd.f32 %v2585_v29, %v6030_v49 }
 0x465   : > { %v2589_v23 = vpop.f32.mrf.mxu0  ;;  %v2979_v4 = vpop.f32.mrf.mxu1 }
 0x466   : > { %3178 = vst [vmem:[%s4283_s12 + $0x578] sm:$0xff] %v2586_v22  ;;  %v2590_v48 = vadd.f32 %v2589_v23, %v6026_v54  ;;  %v2980_v27 = vadd.f32 %v2979_v4, %v6028_v0 }
 0x467   : > { %v2591_v35 = vpop.f32.mrf.mxu0  ;;  %v2981_v7 = vpop.f32.mrf.mxu1 }
 0x468   : > { %3180 = vst [vmem:[%s4283_s12 + $0x588] sm:$0xff] %v2590_v48  ;;  %3182 = vst [vmem:[%s4283_s12 + $0x598] sm:$0xff] %v2980_v27  ;;  %v2592_v57 = vadd.f32 %v2591_v35, %v6030_v49 }
 0x469   : > { %v2595_v39 = vpop.f32.mrf.mxu0  ;;  %v2984_v59 = vpop.f32.mrf.mxu1 }
 0x46a   : > { %3181 = vst [vmem:[%s4283_s12 + $0x590] sm:$0xff] %v2592_v57  ;;  %v2596_v9 = vadd.f32 %v2595_v39, %v6026_v54  ;;  %v2985_v8 = vadd.f32 %v2984_v59, %v6028_v0 }
 0x46b   : > { %v2597_v30 = vpop.f32.mrf.mxu0  ;;  %v2986_v10 = vpop.f32.mrf.mxu1 }
 0x46c   : > { %3183 = vst [vmem:[%s4283_s12 + $0x5a0] sm:$0xff] %v2596_v9  ;;  %3185 = vst [vmem:[%s4283_s12 + $0x5b0] sm:$0xff] %v2985_v8  ;;  %v2598_v50 = vadd.f32 %v2597_v30, %v6030_v49 }
 0x46d   : > { %v2601_v47 = vpop.f32.mrf.mxu0  ;;  %v2989_v25 = vpop.f32.mrf.mxu1 }
 0x46e   : > { %3184 = vst [vmem:[%s4283_s12 + $0x5a8] sm:$0xff] %v2598_v50  ;;  %v2602_v58 = vadd.f32 %v2601_v47, %v6026_v54  ;;  %v2990_v6 = vadd.f32 %v2989_v25, %v6028_v0 }
 0x46f   : > { %v2603_v21 = vpop.f32.mrf.mxu0  ;;  %v2991_v43 = vpop.f32.mrf.mxu1 }
 0x470   : > { %3186 = vst [vmem:[%s4283_s12 + $0x5b8] sm:$0xff] %v2602_v58  ;;  %3188 = vst [vmem:[%s4283_s12 + $0x5c8] sm:$0xff] %v2990_v6  ;;  %v2604_v18 = vadd.f32 %v2603_v21, %v6030_v49 }
 0x471   : > { %v2607_v62 = vpop.f32.mrf.mxu0  ;;  %v2994_v2 = vpop.f32.mrf.mxu1 }
 0x472   : > { %3187 = vst [vmem:[%s4283_s12 + $0x5c0] sm:$0xff] %v2604_v18  ;;  %v2608_v52 = vadd.f32 %v2607_v62, %v6026_v54  ;;  %v2995_v20 = vadd.f32 %v2994_v2, %v6028_v0 }
 0x473   : > { %v2609_v51 = vpop.f32.mrf.mxu0  ;;  %v2996_v12 = vpop.f32.mrf.mxu1 }
 0x474   : > { %3189 = vst [vmem:[%s4283_s12 + $0x5d0] sm:$0xff] %v2608_v52  ;;  %3191 = vst [vmem:[%s4283_s12 + $0x5e0] sm:$0xff] %v2995_v20  ;;  %v2610_v45 = vadd.f32 %v2609_v51, %v6030_v49 }
 0x475   : > { %v2613_v55 = vpop.f32.mrf.mxu0  ;;  %v2999_v60 = vpop.f32.mrf.mxu1 }
 0x476   : > { %3190 = vst [vmem:[%s4283_s12 + $0x5d8] sm:$0xff] %v2610_v45  ;;  %v2614_v33 = vadd.f32 %v2613_v55, %v6026_v54  ;;  %v3000_v34 = vadd.f32 %v2999_v60, %v6028_v0 }
 0x477   : > { %v2615_v5 = vpop.f32.mrf.mxu0  ;;  %v3001_v17 = vpop.f32.mrf.mxu1 }
 0x478   : > { %3192 = vst [vmem:[%s4283_s12 + $0x5e8] sm:$0xff] %v2614_v33  ;;  %3194 = vst [vmem:[%s4283_s12 + $0x5f8] sm:$0xff] %v3000_v34  ;;  %v2616_v32 = vadd.f32 %v2615_v5, %v6030_v49 }
 0x47a   : > { %3193 = vst [vmem:[%s4283_s12 + $0x5f0] sm:$0xff] %v2616_v32 }
 0x47b   : > { %3836 = shalt.err (!%p3833_p2)
}
 0x47c   : > { %s3837_s1 = scalar_lea.hbm %s6418_s18, 24576  ;;  %s3841_s5 = scalar_lea.hbm %s7075_s17, 98304 }
 0x47d   : > { %p3838_p0 = scmp.ne.s32.totalorder %s6418_s18, %s3837_s1  ;;  %p3842_p10 = scmp.lt.s32.totalorder %s6418_s18, %s7075_s17 }
 0x47e   : > { %p3843_p4 = scmp.lt.s32.totalorder %s3841_s5, %s3837_s1 }
 0x47f   : > { %p3839_p9 = pnand %p3838_p0, %p7076_p8 }
 0x480   : > { %p3844_p5 = por %p3843_p4, %p3842_p10 }
 0x481   : > { %p3840_p7 = pneg %p3839_p9 }
 0x483   : > { %p3845_p1 = pnand %p3844_p5, %p3840_p7 }
 0x485   : > { %3848 = shalt.err (!%p3845_p1)
}
 0x486   : > { %s3989_s13 = smov 384   ;;  %s3990_s11 = smov 768  }
 0x487   : > { %s3991_s21 = smov 24  }
 0x488   : > { %3407 = dma.vmem_to_hbm [thread:$0]  (%p7076_p8), %s6420_s16, 24576, %s6418_s18, %s6428_s15, %s3989_s13, %s3990_s11, %s3991_s21  }
 0x489 PF: > { %s7077_s19 = sld [smem:[#allocation17_spill]]  ;;  %p3435_p6 = scmp.ge.s32.totalorder %s3975_s6, 2 }
 0x48a   : > { %s7078_s28 = sld [smem:[#allocation26_spill]] }
 0x48f   : > { %s3227_s3 = sand.u32 1, %s7077_s19  }
 0x490   : > { %p7079_p12 = scmp.ne.s32.totalorder %s7078_s28, 0  ;;  %s3228_s8 = scalar_lea.sflag [#allocation5], %s3227_s3 }
 0x492   : > { %p3427_p3 = pnand %p3435_p6, %p7079_p12 }
 0x494   : > { %p3428_p11 = pneg %p3427_p3 }
 0x496   : > { %3918 = dma.done.wait (%p3428_p11), %s3228_s8, 24576  }
 0x497   : > { %3920 = vsyncadd (%p3428_p11), %s3228_s8, 4294942720  ;;  %s25_s6 = sadd.s32 1, %s3975_s6   ;;  %s7081_s18 = sld [smem:[#allocation18_spill]] }
 0x498   : > { %p6456_p13 = scmp.ge.s32.totalorder %s25_s6, 6   ;;  %s7082_s21 = sld [smem:[#allocation19_spill]] }
 0x499   : > { %s7083_s16 = sld [smem:[#allocation27_spill]]  ;;  %s7086_s19 = smov %s3931_s20 }
 0x49a   : > { %s7084_s9 = sld [smem:[#allocation28_spill]]  ;;  %s7087_s20 = smov %s4227_s2 }
 0x49b   : > { %s7088_s22 = smov %s3943_s23  ;;  %s7089_s23 = smov %s4217_s24 }
 0x49c   : > { %s7090_s24 = smov %s3951_s25  ;;  %s7091_s25 = smov %s3955_s26 }
 0x49d   : > { %s7092_s26 = smov %s4222_s27  ;;  %s7093_s27 = smov %s3967_s29 }
 0x49e   : > { %s7094_s28 = smov %s3971_s30  ;;  %24 = sbr.rel (!%p6456_p13) target bundleno = 19 (0x13), region = 121 }
 0x49f   : > { %s7095_s29 = smov %s7083_s16 }
 0x4a0   : > { %s7096_s30 = smov %s7084_s9 }
 0x4a3   :  { %3233 = vsyncpa [#allocation4], 1 }
 0x4a4   :  { %3235 = vsyncpa [#allocation4 + $0x1], 1 }
 0x4a5   :  { %3236 = vsyncpa [#allocation7], 1 }
 0x4a6   :  { %3237 = vsyncpa [#allocation10], 1 }
 0x4a7   :  { %3239 = vsyncpa [#allocation10 + $0x1], 1 }
 0x4a8   :  { %3240 = vsyncpa [#allocation5], 1 }
 0x4a9   :  { %3242 = vsyncpa [#allocation5 + $0x1], 1 }

</bundles_post_ra>
